<compile_context>
chip_gen: v7x
topology: tpu7x:2x2x1
jax: 0.10.0
libtpu: 0.0.40
codegen_flags: <defaults>
</compile_context>

<pallas_src>
import math

import jax
import jax.numpy as jnp
from jax.experimental import pallas as pl
from jax.experimental.pallas import tpu as pltpu

BN_EPS = 1e-5
LEAKY_SLOPE = 0.01          # nn.LeakyReLU default

_MAX_TILE_COLS = 1024       # flattened-voxel columns per grid step; deepest layer
                            # (K = 27*64 = 1728, bf16) keeps double-buffered
                            # operands ~8 MiB -> fits v7x's 64 MiB VMEM easily.
_VMEM_LIMIT_BYTES = 48 * 1024 * 1024   # < v7x physical 64 MiB, raises the
                                       # 16/32 MiB scoped defaults on v5e/v6e.


def _compiler_params():
    return pltpu.CompilerParams(
        # every column tile is independent -> lets v7x shard across its 2 TCs
        dimension_semantics=("parallel",),
        vmem_limit_bytes=_VMEM_LIMIT_BYTES,
    )


def _tile_cols(m):
    """Pick a lane-dense column tile (multiple of 128) and the padded width."""
    if m >= _MAX_TILE_COLS:
        tm = _MAX_TILE_COLS
    else:
        tm = max(128, ((m + 127) // 128) * 128)
    mp = ((m + tm - 1) // tm) * tm
    return tm, mp


# ----------------------------- Pallas kernels -----------------------------

def _conv_bn_lrelu_kernel(x_ref, w_ref, shift_ref, o_ref):
    # x: (27*Cin, TM) bf16 transposed im2col patches (lane-dense),
    # w: (Cout, 27*Cin) bf16 = conv weight * eval-BN scale (folded),
    # shift: (Cout, 1) f32 = conv_bias * bn_scale + bn_shift.
    y = jnp.dot(w_ref[...], x_ref[...], preferred_element_type=jnp.float32)
    y = y + shift_ref[...]
    o_ref[...] = jnp.where(y >= 0.0, y, LEAKY_SLOPE * y).astype(o_ref.dtype)


def _maxpool_kernel(x_ref, o_ref):
    # x: (8, C, TM) -- the 8 taps of each 2x2x2 pooling window; reduce over taps.
    m = x_ref[0]
    for t in range(1, x_ref.shape[0]):
        m = jnp.maximum(m, x_ref[t])
    o_ref[...] = m


def _final_conv_softmax2_kernel(x_ref, w_ref, b_ref, o_ref):
    # 1x1x1 conv (channel matmul) + softmax over 2 channels, written as the
    # sigmoid of the logit difference (no cross-lane reductions needed).
    y = jnp.dot(w_ref[...], x_ref[...], preferred_element_type=jnp.float32)
    y = y + b_ref[...]
    d = y[0:1, :] - y[1:2, :]
    p0 = 1.0 / (1.0 + jnp.exp(-d))
    o_ref[0:1, :] = p0
    o_ref[1:2, :] = 1.0 - p0


def _final_conv_softmax_kernel(x_ref, w_ref, b_ref, o_ref):
    # General-Cout fallback: softmax over the channel (sublane) axis.
    y = jnp.dot(w_ref[...], x_ref[...], preferred_element_type=jnp.float32)
    y = y + b_ref[...]
    y = y - jnp.max(y, axis=0, keepdims=True)
    e = jnp.exp(y)
    o_ref[...] = e / jnp.sum(e, axis=0, keepdims=True)


# ----------------------------- wrappers -----------------------------

def conv3x3x3_bn_lrelu(x, spatial, w_t, shift):
    """x: (Cin, M) bf16, channel-major.  Returns (Cout, M) bf16."""
    N, D, H, W = spatial
    Cin = x.shape[0]
    Cout, K = w_t.shape
    M = N * D * H * W

    # glue: zero-pad + transposed im2col (pure data movement, XLA).
    # TODO(synk): do this inside the kernel with halo'd blocks to avoid the
    #             27x HBM materialization of the patch matrix.
    xp = jnp.pad(x.reshape(Cin, N, D, H, W),
                 ((0, 0), (0, 0), (1, 1), (1, 1), (1, 1)))
    rows = []
    for kd in range(3):
        for kh in range(3):
            for kw in range(3):
                rows.append(
                    xp[:, :, kd:kd + D, kh:kh + H, kw:kw + W].reshape(Cin, M))
    patches = jnp.concatenate(rows, axis=0)              # (K, M) bf16

    TM, Mp = _tile_cols(M)
    if Mp != M:
        patches = jnp.pad(patches, ((0, 0), (0, Mp - M)))

    out = pl.pallas_call(
        _conv_bn_lrelu_kernel,
        out_shape=jax.ShapeDtypeStruct((Cout, Mp), jnp.bfloat16),
        grid=(Mp // TM,),
        in_specs=[
            pl.BlockSpec((K, TM), lambda i: (0, i)),
            pl.BlockSpec((Cout, K), lambda i: (0, 0)),
            pl.BlockSpec((Cout, 1), lambda i: (0, 0)),
        ],
        out_specs=pl.BlockSpec((Cout, TM), lambda i: (0, i)),
        compiler_params=_compiler_params(),
    )(patches, w_t, shift)
    return out[:, :M] if Mp != M else out


def maxpool2x2x2_s2(x, spatial):
    """MaxPool3d(kernel=2, stride=2, padding=0).  x: (C, M) channel-major."""
    N, D, H, W = spatial
    C = x.shape[0]
    Do, Ho, Wo = D // 2, H // 2, W // 2
    Mo = N * Do * Ho * Wo

    xv = x.reshape(C, N, D, H, W)[:, :, :2 * Do, :2 * Ho, :2 * Wo]
    taps = [xv[:, :, dd::2, hh::2, ww::2].reshape(C, Mo)
            for dd in range(2) for hh in range(2) for ww in range(2)]
    stacked = jnp.stack(taps, axis=0)                    # (8, C, Mo)

    TM, Mp = _tile_cols(Mo)
    if Mp != Mo:
        stacked = jnp.pad(stacked, ((0, 0), (0, 0), (0, Mp - Mo)))

    out = pl.pallas_call(
        _maxpool_kernel,
        out_shape=jax.ShapeDtypeStruct((C, Mp), x.dtype),
        grid=(Mp // TM,),
        in_specs=[pl.BlockSpec((8, C, TM), lambda i: (0, 0, i))],
        out_specs=pl.BlockSpec((C, TM), lambda i: (0, i)),
        compiler_params=_compiler_params(),
    )(stacked)
    out = out[:, :Mo] if Mp != Mo else out
    return out, (N, Do, Ho, Wo)


def upsample_nearest2(x, spatial):
    """F.interpolate(scale_factor=2, mode='nearest'): one broadcast + reshape."""
    N, D, H, W = spatial
    C = x.shape[0]
    xv = x.reshape(C, N, D, 1, H, 1, W, 1)
    xv = jnp.broadcast_to(xv, (C, N, D, 2, H, 2, W, 2))
    return xv.reshape(C, N * 8 * D * H * W), (N, 2 * D, 2 * H, 2 * W)


def final_conv1x1_softmax(x, w_t, b):
    """Conv3d(Cin, Cout, kernel=1) + Softmax over channels.  x: (Cin, M)."""
    Cin, M = x.shape
    Cout = w_t.shape[0]
    TM, Mp = _tile_cols(M)
    if Mp != M:
        x = jnp.pad(x, ((0, 0), (0, Mp - M)))
    kernel = _final_conv_softmax2_kernel if Cout == 2 else _final_conv_softmax_kernel
    out = pl.pallas_call(
        kernel,
        out_shape=jax.ShapeDtypeStruct((Cout, Mp), jnp.float32),
        grid=(Mp // TM,),
        in_specs=[
            pl.BlockSpec((Cin, TM), lambda i: (0, i)),
            pl.BlockSpec((Cout, Cin), lambda i: (0, 0)),
            pl.BlockSpec((Cout, 1), lambda i: (0, 0)),
        ],
        out_specs=pl.BlockSpec((Cout, TM), lambda i: (0, i)),
        compiler_params=_compiler_params(),
    )(x, w_t, b)
    return out[:, :M] if Mp != M else out


# ----------------------------- parameters -----------------------------

def _conv_param(key, cin, cout, k=3):
    # PyTorch init in DownUp: normal(0, sqrt(2 / (ks[0]*ks[1]*out_channels)))
    # (note: the reference intentionally uses the 2D fan formula), bias zero.
    n = k * k * cout
    std = math.sqrt(2.0 / n)
    w = std * jax.random.normal(key, (k, k, k, cin, cout), dtype=jnp.float32)
    b = jnp.zeros((cout,), jnp.float32)
    # eval-mode BatchNorm3d (gamma=1, beta=0, mean=0, var=1) folded into weights.
    bn_scale = 1.0 / math.sqrt(1.0 + BN_EPS)
    bn_shift = 0.0
    w_t = (w * bn_scale).reshape(k * k * k * cin, cout).T        # (Cout, K)
    shift = (b * bn_scale + bn_shift).reshape(cout, 1)           # (Cout, 1)
    return dict(w_t=w_t.astype(jnp.bfloat16), shift=shift.astype(jnp.float32))


def _double_conv_channels(cin, cout):
    if cin < cout:
        return (cin, cout // 2), (cout // 2, cout)
    return (cin, cout), (cout, cout)


def make_params(key, in_channels=1, out_channels=2, f=8):
    enc_specs = [(in_channels, f), (f, 2 * f), (2 * f, 4 * f), (4 * f, 8 * f)]
    dec_specs = [(8 * f, 4 * f), (4 * f, 2 * f), (2 * f, f)]
    keys = jax.random.split(key, 2 * (len(enc_specs) + len(dec_specs)) + 1)
    ki = 0
    params = {"encoders": [], "decoders": []}
    for cin, cout in enc_specs:
        (a_in, a_out), (b_in, b_out) = _double_conv_channels(cin, cout)
        params["encoders"].append((_conv_param(keys[ki], a_in, a_out),
                                   _conv_param(keys[ki + 1], b_in, b_out)))
        ki += 2
    for cin, cout in dec_specs:
        (a_in, a_out), (b_in, b_out) = _double_conv_channels(cin, cout)
        params["decoders"].append((_conv_param(keys[ki], a_in, a_out),
                                   _conv_param(keys[ki + 1], b_in, b_out)))
        ki += 2
    n_final = 1 * 1 * out_channels
    w_final = math.sqrt(2.0 / n_final) * jax.random.normal(
        keys[ki], (out_channels, f), dtype=jnp.float32)          # (Cout, Cin)
    params["final_w_t"] = w_final.astype(jnp.bfloat16)
    params["final_b"] = jnp.zeros((out_channels, 1), jnp.float32)
    return params


# ----------------------------- forward -----------------------------

def double_conv(x, spatial, dc_params):
    for p in dc_params:
        x = conv3x3x3_bn_lrelu(x, spatial, p["w_t"], p["shift"])
    return x


def downup_forward(x_ncdhw, params):
    N, Cin, D0, H0, W0 = x_ncdhw.shape
    spatial = (N, D0, H0, W0)
    # NCDHW -> channel-major (C, N*D*H*W), bf16 activations (MXU-native).
    x = jnp.transpose(x_ncdhw, (1, 0, 2, 3, 4)).reshape(Cin, -1)
    x = x.astype(jnp.bfloat16)

    # Encoders: first has no max-pool; the rest pool 2x2x2 stride 2 first.
    x = double_conv(x, spatial, params["encoders"][0])
    for enc in params["encoders"][1:]:
        x, spatial = maxpool2x2x2_s2(x, spatial)
        x = double_conv(x, spatial, enc)

    # Decoders: nearest x2 upsample + DoubleConv (the `size` argument is unused
    # in the reference Decoder.forward as well).
    for dec in params["decoders"]:
        x, spatial = upsample_nearest2(x, spatial)
        x = double_conv(x, spatial, dec)

    # Final 1x1x1 conv + Softmax over channels (eval-mode forward).
    x = final_conv1x1_softmax(x, params["final_w_t"], params["final_b"])

    Cout = x.shape[0]
    n, d, h, w = spatial
    out = jnp.transpose(x.reshape(Cout, n, d, h, w), (1, 0, 2, 3, 4))  # NCDHW
    xd = D0 - out.shape[2]
    yd = H0 - out.shape[3]
    zd = W0 - out.shape[4]
    if xd + yd + zd != 0:
        out = jnp.pad(out, ((0, 0), (0, 0), (0, xd), (0, yd), (0, zd)))
    return out


if __name__ == "__main__":
    key = jax.random.PRNGKey(0)
    kp, kx = jax.random.split(key)

    # Small but structure-consistent config: init_channel_number=8 (constructor
    # argument of DownUp), in_channels=1, out_channels=2, spatial 8^3, batch 1.
    f = 8
    params = make_params(kp, in_channels=1, out_channels=2, f=f)
    x = jax.random.normal(kx, (1, 1, 8, 8, 8), dtype=jnp.float32)  # NCDHW

    fwd = jax.jit(downup_forward)
    out = jax.block_until_ready(fwd(x, params))

    assert out.shape == (1, 2, 8, 8, 8), out.shape
    # final activation is Softmax over channels -> sums to 1 everywhere
    s = jnp.sum(out, axis=1)
    assert bool(jnp.allclose(s, 1.0, atol=1e-4)), "softmax channel-sum check failed"

    print("KERNEL_OK")
</pallas_src>

<mosaic_0001>
module attributes {stable_mosaic.version = 11 : i64} {
  func.func @_conv_bn_lrelu_kernel(%arg0: i32, %arg1: memref<27x512xbf16, #tpu.memory_space<vmem>>, %arg2: memref<4x27xbf16, #tpu.memory_space<vmem>>, %arg3: memref<4x1xf32, #tpu.memory_space<vmem>>, %arg4: memref<4x512xbf16, #tpu.memory_space<vmem>>) attributes {dimension_semantics = [#tpu.dimension_semantics<parallel>], iteration_bounds = array<i64: 1>, scalar_prefetch = 0 : i64, scratch_operands = 0 : i64, tpu.core_type = #tpu.core_type<tc>, window_params = [{transform_indices = @transform_0, window_bounds = array<i64: 27, 512>}, {pipeline_mode = #tpu.pipeline_mode<synchronous>, transform_indices = @transform_1, window_bounds = array<i64: 4, 27>}, {pipeline_mode = #tpu.pipeline_mode<synchronous>, transform_indices = @transform_2, window_bounds = array<i64: 4, 1>}, {transform_indices = @transform_3, window_bounds = array<i64: 4, 512>}]} {
    %c0 = arith.constant 0 : index
    %c0_0 = arith.constant 0 : index
    %0 = vector.load %arg2[%c0, %c0_0] : memref<4x27xbf16, #tpu.memory_space<vmem>>, vector<4x27xbf16>
    %c0_1 = arith.constant 0 : index
    %c0_2 = arith.constant 0 : index
    %1 = vector.load %arg1[%c0_1, %c0_2] : memref<27x512xbf16, #tpu.memory_space<vmem>>, vector<27x512xbf16>
    %cst = arith.constant dense<0.000000e+00> : vector<4x512xf32>
    %2 = tpu.matmul %0, %1, %cst {dimension_numbers = #tpu.dot_dimension_numbers<[1], [0], [0], [1], [0, 0, 1, 1], [], []>} : vector<4x27xbf16>, vector<27x512xbf16>, vector<4x512xf32> -> vector<4x512xf32>
    %c0_3 = arith.constant 0 : index
    %c0_4 = arith.constant 0 : index
    %3 = vector.load %arg3[%c0_3, %c0_4] : memref<4x1xf32, #tpu.memory_space<vmem>>, vector<4x1xf32>
    %4 = vector.broadcast %3 : vector<4x1xf32> to vector<4x512xf32>
    %5 = arith.addf %2, %4 : vector<4x512xf32>
    %cst_5 = arith.constant 0.000000e+00 : f32
    %6 = vector.broadcast %cst_5 : f32 to vector<4x512xf32>
    %7 = arith.cmpf oge, %5, %6 : vector<4x512xf32>
    %cst_6 = arith.constant 0.00999999977 : f32
    %8 = vector.broadcast %cst_6 : f32 to vector<4x512xf32>
    %9 = arith.mulf %8, %5 : vector<4x512xf32>
    %10 = arith.select %7, %5, %9 : vector<4x512xi1>, vector<4x512xf32>
    %11 = arith.truncf %10 : vector<4x512xf32> to vector<4x512xbf16>
    %c0_7 = arith.constant 0 : index
    %c0_8 = arith.constant 0 : index
    %12 = vector.load %arg4[%c0_7, %c0_8] : memref<4x512xbf16, #tpu.memory_space<vmem>>, vector<4x512xbf16>
    tpu.vector_store %arg4[%c0_7, %c0_8], %11 {strides = array<i32>} : memref<4x512xbf16, #tpu.memory_space<vmem>>, vector<4x512xbf16>,
    return
  }
  func.func @transform_0(%arg0: i32) -> (i32, i32) {
    %c0_i32 = arith.constant 0 : i32
    %c0_i32_0 = arith.constant 0 : i32
    return %c0_i32, %arg0 : i32, i32
  }
  func.func @transform_1(%arg0: i32) -> (i32, i32) {
    %c0_i32 = arith.constant 0 : i32
    %c0_i32_0 = arith.constant 0 : i32
    %c0_i32_1 = arith.constant 0 : i32
    return %c0_i32, %c0_i32_0 : i32, i32
  }
  func.func @transform_2(%arg0: i32) -> (i32, i32) {
    %c0_i32 = arith.constant 0 : i32
    %c0_i32_0 = arith.constant 0 : i32
    %c0_i32_1 = arith.constant 0 : i32
    return %c0_i32, %c0_i32_0 : i32, i32
  }
  func.func @transform_3(%arg0: i32) -> (i32, i32) {
    %c0_i32 = arith.constant 0 : i32
    %c0_i32_0 = arith.constant 0 : i32
    return %c0_i32, %arg0 : i32, i32
  }
}

module attributes {stable_mosaic.version = 11 : i64} {
  func.func @_conv_bn_lrelu_kernel(%arg0: i32, %arg1: memref<108x512xbf16, #tpu.memory_space<vmem>>, %arg2: memref<8x108xbf16, #tpu.memory_space<vmem>>, %arg3: memref<8x1xf32, #tpu.memory_space<vmem>>, %arg4: memref<8x512xbf16, #tpu.memory_space<vmem>>) attributes {dimension_semantics = [#tpu.dimension_semantics<parallel>], iteration_bounds = array<i64: 1>, scalar_prefetch = 0 : i64, scratch_operands = 0 : i64, tpu.core_type = #tpu.core_type<tc>, window_params = [{transform_indices = @transform_0, window_bounds = array<i64: 108, 512>}, {pipeline_mode = #tpu.pipeline_mode<synchronous>, transform_indices = @transform_1, window_bounds = array<i64: 8, 108>}, {pipeline_mode = #tpu.pipeline_mode<synchronous>, transform_indices = @transform_2, window_bounds = array<i64: 8, 1>}, {transform_indices = @transform_3, window_bounds = array<i64: 8, 512>}]} {
    %c0 = arith.constant 0 : index
    %c0_0 = arith.constant 0 : index
    %0 = vector.load %arg2[%c0, %c0_0] : memref<8x108xbf16, #tpu.memory_space<vmem>>, vector<8x108xbf16>
    %c0_1 = arith.constant 0 : index
    %c0_2 = arith.constant 0 : index
    %1 = vector.load %arg1[%c0_1, %c0_2] : memref<108x512xbf16, #tpu.memory_space<vmem>>, vector<108x512xbf16>
    %cst = arith.constant dense<0.000000e+00> : vector<8x512xf32>
    %2 = tpu.matmul %0, %1, %cst {dimension_numbers = #tpu.dot_dimension_numbers<[1], [0], [0], [1], [0, 0, 1, 1], [], []>} : vector<8x108xbf16>, vector<108x512xbf16>, vector<8x512xf32> -> vector<8x512xf32>
    %c0_3 = arith.constant 0 : index
    %c0_4 = arith.constant 0 : index
    %3 = vector.load %arg3[%c0_3, %c0_4] : memref<8x1xf32, #tpu.memory_space<vmem>>, vector<8x1xf32>
    %4 = vector.broadcast %3 : vector<8x1xf32> to vector<8x512xf32>
    %5 = arith.addf %2, %4 : vector<8x512xf32>
    %cst_5 = arith.constant 0.000000e+00 : f32
    %6 = vector.broadcast %cst_5 : f32 to vector<8x512xf32>
    %7 = arith.cmpf oge, %5, %6 : vector<8x512xf32>
    %cst_6 = arith.constant 0.00999999977 : f32
    %8 = vector.broadcast %cst_6 : f32 to vector<8x512xf32>
    %9 = arith.mulf %8, %5 : vector<8x512xf32>
    %10 = arith.select %7, %5, %9 : vector<8x512xi1>, vector<8x512xf32>
    %11 = arith.truncf %10 : vector<8x512xf32> to vector<8x512xbf16>
    %c0_7 = arith.constant 0 : index
    %c0_8 = arith.constant 0 : index
    %12 = vector.load %arg4[%c0_7, %c0_8] : memref<8x512xbf16, #tpu.memory_space<vmem>>, vector<8x512xbf16>
    tpu.vector_store %arg4[%c0_7, %c0_8], %11 {strides = array<i32>} : memref<8x512xbf16, #tpu.memory_space<vmem>>, vector<8x512xbf16>,
    return
  }
  func.func @transform_0(%arg0: i32) -> (i32, i32) {
    %c0_i32 = arith.constant 0 : i32
    %c0_i32_0 = arith.constant 0 : i32
    return %c0_i32, %arg0 : i32, i32
  }
  func.func @transform_1(%arg0: i32) -> (i32, i32) {
    %c0_i32 = arith.constant 0 : i32
    %c0_i32_0 = arith.constant 0 : i32
    %c0_i32_1 = arith.constant 0 : i32
    return %c0_i32, %c0_i32_0 : i32, i32
  }
  func.func @transform_2(%arg0: i32) -> (i32, i32) {
    %c0_i32 = arith.constant 0 : i32
    %c0_i32_0 = arith.constant 0 : i32
    %c0_i32_1 = arith.constant 0 : i32
    return %c0_i32, %c0_i32_0 : i32, i32
  }
  func.func @transform_3(%arg0: i32) -> (i32, i32) {
    %c0_i32 = arith.constant 0 : i32
    %c0_i32_0 = arith.constant 0 : i32
    return %c0_i32, %arg0 : i32, i32
  }
}

module attributes {stable_mosaic.version = 11 : i64} {
  func.func @_maxpool_kernel(%arg0: i32, %arg1: memref<8x8x128xbf16, #tpu.memory_space<vmem>>, %arg2: memref<8x128xbf16, #tpu.memory_space<vmem>>) attributes {dimension_semantics = [#tpu.dimension_semantics<parallel>], iteration_bounds = array<i64: 1>, scalar_prefetch = 0 : i64, scratch_operands = 0 : i64, tpu.core_type = #tpu.core_type<tc>, window_params = [{transform_indices = @transform_0, window_bounds = array<i64: 8, 8, 128>}, {transform_indices = @transform_1, window_bounds = array<i64: 8, 128>}]} {
    %c0 = arith.constant 0 : index
    %c0_0 = arith.constant 0 : index
    %c0_1 = arith.constant 0 : index
    %0 = vector.load %arg1[%c0, %c0_0, %c0_1] : memref<8x8x128xbf16, #tpu.memory_space<vmem>>, vector<1x8x128xbf16>
    %1 = vector.shape_cast %0 : vector<1x8x128xbf16> to vector<8x128xbf16>
    %c1 = arith.constant 1 : index
    %c0_2 = arith.constant 0 : index
    %c0_3 = arith.constant 0 : index
    %2 = vector.load %arg1[%c1, %c0_2, %c0_3] : memref<8x8x128xbf16, #tpu.memory_space<vmem>>, vector<1x8x128xbf16>
    %3 = vector.shape_cast %2 : vector<1x8x128xbf16> to vector<8x128xbf16>
    %4 = arith.maximumf %1, %3 : vector<8x128xbf16>
    %c2 = arith.constant 2 : index
    %c0_4 = arith.constant 0 : index
    %c0_5 = arith.constant 0 : index
    %5 = vector.load %arg1[%c2, %c0_4, %c0_5] : memref<8x8x128xbf16, #tpu.memory_space<vmem>>, vector<1x8x128xbf16>
    %6 = vector.shape_cast %5 : vector<1x8x128xbf16> to vector<8x128xbf16>
    %7 = arith.maximumf %4, %6 : vector<8x128xbf16>
    %c3 = arith.constant 3 : index
    %c0_6 = arith.constant 0 : index
    %c0_7 = arith.constant 0 : index
    %8 = vector.load %arg1[%c3, %c0_6, %c0_7] : memref<8x8x128xbf16, #tpu.memory_space<vmem>>, vector<1x8x128xbf16>
    %9 = vector.shape_cast %8 : vector<1x8x128xbf16> to vector<8x128xbf16>
    %10 = arith.maximumf %7, %9 : vector<8x128xbf16>
    %c4 = arith.constant 4 : index
    %c0_8 = arith.constant 0 : index
    %c0_9 = arith.constant 0 : index
    %11 = vector.load %arg1[%c4, %c0_8, %c0_9] : memref<8x8x128xbf16, #tpu.memory_space<vmem>>, vector<1x8x128xbf16>
    %12 = vector.shape_cast %11 : vector<1x8x128xbf16> to vector<8x128xbf16>
    %13 = arith.maximumf %10, %12 : vector<8x128xbf16>
    %c5 = arith.constant 5 : index
    %c0_10 = arith.constant 0 : index
    %c0_11 = arith.constant 0 : index
    %14 = vector.load %arg1[%c5, %c0_10, %c0_11] : memref<8x8x128xbf16, #tpu.memory_space<vmem>>, vector<1x8x128xbf16>
    %15 = vector.shape_cast %14 : vector<1x8x128xbf16> to vector<8x128xbf16>
    %16 = arith.maximumf %13, %15 : vector<8x128xbf16>
    %c6 = arith.constant 6 : index
    %c0_12 = arith.constant 0 : index
    %c0_13 = arith.constant 0 : index
    %17 = vector.load %arg1[%c6, %c0_12, %c0_13] : memref<8x8x128xbf16, #tpu.memory_space<vmem>>, vector<1x8x128xbf16>
    %18 = vector.shape_cast %17 : vector<1x8x128xbf16> to vector<8x128xbf16>
    %19 = arith.maximumf %16, %18 : vector<8x128xbf16>
    %c7 = arith.constant 7 : index
    %c0_14 = arith.constant 0 : index
    %c0_15 = arith.constant 0 : index
    %20 = vector.load %arg1[%c7, %c0_14, %c0_15] : memref<8x8x128xbf16, #tpu.memory_space<vmem>>, vector<1x8x128xbf16>
    %21 = vector.shape_cast %20 : vector<1x8x128xbf16> to vector<8x128xbf16>
    %22 = arith.maximumf %19, %21 : vector<8x128xbf16>
    %c0_16 = arith.constant 0 : index
    %c0_17 = arith.constant 0 : index
    %23 = vector.load %arg2[%c0_16, %c0_17] : memref<8x128xbf16, #tpu.memory_space<vmem>>, vector<8x128xbf16>
    tpu.vector_store %arg2[%c0_16, %c0_17], %22 {strides = array<i32>} : memref<8x128xbf16, #tpu.memory_space<vmem>>, vector<8x128xbf16>,
    return
  }
  func.func @transform_0(%arg0: i32) -> (i32, i32, i32) {
    %c0_i32 = arith.constant 0 : i32
    %c0_i32_0 = arith.constant 0 : i32
    %c0_i32_1 = arith.constant 0 : i32
    return %c0_i32, %c0_i32_0, %arg0 : i32, i32, i32
  }
  func.func @transform_1(%arg0: i32) -> (i32, i32) {
    %c0_i32 = arith.constant 0 : i32
    %c0_i32_0 = arith.constant 0 : i32
    return %c0_i32, %arg0 : i32, i32
  }
}

module attributes {stable_mosaic.version = 11 : i64} {
  func.func @_conv_bn_lrelu_kernel(%arg0: i32, %arg1: memref<216x128xbf16, #tpu.memory_space<vmem>>, %arg2: memref<16x216xbf16, #tpu.memory_space<vmem>>, %arg3: memref<16x1xf32, #tpu.memory_space<vmem>>, %arg4: memref<16x128xbf16, #tpu.memory_space<vmem>>) attributes {dimension_semantics = [#tpu.dimension_semantics<parallel>], iteration_bounds = array<i64: 1>, scalar_prefetch = 0 : i64, scratch_operands = 0 : i64, tpu.core_type = #tpu.core_type<tc>, window_params = [{transform_indices = @transform_0, window_bounds = array<i64: 216, 128>}, {pipeline_mode = #tpu.pipeline_mode<synchronous>, transform_indices = @transform_1, window_bounds = array<i64: 16, 216>}, {pipeline_mode = #tpu.pipeline_mode<synchronous>, transform_indices = @transform_2, window_bounds = array<i64: 16, 1>}, {transform_indices = @transform_3, window_bounds = array<i64: 16, 128>}]} {
    %c0 = arith.constant 0 : index
    %c0_0 = arith.constant 0 : index
    %0 = vector.load %arg2[%c0, %c0_0] : memref<16x216xbf16, #tpu.memory_space<vmem>>, vector<16x216xbf16>
    %c0_1 = arith.constant 0 : index
    %c0_2 = arith.constant 0 : index
    %1 = vector.load %arg1[%c0_1, %c0_2] : memref<216x128xbf16, #tpu.memory_space<vmem>>, vector<216x128xbf16>
    %cst = arith.constant dense<0.000000e+00> : vector<16x128xf32>
    %2 = tpu.matmul %0, %1, %cst {dimension_numbers = #tpu.dot_dimension_numbers<[1], [0], [0], [1], [0, 0, 1, 1], [], []>} : vector<16x216xbf16>, vector<216x128xbf16>, vector<16x128xf32> -> vector<16x128xf32>
    %c0_3 = arith.constant 0 : index
    %c0_4 = arith.constant 0 : index
    %3 = vector.load %arg3[%c0_3, %c0_4] : memref<16x1xf32, #tpu.memory_space<vmem>>, vector<16x1xf32>
    %4 = vector.broadcast %3 : vector<16x1xf32> to vector<16x128xf32>
    %5 = arith.addf %2, %4 : vector<16x128xf32>
    %cst_5 = arith.constant 0.000000e+00 : f32
    %6 = vector.broadcast %cst_5 : f32 to vector<16x128xf32>
    %7 = arith.cmpf oge, %5, %6 : vector<16x128xf32>
    %cst_6 = arith.constant 0.00999999977 : f32
    %8 = vector.broadcast %cst_6 : f32 to vector<16x128xf32>
    %9 = arith.mulf %8, %5 : vector<16x128xf32>
    %10 = arith.select %7, %5, %9 : vector<16x128xi1>, vector<16x128xf32>
    %11 = arith.truncf %10 : vector<16x128xf32> to vector<16x128xbf16>
    %c0_7 = arith.constant 0 : index
    %c0_8 = arith.constant 0 : index
    %12 = vector.load %arg4[%c0_7, %c0_8] : memref<16x128xbf16, #tpu.memory_space<vmem>>, vector<16x128xbf16>
    tpu.vector_store %arg4[%c0_7, %c0_8], %11 {strides = array<i32>} : memref<16x128xbf16, #tpu.memory_space<vmem>>, vector<16x128xbf16>,
    return
  }
  func.func @transform_0(%arg0: i32) -> (i32, i32) {
    %c0_i32 = arith.constant 0 : i32
    %c0_i32_0 = arith.constant 0 : i32
    return %c0_i32, %arg0 : i32, i32
  }
  func.func @transform_1(%arg0: i32) -> (i32, i32) {
    %c0_i32 = arith.constant 0 : i32
    %c0_i32_0 = arith.constant 0 : i32
    %c0_i32_1 = arith.constant 0 : i32
    return %c0_i32, %c0_i32_0 : i32, i32
  }
  func.func @transform_2(%arg0: i32) -> (i32, i32) {
    %c0_i32 = arith.constant 0 : i32
    %c0_i32_0 = arith.constant 0 : i32
    %c0_i32_1 = arith.constant 0 : i32
    return %c0_i32, %c0_i32_0 : i32, i32
  }
  func.func @transform_3(%arg0: i32) -> (i32, i32) {
    %c0_i32 = arith.constant 0 : i32
    %c0_i32_0 = arith.constant 0 : i32
    return %c0_i32, %arg0 : i32, i32
  }
}

module attributes {stable_mosaic.version = 11 : i64} {
  func.func @_conv_bn_lrelu_kernel(%arg0: i32, %arg1: memref<216x128xbf16, #tpu.memory_space<vmem>>, %arg2: memref<8x216xbf16, #tpu.memory_space<vmem>>, %arg3: memref<8x1xf32, #tpu.memory_space<vmem>>, %arg4: memref<8x128xbf16, #tpu.memory_space<vmem>>) attributes {dimension_semantics = [#tpu.dimension_semantics<parallel>], iteration_bounds = array<i64: 1>, scalar_prefetch = 0 : i64, scratch_operands = 0 : i64, tpu.core_type = #tpu.core_type<tc>, window_params = [{transform_indices = @transform_0, window_bounds = array<i64: 216, 128>}, {pipeline_mode = #tpu.pipeline_mode<synchronous>, transform_indices = @transform_1, window_bounds = array<i64: 8, 216>}, {pipeline_mode = #tpu.pipeline_mode<synchronous>, transform_indices = @transform_2, window_bounds = array<i64: 8, 1>}, {transform_indices = @transform_3, window_bounds = array<i64: 8, 128>}]} {
    %c0 = arith.constant 0 : index
    %c0_0 = arith.constant 0 : index
    %0 = vector.load %arg2[%c0, %c0_0] : memref<8x216xbf16, #tpu.memory_space<vmem>>, vector<8x216xbf16>
    %c0_1 = arith.constant 0 : index
    %c0_2 = arith.constant 0 : index
    %1 = vector.load %arg1[%c0_1, %c0_2] : memref<216x128xbf16, #tpu.memory_space<vmem>>, vector<216x128xbf16>
    %cst = arith.constant dense<0.000000e+00> : vector<8x128xf32>
    %2 = tpu.matmul %0, %1, %cst {dimension_numbers = #tpu.dot_dimension_numbers<[1], [0], [0], [1], [0, 0, 1, 1], [], []>} : vector<8x216xbf16>, vector<216x128xbf16>, vector<8x128xf32> -> vector<8x128xf32>
    %c0_3 = arith.constant 0 : index
    %c0_4 = arith.constant 0 : index
    %3 = vector.load %arg3[%c0_3, %c0_4] : memref<8x1xf32, #tpu.memory_space<vmem>>, vector<8x1xf32>
    %4 = vector.broadcast %3 : vector<8x1xf32> to vector<8x128xf32>
    %5 = arith.addf %2, %4 : vector<8x128xf32>
    %cst_5 = arith.constant 0.000000e+00 : f32
    %6 = vector.broadcast %cst_5 : f32 to vector<8x128xf32>
    %7 = arith.cmpf oge, %5, %6 : vector<8x128xf32>
    %cst_6 = arith.constant 0.00999999977 : f32
    %8 = vector.broadcast %cst_6 : f32 to vector<8x128xf32>
    %9 = arith.mulf %8, %5 : vector<8x128xf32>
    %10 = arith.select %7, %5, %9 : vector<8x128xi1>, vector<8x128xf32>
    %11 = arith.truncf %10 : vector<8x128xf32> to vector<8x128xbf16>
    %c0_7 = arith.constant 0 : index
    %c0_8 = arith.constant 0 : index
    %12 = vector.load %arg4[%c0_7, %c0_8] : memref<8x128xbf16, #tpu.memory_space<vmem>>, vector<8x128xbf16>
    tpu.vector_store %arg4[%c0_7, %c0_8], %11 {strides = array<i32>} : memref<8x128xbf16, #tpu.memory_space<vmem>>, vector<8x128xbf16>,
    return
  }
  func.func @transform_0(%arg0: i32) -> (i32, i32) {
    %c0_i32 = arith.constant 0 : i32
    %c0_i32_0 = arith.constant 0 : i32
    return %c0_i32, %arg0 : i32, i32
  }
  func.func @transform_1(%arg0: i32) -> (i32, i32) {
    %c0_i32 = arith.constant 0 : i32
    %c0_i32_0 = arith.constant 0 : i32
    %c0_i32_1 = arith.constant 0 : i32
    return %c0_i32, %c0_i32_0 : i32, i32
  }
  func.func @transform_2(%arg0: i32) -> (i32, i32) {
    %c0_i32 = arith.constant 0 : i32
    %c0_i32_0 = arith.constant 0 : i32
    %c0_i32_1 = arith.constant 0 : i32
    return %c0_i32, %c0_i32_0 : i32, i32
  }
  func.func @transform_3(%arg0: i32) -> (i32, i32) {
    %c0_i32 = arith.constant 0 : i32
    %c0_i32_0 = arith.constant 0 : i32
    return %c0_i32, %arg0 : i32, i32
  }
}

module attributes {stable_mosaic.version = 11 : i64} {
  func.func @_maxpool_kernel(%arg0: i32, %arg1: memref<8x16x128xbf16, #tpu.memory_space<vmem>>, %arg2: memref<16x128xbf16, #tpu.memory_space<vmem>>) attributes {dimension_semantics = [#tpu.dimension_semantics<parallel>], iteration_bounds = array<i64: 1>, scalar_prefetch = 0 : i64, scratch_operands = 0 : i64, tpu.core_type = #tpu.core_type<tc>, window_params = [{transform_indices = @transform_0, window_bounds = array<i64: 8, 16, 128>}, {transform_indices = @transform_1, window_bounds = array<i64: 16, 128>}]} {
    %c0 = arith.constant 0 : index
    %c0_0 = arith.constant 0 : index
    %c0_1 = arith.constant 0 : index
    %0 = vector.load %arg1[%c0, %c0_0, %c0_1] : memref<8x16x128xbf16, #tpu.memory_space<vmem>>, vector<1x16x128xbf16>
    %1 = vector.shape_cast %0 : vector<1x16x128xbf16> to vector<16x128xbf16>
    %c1 = arith.constant 1 : index
    %c0_2 = arith.constant 0 : index
    %c0_3 = arith.constant 0 : index
    %2 = vector.load %arg1[%c1, %c0_2, %c0_3] : memref<8x16x128xbf16, #tpu.memory_space<vmem>>, vector<1x16x128xbf16>
    %3 = vector.shape_cast %2 : vector<1x16x128xbf16> to vector<16x128xbf16>
    %4 = arith.maximumf %1, %3 : vector<16x128xbf16>
    %c2 = arith.constant 2 : index
    %c0_4 = arith.constant 0 : index
    %c0_5 = arith.constant 0 : index
    %5 = vector.load %arg1[%c2, %c0_4, %c0_5] : memref<8x16x128xbf16, #tpu.memory_space<vmem>>, vector<1x16x128xbf16>
    %6 = vector.shape_cast %5 : vector<1x16x128xbf16> to vector<16x128xbf16>
    %7 = arith.maximumf %4, %6 : vector<16x128xbf16>
    %c3 = arith.constant 3 : index
    %c0_6 = arith.constant 0 : index
    %c0_7 = arith.constant 0 : index
    %8 = vector.load %arg1[%c3, %c0_6, %c0_7] : memref<8x16x128xbf16, #tpu.memory_space<vmem>>, vector<1x16x128xbf16>
    %9 = vector.shape_cast %8 : vector<1x16x128xbf16> to vector<16x128xbf16>
    %10 = arith.maximumf %7, %9 : vector<16x128xbf16>
    %c4 = arith.constant 4 : index
    %c0_8 = arith.constant 0 : index
    %c0_9 = arith.constant 0 : index
    %11 = vector.load %arg1[%c4, %c0_8, %c0_9] : memref<8x16x128xbf16, #tpu.memory_space<vmem>>, vector<1x16x128xbf16>
    %12 = vector.shape_cast %11 : vector<1x16x128xbf16> to vector<16x128xbf16>
    %13 = arith.maximumf %10, %12 : vector<16x128xbf16>
    %c5 = arith.constant 5 : index
    %c0_10 = arith.constant 0 : index
    %c0_11 = arith.constant 0 : index
    %14 = vector.load %arg1[%c5, %c0_10, %c0_11] : memref<8x16x128xbf16, #tpu.memory_space<vmem>>, vector<1x16x128xbf16>
    %15 = vector.shape_cast %14 : vector<1x16x128xbf16> to vector<16x128xbf16>
    %16 = arith.maximumf %13, %15 : vector<16x128xbf16>
    %c6 = arith.constant 6 : index
    %c0_12 = arith.constant 0 : index
    %c0_13 = arith.constant 0 : index
    %17 = vector.load %arg1[%c6, %c0_12, %c0_13] : memref<8x16x128xbf16, #tpu.memory_space<vmem>>, vector<1x16x128xbf16>
    %18 = vector.shape_cast %17 : vector<1x16x128xbf16> to vector<16x128xbf16>
    %19 = arith.maximumf %16, %18 : vector<16x128xbf16>
    %c7 = arith.constant 7 : index
    %c0_14 = arith.constant 0 : index
    %c0_15 = arith.constant 0 : index
    %20 = vector.load %arg1[%c7, %c0_14, %c0_15] : memref<8x16x128xbf16, #tpu.memory_space<vmem>>, vector<1x16x128xbf16>
    %21 = vector.shape_cast %20 : vector<1x16x128xbf16> to vector<16x128xbf16>
    %22 = arith.maximumf %19, %21 : vector<16x128xbf16>
    %c0_16 = arith.constant 0 : index
    %c0_17 = arith.constant 0 : index
    %23 = vector.load %arg2[%c0_16, %c0_17] : memref<16x128xbf16, #tpu.memory_space<vmem>>, vector<16x128xbf16>
    tpu.vector_store %arg2[%c0_16, %c0_17], %22 {strides = array<i32>} : memref<16x128xbf16, #tpu.memory_space<vmem>>, vector<16x128xbf16>,
    return
  }
  func.func @transform_0(%arg0: i32) -> (i32, i32, i32) {
    %c0_i32 = arith.constant 0 : i32
    %c0_i32_0 = arith.constant 0 : i32
    %c0_i32_1 = arith.constant 0 : i32
    return %c0_i32, %c0_i32_0, %arg0 : i32, i32, i32
  }
  func.func @transform_1(%arg0: i32) -> (i32, i32) {
    %c0_i32 = arith.constant 0 : i32
    %c0_i32_0 = arith.constant 0 : i32
    return %c0_i32, %arg0 : i32, i32
  }
}

module attributes {stable_mosaic.version = 11 : i64} {
  func.func @_conv_bn_lrelu_kernel(%arg0: i32, %arg1: memref<432x128xbf16, #tpu.memory_space<vmem>>, %arg2: memref<32x432xbf16, #tpu.memory_space<vmem>>, %arg3: memref<32x1xf32, #tpu.memory_space<vmem>>, %arg4: memref<32x128xbf16, #tpu.memory_space<vmem>>) attributes {dimension_semantics = [#tpu.dimension_semantics<parallel>], iteration_bounds = array<i64: 1>, scalar_prefetch = 0 : i64, scratch_operands = 0 : i64, tpu.core_type = #tpu.core_type<tc>, window_params = [{transform_indices = @transform_0, window_bounds = array<i64: 432, 128>}, {pipeline_mode = #tpu.pipeline_mode<synchronous>, transform_indices = @transform_1, window_bounds = array<i64: 32, 432>}, {pipeline_mode = #tpu.pipeline_mode<synchronous>, transform_indices = @transform_2, window_bounds = array<i64: 32, 1>}, {transform_indices = @transform_3, window_bounds = array<i64: 32, 128>}]} {
    %c0 = arith.constant 0 : index
    %c0_0 = arith.constant 0 : index
    %0 = vector.load %arg2[%c0, %c0_0] : memref<32x432xbf16, #tpu.memory_space<vmem>>, vector<32x432xbf16>
    %c0_1 = arith.constant 0 : index
    %c0_2 = arith.constant 0 : index
    %1 = vector.load %arg1[%c0_1, %c0_2] : memref<432x128xbf16, #tpu.memory_space<vmem>>, vector<432x128xbf16>
    %cst = arith.constant dense<0.000000e+00> : vector<32x128xf32>
    %2 = tpu.matmul %0, %1, %cst {dimension_numbers = #tpu.dot_dimension_numbers<[1], [0], [0], [1], [0, 0, 1, 1], [], []>} : vector<32x432xbf16>, vector<432x128xbf16>, vector<32x128xf32> -> vector<32x128xf32>
    %c0_3 = arith.constant 0 : index
    %c0_4 = arith.constant 0 : index
    %3 = vector.load %arg3[%c0_3, %c0_4] : memref<32x1xf32, #tpu.memory_space<vmem>>, vector<32x1xf32>
    %4 = vector.broadcast %3 : vector<32x1xf32> to vector<32x128xf32>
    %5 = arith.addf %2, %4 : vector<32x128xf32>
    %cst_5 = arith.constant 0.000000e+00 : f32
    %6 = vector.broadcast %cst_5 : f32 to vector<32x128xf32>
    %7 = arith.cmpf oge, %5, %6 : vector<32x128xf32>
    %cst_6 = arith.constant 0.00999999977 : f32
    %8 = vector.broadcast %cst_6 : f32 to vector<32x128xf32>
    %9 = arith.mulf %8, %5 : vector<32x128xf32>
    %10 = arith.select %7, %5, %9 : vector<32x128xi1>, vector<32x128xf32>
    %11 = arith.truncf %10 : vector<32x128xf32> to vector<32x128xbf16>
    %c0_7 = arith.constant 0 : index
    %c0_8 = arith.constant 0 : index
    %12 = vector.load %arg4[%c0_7, %c0_8] : memref<32x128xbf16, #tpu.memory_space<vmem>>, vector<32x128xbf16>
    tpu.vector_store %arg4[%c0_7, %c0_8], %11 {strides = array<i32>} : memref<32x128xbf16, #tpu.memory_space<vmem>>, vector<32x128xbf16>,
    return
  }
  func.func @transform_0(%arg0: i32) -> (i32, i32) {
    %c0_i32 = arith.constant 0 : i32
    %c0_i32_0 = arith.constant 0 : i32
    return %c0_i32, %arg0 : i32, i32
  }
  func.func @transform_1(%arg0: i32) -> (i32, i32) {
    %c0_i32 = arith.constant 0 : i32
    %c0_i32_0 = arith.constant 0 : i32
    %c0_i32_1 = arith.constant 0 : i32
    return %c0_i32, %c0_i32_0 : i32, i32
  }
  func.func @transform_2(%arg0: i32) -> (i32, i32) {
    %c0_i32 = arith.constant 0 : i32
    %c0_i32_0 = arith.constant 0 : i32
    %c0_i32_1 = arith.constant 0 : i32
    return %c0_i32, %c0_i32_0 : i32, i32
  }
  func.func @transform_3(%arg0: i32) -> (i32, i32) {
    %c0_i32 = arith.constant 0 : i32
    %c0_i32_0 = arith.constant 0 : i32
    return %c0_i32, %arg0 : i32, i32
  }
}

module attributes {stable_mosaic.version = 11 : i64} {
  func.func @_conv_bn_lrelu_kernel(%arg0: i32, %arg1: memref<432x128xbf16, #tpu.memory_space<vmem>>, %arg2: memref<16x432xbf16, #tpu.memory_space<vmem>>, %arg3: memref<16x1xf32, #tpu.memory_space<vmem>>, %arg4: memref<16x128xbf16, #tpu.memory_space<vmem>>) attributes {dimension_semantics = [#tpu.dimension_semantics<parallel>], iteration_bounds = array<i64: 1>, scalar_prefetch = 0 : i64, scratch_operands = 0 : i64, tpu.core_type = #tpu.core_type<tc>, window_params = [{transform_indices = @transform_0, window_bounds = array<i64: 432, 128>}, {pipeline_mode = #tpu.pipeline_mode<synchronous>, transform_indices = @transform_1, window_bounds = array<i64: 16, 432>}, {pipeline_mode = #tpu.pipeline_mode<synchronous>, transform_indices = @transform_2, window_bounds = array<i64: 16, 1>}, {transform_indices = @transform_3, window_bounds = array<i64: 16, 128>}]} {
    %c0 = arith.constant 0 : index
    %c0_0 = arith.constant 0 : index
    %0 = vector.load %arg2[%c0, %c0_0] : memref<16x432xbf16, #tpu.memory_space<vmem>>, vector<16x432xbf16>
    %c0_1 = arith.constant 0 : index
    %c0_2 = arith.constant 0 : index
    %1 = vector.load %arg1[%c0_1, %c0_2] : memref<432x128xbf16, #tpu.memory_space<vmem>>, vector<432x128xbf16>
    %cst = arith.constant dense<0.000000e+00> : vector<16x128xf32>
    %2 = tpu.matmul %0, %1, %cst {dimension_numbers = #tpu.dot_dimension_numbers<[1], [0], [0], [1], [0, 0, 1, 1], [], []>} : vector<16x432xbf16>, vector<432x128xbf16>, vector<16x128xf32> -> vector<16x128xf32>
    %c0_3 = arith.constant 0 : index
    %c0_4 = arith.constant 0 : index
    %3 = vector.load %arg3[%c0_3, %c0_4] : memref<16x1xf32, #tpu.memory_space<vmem>>, vector<16x1xf32>
    %4 = vector.broadcast %3 : vector<16x1xf32> to vector<16x128xf32>
    %5 = arith.addf %2, %4 : vector<16x128xf32>
    %cst_5 = arith.constant 0.000000e+00 : f32
    %6 = vector.broadcast %cst_5 : f32 to vector<16x128xf32>
    %7 = arith.cmpf oge, %5, %6 : vector<16x128xf32>
    %cst_6 = arith.constant 0.00999999977 : f32
    %8 = vector.broadcast %cst_6 : f32 to vector<16x128xf32>
    %9 = arith.mulf %8, %5 : vector<16x128xf32>
    %10 = arith.select %7, %5, %9 : vector<16x128xi1>, vector<16x128xf32>
    %11 = arith.truncf %10 : vector<16x128xf32> to vector<16x128xbf16>
    %c0_7 = arith.constant 0 : index
    %c0_8 = arith.constant 0 : index
    %12 = vector.load %arg4[%c0_7, %c0_8] : memref<16x128xbf16, #tpu.memory_space<vmem>>, vector<16x128xbf16>
    tpu.vector_store %arg4[%c0_7, %c0_8], %11 {strides = array<i32>} : memref<16x128xbf16, #tpu.memory_space<vmem>>, vector<16x128xbf16>,
    return
  }
  func.func @transform_0(%arg0: i32) -> (i32, i32) {
    %c0_i32 = arith.constant 0 : i32
    %c0_i32_0 = arith.constant 0 : i32
    return %c0_i32, %arg0 : i32, i32
  }
  func.func @transform_1(%arg0: i32) -> (i32, i32) {
    %c0_i32 = arith.constant 0 : i32
    %c0_i32_0 = arith.constant 0 : i32
    %c0_i32_1 = arith.constant 0 : i32
    return %c0_i32, %c0_i32_0 : i32, i32
  }
  func.func @transform_2(%arg0: i32) -> (i32, i32) {
    %c0_i32 = arith.constant 0 : i32
    %c0_i32_0 = arith.constant 0 : i32
    %c0_i32_1 = arith.constant 0 : i32
    return %c0_i32, %c0_i32_0 : i32, i32
  }
  func.func @transform_3(%arg0: i32) -> (i32, i32) {
    %c0_i32 = arith.constant 0 : i32
    %c0_i32_0 = arith.constant 0 : i32
    return %c0_i32, %arg0 : i32, i32
  }
}

module attributes {stable_mosaic.version = 11 : i64} {
  func.func @_maxpool_kernel(%arg0: i32, %arg1: memref<8x32x128xbf16, #tpu.memory_space<vmem>>, %arg2: memref<32x128xbf16, #tpu.memory_space<vmem>>) attributes {dimension_semantics = [#tpu.dimension_semantics<parallel>], iteration_bounds = array<i64: 1>, scalar_prefetch = 0 : i64, scratch_operands = 0 : i64, tpu.core_type = #tpu.core_type<tc>, window_params = [{transform_indices = @transform_0, window_bounds = array<i64: 8, 32, 128>}, {transform_indices = @transform_1, window_bounds = array<i64: 32, 128>}]} {
    %c0 = arith.constant 0 : index
    %c0_0 = arith.constant 0 : index
    %c0_1 = arith.constant 0 : index
    %0 = vector.load %arg1[%c0, %c0_0, %c0_1] : memref<8x32x128xbf16, #tpu.memory_space<vmem>>, vector<1x32x128xbf16>
    %1 = vector.shape_cast %0 : vector<1x32x128xbf16> to vector<32x128xbf16>
    %c1 = arith.constant 1 : index
    %c0_2 = arith.constant 0 : index
    %c0_3 = arith.constant 0 : index
    %2 = vector.load %arg1[%c1, %c0_2, %c0_3] : memref<8x32x128xbf16, #tpu.memory_space<vmem>>, vector<1x32x128xbf16>
    %3 = vector.shape_cast %2 : vector<1x32x128xbf16> to vector<32x128xbf16>
    %4 = arith.maximumf %1, %3 : vector<32x128xbf16>
    %c2 = arith.constant 2 : index
    %c0_4 = arith.constant 0 : index
    %c0_5 = arith.constant 0 : index
    %5 = vector.load %arg1[%c2, %c0_4, %c0_5] : memref<8x32x128xbf16, #tpu.memory_space<vmem>>, vector<1x32x128xbf16>
    %6 = vector.shape_cast %5 : vector<1x32x128xbf16> to vector<32x128xbf16>
    %7 = arith.maximumf %4, %6 : vector<32x128xbf16>
    %c3 = arith.constant 3 : index
    %c0_6 = arith.constant 0 : index
    %c0_7 = arith.constant 0 : index
    %8 = vector.load %arg1[%c3, %c0_6, %c0_7] : memref<8x32x128xbf16, #tpu.memory_space<vmem>>, vector<1x32x128xbf16>
    %9 = vector.shape_cast %8 : vector<1x32x128xbf16> to vector<32x128xbf16>
    %10 = arith.maximumf %7, %9 : vector<32x128xbf16>
    %c4 = arith.constant 4 : index
    %c0_8 = arith.constant 0 : index
    %c0_9 = arith.constant 0 : index
    %11 = vector.load %arg1[%c4, %c0_8, %c0_9] : memref<8x32x128xbf16, #tpu.memory_space<vmem>>, vector<1x32x128xbf16>
    %12 = vector.shape_cast %11 : vector<1x32x128xbf16> to vector<32x128xbf16>
    %13 = arith.maximumf %10, %12 : vector<32x128xbf16>
    %c5 = arith.constant 5 : index
    %c0_10 = arith.constant 0 : index
    %c0_11 = arith.constant 0 : index
    %14 = vector.load %arg1[%c5, %c0_10, %c0_11] : memref<8x32x128xbf16, #tpu.memory_space<vmem>>, vector<1x32x128xbf16>
    %15 = vector.shape_cast %14 : vector<1x32x128xbf16> to vector<32x128xbf16>
    %16 = arith.maximumf %13, %15 : vector<32x128xbf16>
    %c6 = arith.constant 6 : index
    %c0_12 = arith.constant 0 : index
    %c0_13 = arith.constant 0 : index
    %17 = vector.load %arg1[%c6, %c0_12, %c0_13] : memref<8x32x128xbf16, #tpu.memory_space<vmem>>, vector<1x32x128xbf16>
    %18 = vector.shape_cast %17 : vector<1x32x128xbf16> to vector<32x128xbf16>
    %19 = arith.maximumf %16, %18 : vector<32x128xbf16>
    %c7 = arith.constant 7 : index
    %c0_14 = arith.constant 0 : index
    %c0_15 = arith.constant 0 : index
    %20 = vector.load %arg1[%c7, %c0_14, %c0_15] : memref<8x32x128xbf16, #tpu.memory_space<vmem>>, vector<1x32x128xbf16>
    %21 = vector.shape_cast %20 : vector<1x32x128xbf16> to vector<32x128xbf16>
    %22 = arith.maximumf %19, %21 : vector<32x128xbf16>
    %c0_16 = arith.constant 0 : index
    %c0_17 = arith.constant 0 : index
    %23 = vector.load %arg2[%c0_16, %c0_17] : memref<32x128xbf16, #tpu.memory_space<vmem>>, vector<32x128xbf16>
    tpu.vector_store %arg2[%c0_16, %c0_17], %22 {strides = array<i32>} : memref<32x128xbf16, #tpu.memory_space<vmem>>, vector<32x128xbf16>,
    return
  }
  func.func @transform_0(%arg0: i32) -> (i32, i32, i32) {
    %c0_i32 = arith.constant 0 : i32
    %c0_i32_0 = arith.constant 0 : i32
    %c0_i32_1 = arith.constant 0 : i32
    return %c0_i32, %c0_i32_0, %arg0 : i32, i32, i32
  }
  func.func @transform_1(%arg0: i32) -> (i32, i32) {
    %c0_i32 = arith.constant 0 : i32
    %c0_i32_0 = arith.constant 0 : i32
    return %c0_i32, %arg0 : i32, i32
  }
}

module attributes {stable_mosaic.version = 11 : i64} {
  func.func @_conv_bn_lrelu_kernel(%arg0: i32, %arg1: memref<864x128xbf16, #tpu.memory_space<vmem>>, %arg2: memref<64x864xbf16, #tpu.memory_space<vmem>>, %arg3: memref<64x1xf32, #tpu.memory_space<vmem>>, %arg4: memref<64x128xbf16, #tpu.memory_space<vmem>>) attributes {dimension_semantics = [#tpu.dimension_semantics<parallel>], iteration_bounds = array<i64: 1>, scalar_prefetch = 0 : i64, scratch_operands = 0 : i64, tpu.core_type = #tpu.core_type<tc>, window_params = [{transform_indices = @transform_0, window_bounds = array<i64: 864, 128>}, {pipeline_mode = #tpu.pipeline_mode<synchronous>, transform_indices = @transform_1, window_bounds = array<i64: 64, 864>}, {pipeline_mode = #tpu.pipeline_mode<synchronous>, transform_indices = @transform_2, window_bounds = array<i64: 64, 1>}, {transform_indices = @transform_3, window_bounds = array<i64: 64, 128>}]} {
    %c0 = arith.constant 0 : index
    %c0_0 = arith.constant 0 : index
    %0 = vector.load %arg2[%c0, %c0_0] : memref<64x864xbf16, #tpu.memory_space<vmem>>, vector<64x864xbf16>
    %c0_1 = arith.constant 0 : index
    %c0_2 = arith.constant 0 : index
    %1 = vector.load %arg1[%c0_1, %c0_2] : memref<864x128xbf16, #tpu.memory_space<vmem>>, vector<864x128xbf16>
    %cst = arith.constant dense<0.000000e+00> : vector<64x128xf32>
    %2 = tpu.matmul %0, %1, %cst {dimension_numbers = #tpu.dot_dimension_numbers<[1], [0], [0], [1], [0, 0, 1, 1], [], []>} : vector<64x864xbf16>, vector<864x128xbf16>, vector<64x128xf32> -> vector<64x128xf32>
    %c0_3 = arith.constant 0 : index
    %c0_4 = arith.constant 0 : index
    %3 = vector.load %arg3[%c0_3, %c0_4] : memref<64x1xf32, #tpu.memory_space<vmem>>, vector<64x1xf32>
    %4 = vector.broadcast %3 : vector<64x1xf32> to vector<64x128xf32>
    %5 = arith.addf %2, %4 : vector<64x128xf32>
    %cst_5 = arith.constant 0.000000e+00 : f32
    %6 = vector.broadcast %cst_5 : f32 to vector<64x128xf32>
    %7 = arith.cmpf oge, %5, %6 : vector<64x128xf32>
    %cst_6 = arith.constant 0.00999999977 : f32
    %8 = vector.broadcast %cst_6 : f32 to vector<64x128xf32>
    %9 = arith.mulf %8, %5 : vector<64x128xf32>
    %10 = arith.select %7, %5, %9 : vector<64x128xi1>, vector<64x128xf32>
    %11 = arith.truncf %10 : vector<64x128xf32> to vector<64x128xbf16>
    %c0_7 = arith.constant 0 : index
    %c0_8 = arith.constant 0 : index
    %12 = vector.load %arg4[%c0_7, %c0_8] : memref<64x128xbf16, #tpu.memory_space<vmem>>, vector<64x128xbf16>
    tpu.vector_store %arg4[%c0_7, %c0_8], %11 {strides = array<i32>} : memref<64x128xbf16, #tpu.memory_space<vmem>>, vector<64x128xbf16>,
    return
  }
  func.func @transform_0(%arg0: i32) -> (i32, i32) {
    %c0_i32 = arith.constant 0 : i32
    %c0_i32_0 = arith.constant 0 : i32
    return %c0_i32, %arg0 : i32, i32
  }
  func.func @transform_1(%arg0: i32) -> (i32, i32) {
    %c0_i32 = arith.constant 0 : i32
    %c0_i32_0 = arith.constant 0 : i32
    %c0_i32_1 = arith.constant 0 : i32
    return %c0_i32, %c0_i32_0 : i32, i32
  }
  func.func @transform_2(%arg0: i32) -> (i32, i32) {
    %c0_i32 = arith.constant 0 : i32
    %c0_i32_0 = arith.constant 0 : i32
    %c0_i32_1 = arith.constant 0 : i32
    return %c0_i32, %c0_i32_0 : i32, i32
  }
  func.func @transform_3(%arg0: i32) -> (i32, i32) {
    %c0_i32 = arith.constant 0 : i32
    %c0_i32_0 = arith.constant 0 : i32
    return %c0_i32, %arg0 : i32, i32
  }
}

module attributes {stable_mosaic.version = 11 : i64} {
  func.func @_conv_bn_lrelu_kernel(%arg0: i32, %arg1: memref<864x128xbf16, #tpu.memory_space<vmem>>, %arg2: memref<32x864xbf16, #tpu.memory_space<vmem>>, %arg3: memref<32x1xf32, #tpu.memory_space<vmem>>, %arg4: memref<32x128xbf16, #tpu.memory_space<vmem>>) attributes {dimension_semantics = [#tpu.dimension_semantics<parallel>], iteration_bounds = array<i64: 1>, scalar_prefetch = 0 : i64, scratch_operands = 0 : i64, tpu.core_type = #tpu.core_type<tc>, window_params = [{transform_indices = @transform_0, window_bounds = array<i64: 864, 128>}, {pipeline_mode = #tpu.pipeline_mode<synchronous>, transform_indices = @transform_1, window_bounds = array<i64: 32, 864>}, {pipeline_mode = #tpu.pipeline_mode<synchronous>, transform_indices = @transform_2, window_bounds = array<i64: 32, 1>}, {transform_indices = @transform_3, window_bounds = array<i64: 32, 128>}]} {
    %c0 = arith.constant 0 : index
    %c0_0 = arith.constant 0 : index
    %0 = vector.load %arg2[%c0, %c0_0] : memref<32x864xbf16, #tpu.memory_space<vmem>>, vector<32x864xbf16>
    %c0_1 = arith.constant 0 : index
    %c0_2 = arith.constant 0 : index
    %1 = vector.load %arg1[%c0_1, %c0_2] : memref<864x128xbf16, #tpu.memory_space<vmem>>, vector<864x128xbf16>
    %cst = arith.constant dense<0.000000e+00> : vector<32x128xf32>
    %2 = tpu.matmul %0, %1, %cst {dimension_numbers = #tpu.dot_dimension_numbers<[1], [0], [0], [1], [0, 0, 1, 1], [], []>} : vector<32x864xbf16>, vector<864x128xbf16>, vector<32x128xf32> -> vector<32x128xf32>
    %c0_3 = arith.constant 0 : index
    %c0_4 = arith.constant 0 : index
    %3 = vector.load %arg3[%c0_3, %c0_4] : memref<32x1xf32, #tpu.memory_space<vmem>>, vector<32x1xf32>
    %4 = vector.broadcast %3 : vector<32x1xf32> to vector<32x128xf32>
    %5 = arith.addf %2, %4 : vector<32x128xf32>
    %cst_5 = arith.constant 0.000000e+00 : f32
    %6 = vector.broadcast %cst_5 : f32 to vector<32x128xf32>
    %7 = arith.cmpf oge, %5, %6 : vector<32x128xf32>
    %cst_6 = arith.constant 0.00999999977 : f32
    %8 = vector.broadcast %cst_6 : f32 to vector<32x128xf32>
    %9 = arith.mulf %8, %5 : vector<32x128xf32>
    %10 = arith.select %7, %5, %9 : vector<32x128xi1>, vector<32x128xf32>
    %11 = arith.truncf %10 : vector<32x128xf32> to vector<32x128xbf16>
    %c0_7 = arith.constant 0 : index
    %c0_8 = arith.constant 0 : index
    %12 = vector.load %arg4[%c0_7, %c0_8] : memref<32x128xbf16, #tpu.memory_space<vmem>>, vector<32x128xbf16>
    tpu.vector_store %arg4[%c0_7, %c0_8], %11 {strides = array<i32>} : memref<32x128xbf16, #tpu.memory_space<vmem>>, vector<32x128xbf16>,
    return
  }
  func.func @transform_0(%arg0: i32) -> (i32, i32) {
    %c0_i32 = arith.constant 0 : i32
    %c0_i32_0 = arith.constant 0 : i32
    return %c0_i32, %arg0 : i32, i32
  }
  func.func @transform_1(%arg0: i32) -> (i32, i32) {
    %c0_i32 = arith.constant 0 : i32
    %c0_i32_0 = arith.constant 0 : i32
    %c0_i32_1 = arith.constant 0 : i32
    return %c0_i32, %c0_i32_0 : i32, i32
  }
  func.func @transform_2(%arg0: i32) -> (i32, i32) {
    %c0_i32 = arith.constant 0 : i32
    %c0_i32_0 = arith.constant 0 : i32
    %c0_i32_1 = arith.constant 0 : i32
    return %c0_i32, %c0_i32_0 : i32, i32
  }
  func.func @transform_3(%arg0: i32) -> (i32, i32) {
    %c0_i32 = arith.constant 0 : i32
    %c0_i32_0 = arith.constant 0 : i32
    return %c0_i32, %arg0 : i32, i32
  }
}

module attributes {stable_mosaic.version = 11 : i64} {
  func.func @_conv_bn_lrelu_kernel(%arg0: i32, %arg1: memref<1728x128xbf16, #tpu.memory_space<vmem>>, %arg2: memref<32x1728xbf16, #tpu.memory_space<vmem>>, %arg3: memref<32x1xf32, #tpu.memory_space<vmem>>, %arg4: memref<32x128xbf16, #tpu.memory_space<vmem>>) attributes {dimension_semantics = [#tpu.dimension_semantics<parallel>], iteration_bounds = array<i64: 1>, scalar_prefetch = 0 : i64, scratch_operands = 0 : i64, tpu.core_type = #tpu.core_type<tc>, window_params = [{transform_indices = @transform_0, window_bounds = array<i64: 1728, 128>}, {pipeline_mode = #tpu.pipeline_mode<synchronous>, transform_indices = @transform_1, window_bounds = array<i64: 32, 1728>}, {pipeline_mode = #tpu.pipeline_mode<synchronous>, transform_indices = @transform_2, window_bounds = array<i64: 32, 1>}, {transform_indices = @transform_3, window_bounds = array<i64: 32, 128>}]} {
    %c0 = arith.constant 0 : index
    %c0_0 = arith.constant 0 : index
    %0 = vector.load %arg2[%c0, %c0_0] : memref<32x1728xbf16, #tpu.memory_space<vmem>>, vector<32x1728xbf16>
    %c0_1 = arith.constant 0 : index
    %c0_2 = arith.constant 0 : index
    %1 = vector.load %arg1[%c0_1, %c0_2] : memref<1728x128xbf16, #tpu.memory_space<vmem>>, vector<1728x128xbf16>
    %cst = arith.constant dense<0.000000e+00> : vector<32x128xf32>
    %2 = tpu.matmul %0, %1, %cst {dimension_numbers = #tpu.dot_dimension_numbers<[1], [0], [0], [1], [0, 0, 1, 1], [], []>} : vector<32x1728xbf16>, vector<1728x128xbf16>, vector<32x128xf32> -> vector<32x128xf32>
    %c0_3 = arith.constant 0 : index
    %c0_4 = arith.constant 0 : index
    %3 = vector.load %arg3[%c0_3, %c0_4] : memref<32x1xf32, #tpu.memory_space<vmem>>, vector<32x1xf32>
    %4 = vector.broadcast %3 : vector<32x1xf32> to vector<32x128xf32>
    %5 = arith.addf %2, %4 : vector<32x128xf32>
    %cst_5 = arith.constant 0.000000e+00 : f32
    %6 = vector.broadcast %cst_5 : f32 to vector<32x128xf32>
    %7 = arith.cmpf oge, %5, %6 : vector<32x128xf32>
    %cst_6 = arith.constant 0.00999999977 : f32
    %8 = vector.broadcast %cst_6 : f32 to vector<32x128xf32>
    %9 = arith.mulf %8, %5 : vector<32x128xf32>
    %10 = arith.select %7, %5, %9 : vector<32x128xi1>, vector<32x128xf32>
    %11 = arith.truncf %10 : vector<32x128xf32> to vector<32x128xbf16>
    %c0_7 = arith.constant 0 : index
    %c0_8 = arith.constant 0 : index
    %12 = vector.load %arg4[%c0_7, %c0_8] : memref<32x128xbf16, #tpu.memory_space<vmem>>, vector<32x128xbf16>
    tpu.vector_store %arg4[%c0_7, %c0_8], %11 {strides = array<i32>} : memref<32x128xbf16, #tpu.memory_space<vmem>>, vector<32x128xbf16>,
    return
  }
  func.func @transform_0(%arg0: i32) -> (i32, i32) {
    %c0_i32 = arith.constant 0 : i32
    %c0_i32_0 = arith.constant 0 : i32
    return %c0_i32, %arg0 : i32, i32
  }
  func.func @transform_1(%arg0: i32) -> (i32, i32) {
    %c0_i32 = arith.constant 0 : i32
    %c0_i32_0 = arith.constant 0 : i32
    %c0_i32_1 = arith.constant 0 : i32
    return %c0_i32, %c0_i32_0 : i32, i32
  }
  func.func @transform_2(%arg0: i32) -> (i32, i32) {
    %c0_i32 = arith.constant 0 : i32
    %c0_i32_0 = arith.constant 0 : i32
    %c0_i32_1 = arith.constant 0 : i32
    return %c0_i32, %c0_i32_0 : i32, i32
  }
  func.func @transform_3(%arg0: i32) -> (i32, i32) {
    %c0_i32 = arith.constant 0 : i32
    %c0_i32_0 = arith.constant 0 : i32
    return %c0_i32, %arg0 : i32, i32
  }
}

module attributes {stable_mosaic.version = 11 : i64} {
  func.func @_conv_bn_lrelu_kernel(%arg0: i32, %arg1: memref<864x128xbf16, #tpu.memory_space<vmem>>, %arg2: memref<16x864xbf16, #tpu.memory_space<vmem>>, %arg3: memref<16x1xf32, #tpu.memory_space<vmem>>, %arg4: memref<16x128xbf16, #tpu.memory_space<vmem>>) attributes {dimension_semantics = [#tpu.dimension_semantics<parallel>], iteration_bounds = array<i64: 1>, scalar_prefetch = 0 : i64, scratch_operands = 0 : i64, tpu.core_type = #tpu.core_type<tc>, window_params = [{transform_indices = @transform_0, window_bounds = array<i64: 864, 128>}, {pipeline_mode = #tpu.pipeline_mode<synchronous>, transform_indices = @transform_1, window_bounds = array<i64: 16, 864>}, {pipeline_mode = #tpu.pipeline_mode<synchronous>, transform_indices = @transform_2, window_bounds = array<i64: 16, 1>}, {transform_indices = @transform_3, window_bounds = array<i64: 16, 128>}]} {
    %c0 = arith.constant 0 : index
    %c0_0 = arith.constant 0 : index
    %0 = vector.load %arg2[%c0, %c0_0] : memref<16x864xbf16, #tpu.memory_space<vmem>>, vector<16x864xbf16>
    %c0_1 = arith.constant 0 : index
    %c0_2 = arith.constant 0 : index
    %1 = vector.load %arg1[%c0_1, %c0_2] : memref<864x128xbf16, #tpu.memory_space<vmem>>, vector<864x128xbf16>
    %cst = arith.constant dense<0.000000e+00> : vector<16x128xf32>
    %2 = tpu.matmul %0, %1, %cst {dimension_numbers = #tpu.dot_dimension_numbers<[1], [0], [0], [1], [0, 0, 1, 1], [], []>} : vector<16x864xbf16>, vector<864x128xbf16>, vector<16x128xf32> -> vector<16x128xf32>
    %c0_3 = arith.constant 0 : index
    %c0_4 = arith.constant 0 : index
    %3 = vector.load %arg3[%c0_3, %c0_4] : memref<16x1xf32, #tpu.memory_space<vmem>>, vector<16x1xf32>
    %4 = vector.broadcast %3 : vector<16x1xf32> to vector<16x128xf32>
    %5 = arith.addf %2, %4 : vector<16x128xf32>
    %cst_5 = arith.constant 0.000000e+00 : f32
    %6 = vector.broadcast %cst_5 : f32 to vector<16x128xf32>
    %7 = arith.cmpf oge, %5, %6 : vector<16x128xf32>
    %cst_6 = arith.constant 0.00999999977 : f32
    %8 = vector.broadcast %cst_6 : f32 to vector<16x128xf32>
    %9 = arith.mulf %8, %5 : vector<16x128xf32>
    %10 = arith.select %7, %5, %9 : vector<16x128xi1>, vector<16x128xf32>
    %11 = arith.truncf %10 : vector<16x128xf32> to vector<16x128xbf16>
    %c0_7 = arith.constant 0 : index
    %c0_8 = arith.constant 0 : index
    %12 = vector.load %arg4[%c0_7, %c0_8] : memref<16x128xbf16, #tpu.memory_space<vmem>>, vector<16x128xbf16>
    tpu.vector_store %arg4[%c0_7, %c0_8], %11 {strides = array<i32>} : memref<16x128xbf16, #tpu.memory_space<vmem>>, vector<16x128xbf16>,
    return
  }
  func.func @transform_0(%arg0: i32) -> (i32, i32) {
    %c0_i32 = arith.constant 0 : i32
    %c0_i32_0 = arith.constant 0 : i32
    return %c0_i32, %arg0 : i32, i32
  }
  func.func @transform_1(%arg0: i32) -> (i32, i32) {
    %c0_i32 = arith.constant 0 : i32
    %c0_i32_0 = arith.constant 0 : i32
    %c0_i32_1 = arith.constant 0 : i32
    return %c0_i32, %c0_i32_0 : i32, i32
  }
  func.func @transform_2(%arg0: i32) -> (i32, i32) {
    %c0_i32 = arith.constant 0 : i32
    %c0_i32_0 = arith.constant 0 : i32
    %c0_i32_1 = arith.constant 0 : i32
    return %c0_i32, %c0_i32_0 : i32, i32
  }
  func.func @transform_3(%arg0: i32) -> (i32, i32) {
    %c0_i32 = arith.constant 0 : i32
    %c0_i32_0 = arith.constant 0 : i32
    return %c0_i32, %arg0 : i32, i32
  }
}

module attributes {stable_mosaic.version = 11 : i64} {
  func.func @_conv_bn_lrelu_kernel(%arg0: i32, %arg1: memref<432x512xbf16, #tpu.memory_space<vmem>>, %arg2: memref<8x432xbf16, #tpu.memory_space<vmem>>, %arg3: memref<8x1xf32, #tpu.memory_space<vmem>>, %arg4: memref<8x512xbf16, #tpu.memory_space<vmem>>) attributes {dimension_semantics = [#tpu.dimension_semantics<parallel>], iteration_bounds = array<i64: 1>, scalar_prefetch = 0 : i64, scratch_operands = 0 : i64, tpu.core_type = #tpu.core_type<tc>, window_params = [{transform_indices = @transform_0, window_bounds = array<i64: 432, 512>}, {pipeline_mode = #tpu.pipeline_mode<synchronous>, transform_indices = @transform_1, window_bounds = array<i64: 8, 432>}, {pipeline_mode = #tpu.pipeline_mode<synchronous>, transform_indices = @transform_2, window_bounds = array<i64: 8, 1>}, {transform_indices = @transform_3, window_bounds = array<i64: 8, 512>}]} {
    %c0 = arith.constant 0 : index
    %c0_0 = arith.constant 0 : index
    %0 = vector.load %arg2[%c0, %c0_0] : memref<8x432xbf16, #tpu.memory_space<vmem>>, vector<8x432xbf16>
    %c0_1 = arith.constant 0 : index
    %c0_2 = arith.constant 0 : index
    %1 = vector.load %arg1[%c0_1, %c0_2] : memref<432x512xbf16, #tpu.memory_space<vmem>>, vector<432x512xbf16>
    %cst = arith.constant dense<0.000000e+00> : vector<8x512xf32>
    %2 = tpu.matmul %0, %1, %cst {dimension_numbers = #tpu.dot_dimension_numbers<[1], [0], [0], [1], [0, 0, 1, 1], [], []>} : vector<8x432xbf16>, vector<432x512xbf16>, vector<8x512xf32> -> vector<8x512xf32>
    %c0_3 = arith.constant 0 : index
    %c0_4 = arith.constant 0 : index
    %3 = vector.load %arg3[%c0_3, %c0_4] : memref<8x1xf32, #tpu.memory_space<vmem>>, vector<8x1xf32>
    %4 = vector.broadcast %3 : vector<8x1xf32> to vector<8x512xf32>
    %5 = arith.addf %2, %4 : vector<8x512xf32>
    %cst_5 = arith.constant 0.000000e+00 : f32
    %6 = vector.broadcast %cst_5 : f32 to vector<8x512xf32>
    %7 = arith.cmpf oge, %5, %6 : vector<8x512xf32>
    %cst_6 = arith.constant 0.00999999977 : f32
    %8 = vector.broadcast %cst_6 : f32 to vector<8x512xf32>
    %9 = arith.mulf %8, %5 : vector<8x512xf32>
    %10 = arith.select %7, %5, %9 : vector<8x512xi1>, vector<8x512xf32>
    %11 = arith.truncf %10 : vector<8x512xf32> to vector<8x512xbf16>
    %c0_7 = arith.constant 0 : index
    %c0_8 = arith.constant 0 : index
    %12 = vector.load %arg4[%c0_7, %c0_8] : memref<8x512xbf16, #tpu.memory_space<vmem>>, vector<8x512xbf16>
    tpu.vector_store %arg4[%c0_7, %c0_8], %11 {strides = array<i32>} : memref<8x512xbf16, #tpu.memory_space<vmem>>, vector<8x512xbf16>,
    return
  }
  func.func @transform_0(%arg0: i32) -> (i32, i32) {
    %c0_i32 = arith.constant 0 : i32
    %c0_i32_0 = arith.constant 0 : i32
    return %c0_i32, %arg0 : i32, i32
  }
  func.func @transform_1(%arg0: i32) -> (i32, i32) {
    %c0_i32 = arith.constant 0 : i32
    %c0_i32_0 = arith.constant 0 : i32
    %c0_i32_1 = arith.constant 0 : i32
    return %c0_i32, %c0_i32_0 : i32, i32
  }
  func.func @transform_2(%arg0: i32) -> (i32, i32) {
    %c0_i32 = arith.constant 0 : i32
    %c0_i32_0 = arith.constant 0 : i32
    %c0_i32_1 = arith.constant 0 : i32
    return %c0_i32, %c0_i32_0 : i32, i32
  }
  func.func @transform_3(%arg0: i32) -> (i32, i32) {
    %c0_i32 = arith.constant 0 : i32
    %c0_i32_0 = arith.constant 0 : i32
    return %c0_i32, %arg0 : i32, i32
  }
}

module attributes {stable_mosaic.version = 11 : i64} {
  func.func @_conv_bn_lrelu_kernel(%arg0: i32, %arg1: memref<216x512xbf16, #tpu.memory_space<vmem>>, %arg2: memref<8x216xbf16, #tpu.memory_space<vmem>>, %arg3: memref<8x1xf32, #tpu.memory_space<vmem>>, %arg4: memref<8x512xbf16, #tpu.memory_space<vmem>>) attributes {dimension_semantics = [#tpu.dimension_semantics<parallel>], iteration_bounds = array<i64: 1>, scalar_prefetch = 0 : i64, scratch_operands = 0 : i64, tpu.core_type = #tpu.core_type<tc>, window_params = [{transform_indices = @transform_0, window_bounds = array<i64: 216, 512>}, {pipeline_mode = #tpu.pipeline_mode<synchronous>, transform_indices = @transform_1, window_bounds = array<i64: 8, 216>}, {pipeline_mode = #tpu.pipeline_mode<synchronous>, transform_indices = @transform_2, window_bounds = array<i64: 8, 1>}, {transform_indices = @transform_3, window_bounds = array<i64: 8, 512>}]} {
    %c0 = arith.constant 0 : index
    %c0_0 = arith.constant 0 : index
    %0 = vector.load %arg2[%c0, %c0_0] : memref<8x216xbf16, #tpu.memory_space<vmem>>, vector<8x216xbf16>
    %c0_1 = arith.constant 0 : index
    %c0_2 = arith.constant 0 : index
    %1 = vector.load %arg1[%c0_1, %c0_2] : memref<216x512xbf16, #tpu.memory_space<vmem>>, vector<216x512xbf16>
    %cst = arith.constant dense<0.000000e+00> : vector<8x512xf32>
    %2 = tpu.matmul %0, %1, %cst {dimension_numbers = #tpu.dot_dimension_numbers<[1], [0], [0], [1], [0, 0, 1, 1], [], []>} : vector<8x216xbf16>, vector<216x512xbf16>, vector<8x512xf32> -> vector<8x512xf32>
    %c0_3 = arith.constant 0 : index
    %c0_4 = arith.constant 0 : index
    %3 = vector.load %arg3[%c0_3, %c0_4] : memref<8x1xf32, #tpu.memory_space<vmem>>, vector<8x1xf32>
    %4 = vector.broadcast %3 : vector<8x1xf32> to vector<8x512xf32>
    %5 = arith.addf %2, %4 : vector<8x512xf32>
    %cst_5 = arith.constant 0.000000e+00 : f32
    %6 = vector.broadcast %cst_5 : f32 to vector<8x512xf32>
    %7 = arith.cmpf oge, %5, %6 : vector<8x512xf32>
    %cst_6 = arith.constant 0.00999999977 : f32
    %8 = vector.broadcast %cst_6 : f32 to vector<8x512xf32>
    %9 = arith.mulf %8, %5 : vector<8x512xf32>
    %10 = arith.select %7, %5, %9 : vector<8x512xi1>, vector<8x512xf32>
    %11 = arith.truncf %10 : vector<8x512xf32> to vector<8x512xbf16>
    %c0_7 = arith.constant 0 : index
    %c0_8 = arith.constant 0 : index
    %12 = vector.load %arg4[%c0_7, %c0_8] : memref<8x512xbf16, #tpu.memory_space<vmem>>, vector<8x512xbf16>
    tpu.vector_store %arg4[%c0_7, %c0_8], %11 {strides = array<i32>} : memref<8x512xbf16, #tpu.memory_space<vmem>>, vector<8x512xbf16>,
    return
  }
  func.func @transform_0(%arg0: i32) -> (i32, i32) {
    %c0_i32 = arith.constant 0 : i32
    %c0_i32_0 = arith.constant 0 : i32
    return %c0_i32, %arg0 : i32, i32
  }
  func.func @transform_1(%arg0: i32) -> (i32, i32) {
    %c0_i32 = arith.constant 0 : i32
    %c0_i32_0 = arith.constant 0 : i32
    %c0_i32_1 = arith.constant 0 : i32
    return %c0_i32, %c0_i32_0 : i32, i32
  }
  func.func @transform_2(%arg0: i32) -> (i32, i32) {
    %c0_i32 = arith.constant 0 : i32
    %c0_i32_0 = arith.constant 0 : i32
    %c0_i32_1 = arith.constant 0 : i32
    return %c0_i32, %c0_i32_0 : i32, i32
  }
  func.func @transform_3(%arg0: i32) -> (i32, i32) {
    %c0_i32 = arith.constant 0 : i32
    %c0_i32_0 = arith.constant 0 : i32
    return %c0_i32, %arg0 : i32, i32
  }
}

module attributes {stable_mosaic.version = 11 : i64} {
  func.func @_final_conv_softmax2_kernel(%arg0: i32, %arg1: memref<8x512xbf16, #tpu.memory_space<vmem>>, %arg2: memref<2x8xbf16, #tpu.memory_space<vmem>>, %arg3: memref<2x1xf32, #tpu.memory_space<vmem>>, %arg4: memref<2x512xf32, #tpu.memory_space<vmem>>) attributes {dimension_semantics = [#tpu.dimension_semantics<parallel>], iteration_bounds = array<i64: 1>, scalar_prefetch = 0 : i64, scratch_operands = 0 : i64, tpu.core_type = #tpu.core_type<tc>, window_params = [{transform_indices = @transform_0, window_bounds = array<i64: 8, 512>}, {pipeline_mode = #tpu.pipeline_mode<synchronous>, transform_indices = @transform_1, window_bounds = array<i64: 2, 8>}, {pipeline_mode = #tpu.pipeline_mode<synchronous>, transform_indices = @transform_2, window_bounds = array<i64: 2, 1>}, {transform_indices = @transform_3, window_bounds = array<i64: 2, 512>}]} {
    %c0 = arith.constant 0 : index
    %c0_0 = arith.constant 0 : index
    %0 = vector.load %arg2[%c0, %c0_0] : memref<2x8xbf16, #tpu.memory_space<vmem>>, vector<2x8xbf16>
    %c0_1 = arith.constant 0 : index
    %c0_2 = arith.constant 0 : index
    %1 = vector.load %arg1[%c0_1, %c0_2] : memref<8x512xbf16, #tpu.memory_space<vmem>>, vector<8x512xbf16>
    %cst = arith.constant dense<0.000000e+00> : vector<2x512xf32>
    %2 = tpu.matmul %0, %1, %cst {dimension_numbers = #tpu.dot_dimension_numbers<[1], [0], [0], [1], [0, 0, 1, 1], [], []>} : vector<2x8xbf16>, vector<8x512xbf16>, vector<2x512xf32> -> vector<2x512xf32>
    %c0_3 = arith.constant 0 : index
    %c0_4 = arith.constant 0 : index
    %3 = vector.load %arg3[%c0_3, %c0_4] : memref<2x1xf32, #tpu.memory_space<vmem>>, vector<2x1xf32>
    %4 = vector.broadcast %3 : vector<2x1xf32> to vector<2x512xf32>
    %5 = arith.addf %2, %4 : vector<2x512xf32>
    %6 = vector.extract_strided_slice %5 {offsets = [0, 0], sizes = [1, 512], strides = [1, 1]} : vector<2x512xf32> to vector<1x512xf32>
    %7 = vector.extract_strided_slice %5 {offsets = [1, 0], sizes = [1, 512], strides = [1, 1]} : vector<2x512xf32> to vector<1x512xf32>
    %8 = arith.subf %6, %7 : vector<1x512xf32>
    %cst_5 = arith.constant 0.000000e+00 : f32
    %9 = vector.broadcast %cst_5 : f32 to vector<1x512xf32>
    %10 = arith.subf %9, %8 : vector<1x512xf32>
    %11 = math.exp %10 : vector<1x512xf32>
    %cst_6 = arith.constant 1.000000e+00 : f32
    %12 = vector.broadcast %cst_6 : f32 to vector<1x512xf32>
    %13 = arith.addf %12, %11 : vector<1x512xf32>
    %cst_7 = arith.constant 1.000000e+00 : f32
    %14 = vector.broadcast %cst_7 : f32 to vector<1x512xf32>
    %15 = arith.divf %14, %13 : vector<1x512xf32>
    %c0_8 = arith.constant 0 : index
    %c0_9 = arith.constant 0 : index
    %16 = vector.load %arg4[%c0_8, %c0_9] : memref<2x512xf32, #tpu.memory_space<vmem>>, vector<1x512xf32>
    tpu.vector_store %arg4[%c0_8, %c0_9], %15 {strides = array<i32>} : memref<2x512xf32, #tpu.memory_space<vmem>>, vector<1x512xf32>,
    %cst_10 = arith.constant 1.000000e+00 : f32
    %17 = vector.broadcast %cst_10 : f32 to vector<1x512xf32>
    %18 = arith.subf %17, %15 : vector<1x512xf32>
    %c1 = arith.constant 1 : index
    %c0_11 = arith.constant 0 : index
    %19 = vector.load %arg4[%c1, %c0_11] : memref<2x512xf32, #tpu.memory_space<vmem>>, vector<1x512xf32>
    tpu.vector_store %arg4[%c1, %c0_11], %18 {strides = array<i32>} : memref<2x512xf32, #tpu.memory_space<vmem>>, vector<1x512xf32>,
    return
  }
  func.func @transform_0(%arg0: i32) -> (i32, i32) {
    %c0_i32 = arith.constant 0 : i32
    %c0_i32_0 = arith.constant 0 : i32
    return %c0_i32, %arg0 : i32, i32
  }
  func.func @transform_1(%arg0: i32) -> (i32, i32) {
    %c0_i32 = arith.constant 0 : i32
    %c0_i32_0 = arith.constant 0 : i32
    %c0_i32_1 = arith.constant 0 : i32
    return %c0_i32, %c0_i32_0 : i32, i32
  }
  func.func @transform_2(%arg0: i32) -> (i32, i32) {
    %c0_i32 = arith.constant 0 : i32
    %c0_i32_0 = arith.constant 0 : i32
    %c0_i32_1 = arith.constant 0 : i32
    return %c0_i32, %c0_i32_0 : i32, i32
  }
  func.func @transform_3(%arg0: i32) -> (i32, i32) {
    %c0_i32 = arith.constant 0 : i32
    %c0_i32_0 = arith.constant 0 : i32
    return %c0_i32, %arg0 : i32, i32
  }
}

</mosaic_0001>

<bundles_post_ra>
// kernel: downup_forward.18
= control target key start
LH: loop header
LB: loop body
LE: loop exit
PB: predicated region body
PF: predicated region fallthrough
CT: control target
= control target key end

     0   :  { %vm70_vm0 = vcmask 1044480   ;;  %vm71_vm1 = vcmask 1045504   ;;  %v239_v1 = vmov 65535   ;;  %v240_v3 = vmov 0   ;;  %s295_s0 = inlined_call_operand.vmem [shape: bf16[27,512], index: 0, kind: input, shape index: {}]   ;;  %s296_s2 = inlined_call_operand.vmem [shape: f32[4,1], index: 2, kind: input, shape index: {}]   ;;  %s297_s1 = inlined_call_operand.vmem [shape: bf16[4,27], index: 1, kind: input, shape index: {}]   ;;  %s298_s3 = inlined_call_operand.vmem [shape: bf16[4,512], index: 3, kind: output, shape index: {}]  }
   0x1   :  { %v227_v0 = vld [vmem:[%s295_s0 + $0x4] ss:$16 sps:$4 sm:$0xff]   ;;  %v72_v2 = vsel %vm70_vm0, 4294967295, %v239_v1  ;;  %118 = vmatprep.mubr.bf16.mxu0 %v240_v3  ;;  %159 = vmatprep.mubr.bf16.mxu1 %v240_v3  ;;  %v229_v4 = vld [vmem:[%s295_s0 + $0xc] ss:$16 sps:$4 sm:$0xff]   ;;  %vm66_vm2 = vcmask 220160   ;;  %v193_v20 = vlaneseq }
   0x2   :  { %226 = vset.pattern.permute.xlu0 %v240_v3  ;;  %86 = vmatprep.subr.bf16.mxu0 %v227_v0  ;;  %v231_v5 = vld [vmem:[%s295_s0] ss:$16 sps:$4 sm:$0xff]   ;;  %v232_v6 = vld [vmem:[%s295_s0 + $0x8] ss:$16 sps:$4 sm:$0xff]   ;;  %v73_v7 = vsel %vm71_vm1, %v72_v2, 0 }
   0x3   :  { %127 = vmatprep.subr.bf16.mxu1 %v229_v4  ;;  %v233_v8 = vld [vmem:[%s295_s0 + $0x24] ss:$16 sps:$4 sm:$0x3f]   ;;  %87 = vmatpush1.bf16.msra.mxu0 %v231_v5  ;;  %v235_v9 = vld [vmem:[%s295_s0 + $0x2c] ss:$16 sps:$4 sm:$0x3f]  }
   0x4   :  { %128 = vmatpush1.bf16.msra.mxu1 %v232_v6  ;;  %v78_v10 = vand.u32 %v233_v8, %v73_v7  ;;  %v237_v11 = vld [vmem:[%s295_s0 + $0x20] ss:$16 sps:$4 sm:$0x3f]   ;;  %v238_v12 = vld [vmem:[%s295_s0 + $0x28] ss:$16 sps:$4 sm:$0x3f]   ;;  %v84_v13 = vand.u32 %v235_v9, %v73_v7 }
   0x5   :  { %v24_v14 = vld [vmem:[%s296_s2] sm:$0xf]  ;;  %v75_v15 = vand.u32 %v237_v11, %v73_v7  ;;  %v81_v16 = vand.u32 %v238_v12, %v73_v7  ;;  %v241_v18 = vmov 1983009808   ;;  %v194_v28 = vshrl.u32 %v193_v20, 7 }
   0x6   :  { %88 = vmatprep.subr.bf16.mxu0 %v78_v10  ;;  %27 = vperm.xlu0 %226, %v24_v14   ;;  %v15_v17 = vld [vmem:[%s297_s1] sm:$0x3]  ;;  %v191_v19 = vunpack.c.l.s4 %v241_v18 }
   0x7   :  { %129 = vmatprep.subr.bf16.mxu1 %v84_v13  ;;  %89 = vmatpush1.bf16.msra.mxu0 %v75_v15 }
   0x8   :  { %130 = vmatpush1.bf16.msra.mxu1 %v81_v16  ;;  %v192_v27 = vunpack.c.0.s8 %v191_v19 }
   0xa   :  { %219 = vmatmul.mubr.msk.bf16.vlgmr.msra.gmra.mrb[0].mxu0 %vm66_vm2, %v15_v17  ;;  %v195_v40 = vsub.s32 %v192_v27, %v194_v28 }
   0xb   :  { %220 = vmatmul.mubr.msk.bf16.vlgmr.msra.gmra.mrb[0].mxu1 %vm66_vm2, %v15_v17 }
  0x85   :  { %v28_v21 = vpop.permute.xlu0 %27 }
  0xdd   :  { %v120_v22 = vpop.f32.mrb[0].mxu0 }
  0xde   :  { %v161_v23 = vpop.f32.mrb[0].mxu1  ;;  %v121_v24 = vadd.f32 %v120_v22, %v28_v21  ;;  %v122_v26 = vpop.f32.mrb[1].mxu0 }
  0xdf   :  { %v162_v25 = vadd.f32 %v161_v23, %v28_v21  ;;  %v163_v29 = vpop.f32.mrb[1].mxu1  ;;  %v123_v30 = vadd.f32 %v122_v26, %v28_v21  ;;  %v124_v32 = vpop.f32.mrb[2].mxu0 }
  0xe0   :  { %v164_v31 = vadd.f32 %v163_v29, %v28_v21  ;;  %v165_v33 = vpop.f32.mrb[2].mxu1  ;;  %vm168_vm3 = vcmp.ge.f32.partialorder %v121_v24, 0.0  ;;  %v172_v34 = vmul.f32 0.01, %v121_v24  ;;  %v125_v41 = vpop.f32.mrb[3].mxu0 }
  0xe1   :  { %vm170_vm4 = vcmp.ge.f32.partialorder %v162_v25, 0.0  ;;  %v174_v35 = vmul.f32 0.01, %v162_v25  ;;  %vm169_vm5 = vcmp.ge.f32.partialorder %v123_v30, 0.0  ;;  %v173_v36 = vmul.f32 0.01, %v123_v30 }
  0xe2   :  { %vm171_vm6 = vcmp.ge.f32.partialorder %v164_v31, 0.0  ;;  %v175_v37 = vmul.f32 0.01, %v164_v31  ;;  %v176_v38 = vsel %vm168_vm3, %v121_v24, %v172_v34  ;;  %v166_v42 = vpop.f32.mrb[3].mxu1 }
  0xe3   :  { %v178_v39 = vsel %vm170_vm4, %v162_v25, %v174_v35  ;;  %v177_v43 = vsel %vm169_vm5, %v123_v30, %v173_v36 }
  0xe4   :  { %v179_v44 = vsel %vm171_vm6, %v164_v31, %v175_v37  ;;  %v221_v45 = vpack.c.bf16 %v177_v43, %v176_v38 }
  0xe5   :  { %v222_v46 = vpack.c.bf16 %v179_v44, %v178_v39 }
  0xe6   :  { %v196_v47 = vrot.slane %v221_v45, %v195_v40 }
  0xe7   :  { %v203_v48 = vrot.slane %v222_v46, %v195_v40 }
  0xe9   :  { %v204_v49 = vcombine.low %v196_v47, %v203_v48 }
  0xeb   :  { %206 = vst [vmem:[%s298_s3] sm:$0xff] %v204_v49 }

// kernel: downup_forward.19
= control target key start
LH: loop header
LB: loop body
LE: loop exit
PB: predicated region body
PF: predicated region fallthrough
CT: control target
= control target key end

     0   :  { %v399_v1 = vmov 0   ;;  %vm190_vm0 = vcmask 1045504   ;;  %vm186_vm1 = vcmask 883712   ;;  %s516_s0 = inlined_call_operand.vmem [shape: bf16[108,512], index: 0, kind: input, shape index: {}]   ;;  %s517_s2 = inlined_call_operand.vmem [shape: f32[8,1], index: 2, kind: input, shape index: {}]   ;;  %s518_s1 = inlined_call_operand.vmem [shape: bf16[8,108], index: 1, kind: input, shape index: {}]   ;;  %s519_s3 = inlined_call_operand.vmem [shape: bf16[8,512], index: 3, kind: output, shape index: {}]  }
   0x1   :  { %v357_v0 = vld [vmem:[%s516_s0 + $0x4] ss:$16 sps:$4 sm:$0xff]   ;;  %235 = vmatprep.mubr.bf16.mxu0 %v399_v1  ;;  %276 = vmatprep.mubr.bf16.mxu1 %v399_v1  ;;  %v359_v2 = vld [vmem:[%s516_s0 + $0xc] ss:$16 sps:$4 sm:$0xff]   ;;  %v361_v3 = vld [vmem:[%s516_s0] ss:$16 sps:$4 sm:$0xff]  }
   0x2   :  { %356 = vset.pattern.permute.xlu0 %v399_v1  ;;  %203 = vmatprep.subr.bf16.mxu0 %v357_v0  ;;  %v362_v4 = vld [vmem:[%s516_s0 + $0x8] ss:$16 sps:$4 sm:$0xff]   ;;  %v363_v5 = vld [vmem:[%s516_s0 + $0x24] ss:$16 sps:$4 sm:$0xff]   ;;  %v365_v6 = vld [vmem:[%s516_s0 + $0x2c] ss:$16 sps:$4 sm:$0xff]  }
   0x3   :  { %244 = vmatprep.subr.bf16.mxu1 %v359_v2  ;;  %204 = vmatpush1.bf16.msra.mxu0 %v361_v3  ;;  %v367_v7 = vld [vmem:[%s516_s0 + $0x20] ss:$16 sps:$4 sm:$0xff]   ;;  %v368_v8 = vld [vmem:[%s516_s0 + $0x28] ss:$16 sps:$4 sm:$0xff]   ;;  %v369_v9 = vld [vmem:[%s516_s0 + $0x44] ss:$16 sps:$4 sm:$0xff]  }
   0x4   :  { %245 = vmatpush1.bf16.msra.mxu1 %v362_v4  ;;  %205 = vmatprep.subr.bf16.mxu0 %v363_v5  ;;  %v371_v10 = vld [vmem:[%s516_s0 + $0x4c] ss:$16 sps:$4 sm:$0xff]   ;;  %v373_v11 = vld [vmem:[%s516_s0 + $0x40] ss:$16 sps:$4 sm:$0xff]   ;;  %v374_v12 = vld [vmem:[%s516_s0 + $0x48] ss:$16 sps:$4 sm:$0xff]  }
   0x5   :  { %246 = vmatprep.subr.bf16.mxu1 %v365_v6  ;;  %v375_v13 = vld [vmem:[%s516_s0 + $0x64] ss:$16 sps:$4 sm:$0xff]   ;;  %v377_v14 = vld [vmem:[%s516_s0 + $0x6c] ss:$16 sps:$4 sm:$0xff]   ;;  %v379_v15 = vld [vmem:[%s516_s0 + $0x60] ss:$16 sps:$4 sm:$0xff]  }
   0x6   :  { %v380_v16 = vld [vmem:[%s516_s0 + $0x68] ss:$16 sps:$4 sm:$0xff]   ;;  %v381_v17 = vld [vmem:[%s516_s0 + $0x84] ss:$16 sps:$4 sm:$0xff]   ;;  %v383_v18 = vld [vmem:[%s516_s0 + $0x8c] ss:$16 sps:$4 sm:$0xff]  }
   0x7   :  { %206 = vmatpush1.bf16.msra.mxu0 %v367_v7  ;;  %v385_v19 = vld [vmem:[%s516_s0 + $0x80] ss:$16 sps:$4 sm:$0xff]   ;;  %v386_v20 = vld [vmem:[%s516_s0 + $0x88] ss:$16 sps:$4 sm:$0xff]   ;;  %v387_v21 = vld [vmem:[%s516_s0 + $0xa4] ss:$16 sps:$4 sm:$0xff]  }
   0x8   :  { %247 = vmatpush1.bf16.msra.mxu1 %v368_v8  ;;  %207 = vmatprep.subr.bf16.mxu0 %v369_v9  ;;  %v389_v22 = vld [vmem:[%s516_s0 + $0xac] ss:$16 sps:$4 sm:$0xff]   ;;  %v391_v23 = vld [vmem:[%s516_s0 + $0xa0] ss:$16 sps:$4 sm:$0xff]   ;;  %v392_v24 = vld [vmem:[%s516_s0 + $0xa8] ss:$16 sps:$4 sm:$0xff]  }
   0x9   :  { %248 = vmatprep.subr.bf16.mxu1 %v371_v10  ;;  %v44_v25 = vld [vmem:[%s517_s2] sm:$0xff]  ;;  %v395_v27 = vld [vmem:[%s516_s0 + $0xcc] ss:$16 sps:$4 sm:$0x3f]  }
   0xa   :  { %v393_v26 = vld [vmem:[%s516_s0 + $0xc4] ss:$16 sps:$4 sm:$0x3f]   ;;  %v397_v28 = vld [vmem:[%s516_s0 + $0xc0] ss:$16 sps:$4 sm:$0x3f]   ;;  %47 = vperm.xlu0 %356, %v44_v25  }
   0xb   :  { %208 = vmatpush1.bf16.msra.mxu0 %v373_v11  ;;  %v398_v29 = vld [vmem:[%s516_s0 + $0xc8] ss:$16 sps:$4 sm:$0x3f]   ;;  %v192_v30 = vsel %vm190_vm0, %v397_v28, 0  ;;  %v15_v32 = vld [vmem:[%s518_s1] sm:$0xf] }
   0xc   :  { %249 = vmatpush1.bf16.msra.mxu1 %v374_v12  ;;  %209 = vmatprep.subr.bf16.mxu0 %v375_v13  ;;  %v198_v31 = vsel %vm190_vm0, %v398_v29, 0 }
   0xd   :  { %250 = vmatprep.subr.bf16.mxu1 %v377_v14 }
   0xf   :  { %210 = vmatpush1.bf16.msra.mxu0 %v379_v15 }
  0x10   :  { %251 = vmatpush1.bf16.msra.mxu1 %v380_v16  ;;  %211 = vmatprep.subr.bf16.mxu0 %v381_v17 }
  0x11   :  { %252 = vmatprep.subr.bf16.mxu1 %v383_v18 }
  0x13   :  { %212 = vmatpush1.bf16.msra.mxu0 %v385_v19 }
  0x14   :  { %253 = vmatpush1.bf16.msra.mxu1 %v386_v20  ;;  %213 = vmatprep.subr.bf16.mxu0 %v387_v21 }
  0x15   :  { %254 = vmatprep.subr.bf16.mxu1 %v389_v22 }
  0x17   :  { %214 = vmatpush1.bf16.msra.mxu0 %v391_v23 }
  0x18   :  { %255 = vmatpush1.bf16.msra.mxu1 %v392_v24  ;;  %347 = vmatprep.subr.msk.bf16.mxu0 %vm190_vm0, %v393_v26 }
  0x19   :  { %349 = vmatprep.subr.msk.bf16.mxu1 %vm190_vm0, %v395_v27 }
  0x1b   :  { %216 = vmatpush1.bf16.msra.mxu0 %v192_v30 }
  0x1c   :  { %257 = vmatpush1.bf16.msra.mxu1 %v198_v31 }
  0x1e   :  { %348 = vmatmul.mubr.msk.bf16.vlgmr.msra.gmra.mrb[0].mxu0 %vm186_vm1, %v15_v32 }
  0x1f   :  { %350 = vmatmul.mubr.msk.bf16.vlgmr.msra.gmra.mrb[0].mxu1 %vm186_vm1, %v15_v32 }
  0x89   :  { %v48_v33 = vpop.permute.xlu0 %47 }
  0xf1   :  { %v237_v34 = vpop.f32.mrb[0].mxu0 }
  0xf2   :  { %v278_v35 = vpop.f32.mrb[0].mxu1  ;;  %v238_v36 = vadd.f32 %v237_v34, %v48_v33  ;;  %v239_v38 = vpop.f32.mrb[1].mxu0 }
  0xf3   :  { %v279_v37 = vadd.f32 %v278_v35, %v48_v33  ;;  %v280_v39 = vpop.f32.mrb[1].mxu1  ;;  %v240_v40 = vadd.f32 %v239_v38, %v48_v33  ;;  %v241_v42 = vpop.f32.mrb[2].mxu0 }
  0xf4   :  { %v281_v41 = vadd.f32 %v280_v39, %v48_v33  ;;  %v282_v43 = vpop.f32.mrb[2].mxu1  ;;  %vm285_vm2 = vcmp.ge.f32.partialorder %v238_v36, 0.0  ;;  %v289_v44 = vmul.f32 0.01, %v238_v36  ;;  %v242_v50 = vpop.f32.mrb[3].mxu0 }
  0xf5   :  { %vm287_vm3 = vcmp.ge.f32.partialorder %v279_v37, 0.0  ;;  %v291_v45 = vmul.f32 0.01, %v279_v37  ;;  %vm286_vm4 = vcmp.ge.f32.partialorder %v240_v40, 0.0  ;;  %v290_v46 = vmul.f32 0.01, %v240_v40 }
  0xf6   :  { %vm288_vm5 = vcmp.ge.f32.partialorder %v281_v41, 0.0  ;;  %v292_v47 = vmul.f32 0.01, %v281_v41  ;;  %v293_v48 = vsel %vm285_vm2, %v238_v36, %v289_v44  ;;  %v283_v51 = vpop.f32.mrb[3].mxu1 }
  0xf7   :  { %v295_v49 = vsel %vm287_vm3, %v279_v37, %v291_v45  ;;  %v294_v52 = vsel %vm286_vm4, %v240_v40, %v290_v46 }
  0xf8   :  { %v296_v53 = vsel %vm288_vm5, %v281_v41, %v292_v47  ;;  %v353_v54 = vpack.c.bf16 %v294_v52, %v293_v48 }
  0xf9   :  { %v354_v55 = vpack.c.bf16 %v296_v53, %v295_v49 }
  0xfa   :  { %313 = vst [vmem:[%s519_s3] sm:$0xff] %v353_v54 }
  0xfb   :  { %314 = vst [vmem:[%s519_s3 + $0x8] sm:$0xff] %v354_v55 }

// kernel: downup_forward.20
= control target key start
LH: loop header
LB: loop body
LE: loop exit
PB: predicated region body
PF: predicated region fallthrough
CT: control target
= control target key end

     0   :  { %s79_s0 = inlined_call_operand.vmem [shape: bf16[8,8,128], index: 0, kind: input, shape index: {}]   ;;  %s80_s1 = inlined_call_operand.vmem [shape: bf16[8,128], index: 1, kind: output, shape index: {}]  }
   0x1   :  { %v8_v0 = vld [vmem:[%s79_s0] sm:$0xf]  ;;  %v35_v1 = vld [vmem:[%s79_s0 + $0x4] sm:$0xf]  ;;  %v36_v2 = vld [vmem:[%s79_s0 + $0x8] sm:$0xf] }
   0x2   :  { %v11_v3 = vmax.bf16 %v35_v1, %v8_v0  ;;  %v37_v4 = vld [vmem:[%s79_s0 + $0xc] sm:$0xf]  ;;  %v38_v6 = vld [vmem:[%s79_s0 + $0x10] sm:$0xf]  ;;  %v39_v8 = vld [vmem:[%s79_s0 + $0x14] sm:$0xf] }
   0x3   :  { %v40_v10 = vld [vmem:[%s79_s0 + $0x18] sm:$0xf]  ;;  %v41_v12 = vld [vmem:[%s79_s0 + $0x1c] sm:$0xf] }
   0x4   :  { %v14_v5 = vmax.bf16 %v36_v2, %v11_v3 }
   0x6   :  { %v17_v7 = vmax.bf16 %v37_v4, %v14_v5 }
   0x8   :  { %v20_v9 = vmax.bf16 %v38_v6, %v17_v7 }
   0xa   :  { %v23_v11 = vmax.bf16 %v39_v8, %v20_v9 }
   0xc   :  { %v26_v13 = vmax.bf16 %v40_v10, %v23_v11 }
   0xe   :  { %v29_v14 = vmax.bf16 %v41_v12, %v26_v13 }
  0x10   :  { %30 = vst [vmem:[%s80_s1] sm:$0xf] %v29_v14 }

// kernel: downup_forward.21
= control target key start
LH: loop header
LB: loop body
LE: loop exit
PB: predicated region body
PF: predicated region fallthrough
CT: control target
= control target key end

     0   :  { %v228_v0 = vmov 0   ;;  %vm136_vm0 = vcmask 719872   ;;  %vm140_vm1 = vcmask 1043456   ;;  %s300_s0 = inlined_call_operand.vmem [shape: bf16[216,128], index: 0, kind: input, shape index: {}]   ;;  %s301_s1 = inlined_call_operand.vmem [shape: bf16[8,216], index: 1, kind: input, shape index: {}]   ;;  %s302_s2 = inlined_call_operand.vmem [shape: f32[8,1], index: 2, kind: input, shape index: {}]   ;;  %s303_s3 = inlined_call_operand.vmem [shape: bf16[8,128], index: 3, kind: output, shape index: {}]  }
   0x1   :  { %144 = vmatprep.subr.bf16.mxu0 %v228_v0  ;;  %v212_v1 = vld [vmem:[%s300_s0] sm:$0xff]   ;;  %211 = vset.pattern.permute.xlu0 %v228_v0  ;;  %v213_v2 = vld [vmem:[%s300_s0 + $0x8] sm:$0xff]   ;;  %v214_v3 = vld [vmem:[%s300_s0 + $0x10] sm:$0xff]  }
   0x2   :  { %145 = vmatpush1.bf16.msra.mxu0 %v212_v1  ;;  %v215_v4 = vld [vmem:[%s300_s0 + $0x18] sm:$0xff]   ;;  %v15_v5 = vld [vmem:[%s301_s1] sm:$0xff]  ;;  %v217_v9 = vld [vmem:[%s300_s0 + $0x28] sm:$0xff]  }
   0x3   :  { %146 = vmatprep.subr.bf16.mxu0 %v228_v0  ;;  %v216_v6 = vld [vmem:[%s300_s0 + $0x20] sm:$0xff]   ;;  %v194_v7 = vcombine.high %v15_v5, %v15_v5  ;;  %v218_v10 = vld [vmem:[%s300_s0 + $0x30] sm:$0xff]   ;;  %v219_v11 = vld [vmem:[%s300_s0 + $0x38] sm:$0xff]   ;;  %v193_v19 = vcombine.low %v15_v5, %v15_v5 }
   0x4   :  { %v43_v8 = vld [vmem:[%s302_s2] sm:$0xff]  ;;  %v221_v13 = vld [vmem:[%s300_s0 + $0x48] sm:$0xff]   ;;  %v222_v14 = vld [vmem:[%s300_s0 + $0x50] sm:$0xff]  }
   0x5   :  { %46 = vperm.xlu0 %211, %v43_v8   ;;  %209 = vmatprep.mubr.msk.bf16.mxu0 %vm136_vm0, %v194_v7  ;;  %v220_v12 = vld [vmem:[%s300_s0 + $0x40] sm:$0xff]   ;;  %v223_v15 = vld [vmem:[%s300_s0 + $0x58] sm:$0xff]   ;;  %v225_v17 = vld [vmem:[%s300_s0 + $0x68] ss:$0 sps:$4 sm:$0xff]  }
   0x6   :  { %147 = vmatpush1.bf16.msra.mxu0 %v213_v2  ;;  %v224_v16 = vld [vmem:[%s300_s0 + $0x60] sm:$0xff]   ;;  %v142_v18 = vsel %vm140_vm1, %v225_v17, 0 }
   0x7   :  { %148 = vmatprep.subr.bf16.mxu0 %v228_v0 }
   0xa   :  { %149 = vmatpush1.bf16.msra.mxu0 %v214_v3 }
   0xb   :  { %150 = vmatprep.subr.bf16.mxu0 %v228_v0 }
   0xe   :  { %151 = vmatpush1.bf16.msra.mxu0 %v215_v4 }
   0xf   :  { %152 = vmatprep.subr.bf16.mxu0 %v228_v0 }
  0x12   :  { %153 = vmatpush1.bf16.msra.mxu0 %v216_v6 }
  0x13   :  { %154 = vmatprep.subr.bf16.mxu0 %v228_v0 }
  0x16   :  { %155 = vmatpush1.bf16.msra.mxu0 %v217_v9 }
  0x17   :  { %156 = vmatprep.subr.bf16.mxu0 %v228_v0 }
  0x1a   :  { %157 = vmatpush1.bf16.msra.mxu0 %v218_v10 }
  0x1b   :  { %158 = vmatprep.subr.bf16.mxu0 %v228_v0 }
  0x1e   :  { %159 = vmatpush1.bf16.msra.mxu0 %v219_v11 }
  0x1f   :  { %160 = vmatprep.subr.bf16.mxu0 %v228_v0 }
  0x22   :  { %161 = vmatpush1.bf16.msra.mxu0 %v220_v12 }
  0x23   :  { %162 = vmatprep.subr.bf16.mxu0 %v228_v0 }
  0x26   :  { %163 = vmatpush1.bf16.msra.mxu0 %v221_v13 }
  0x27   :  { %164 = vmatprep.subr.bf16.mxu0 %v228_v0 }
  0x2a   :  { %165 = vmatpush1.bf16.msra.mxu0 %v222_v14 }
  0x2b   :  { %166 = vmatprep.subr.bf16.mxu0 %v228_v0 }
  0x2e   :  { %167 = vmatpush1.bf16.msra.mxu0 %v223_v15 }
  0x2f   :  { %168 = vmatprep.subr.bf16.mxu0 %v228_v0 }
  0x32   :  { %169 = vmatpush1.bf16.msra.mxu0 %v224_v16 }
  0x33   :  { %170 = vmatprep.subr.bf16.mxu0 %v228_v0 }
  0x36   :  { %171 = vmatpush1.bf16.msra.mxu0 %v142_v18 }
  0x39   :  { %177 = vmatmul.mubr.bf16.vlgmr.msra.gmra.mrb[0].mxu0 %v193_v19 }
  0x84   :  { %v47_v20 = vpop.permute.xlu0 %46 }
 0x10c   :  { %v178_v21 = vpop.f32.mrb[0].mxu0 }
 0x10d   :  { %v179_v22 = vadd.f32 %v178_v21, %v47_v20  ;;  %v180_v23 = vpop.f32.mrb[1].mxu0 }
 0x10e   :  { %v181_v24 = vpop.f32.mrb[2].mxu0 }
 0x10f   :  { %vm184_vm2 = vcmp.ge.f32.partialorder %v179_v22, 0.0  ;;  %v185_v25 = vmul.f32 0.01, %v179_v22  ;;  %v182_v26 = vpop.f32.mrb[3].mxu0 }
 0x111   :  { %v186_v27 = vsel %vm184_vm2, %v179_v22, %v185_v25 }
 0x112   :  { %v187_v28 = vpack.c.bf16 %v186_v27, %v186_v27 }
 0x114   :  { %188 = vst [vmem:[%s303_s3] sm:$0xf] %v187_v28 }

// kernel: downup_forward.22
= control target key start
LH: loop header
LB: loop body
LE: loop exit
PB: predicated region body
PF: predicated region fallthrough
CT: control target
= control target key end

     0   :  { %v260_v0 = vmov 0   ;;  %vm146_vm0 = vcmask 719872   ;;  %vm150_vm1 = vcmask 1043456   ;;  %s338_s0 = inlined_call_operand.vmem [shape: bf16[216,128], index: 0, kind: input, shape index: {}]   ;;  %s339_s1 = inlined_call_operand.vmem [shape: bf16[16,216], index: 1, kind: input, shape index: {}]   ;;  %s340_s2 = inlined_call_operand.vmem [shape: f32[16,1], index: 2, kind: input, shape index: {}]   ;;  %s341_s3 = inlined_call_operand.vmem [shape: bf16[16,128], index: 3, kind: output, shape index: {}]  }
   0x1   :  { %154 = vmatprep.subr.bf16.mxu0 %v260_v0  ;;  %v243_v1 = vld [vmem:[%s338_s0] sm:$0xff]   ;;  %242 = vset.pattern.permute.xlu0 %v260_v0  ;;  %v244_v2 = vld [vmem:[%s338_s0 + $0x8] sm:$0xff]   ;;  %v245_v3 = vld [vmem:[%s338_s0 + $0x10] sm:$0xff]  }
   0x2   :  { %155 = vmatpush1.bf16.msra.mxu0 %v243_v1  ;;  %v246_v4 = vld [vmem:[%s338_s0 + $0x18] sm:$0xff]   ;;  %v247_v5 = vld [vmem:[%s338_s0 + $0x20] sm:$0xff]   ;;  %v45_v8 = vld [vmem:[%s340_s2 + $0x8] sm:$0xff] }
   0x3   :  { %156 = vmatprep.subr.bf16.mxu0 %v260_v0  ;;  %v259_v6 = vld [vmem:[%s339_s1 + $0x4] ss:$8 sps:$4 sm:$0xff]   ;;  %v249_v10 = vld [vmem:[%s338_s0 + $0x30] sm:$0xff]   ;;  %v250_v11 = vld [vmem:[%s338_s0 + $0x38] sm:$0xff]  }
   0x4   :  { %v44_v7 = vld [vmem:[%s340_s2] sm:$0xff]  ;;  %231 = vmatprep.mubr.msk.bf16.mxu0 %vm146_vm0, %v259_v6  ;;  %v248_v9 = vld [vmem:[%s338_s0 + $0x28] sm:$0xff]   ;;  %v253_v14 = vld [vmem:[%s338_s0 + $0x50] sm:$0xff]  }
   0x5   :  { %48 = vperm.xlu0 %242, %v44_v7   ;;  %v251_v12 = vld [vmem:[%s338_s0 + $0x40] sm:$0xff]   ;;  %v252_v13 = vld [vmem:[%s338_s0 + $0x48] sm:$0xff]   ;;  %v254_v15 = vld [vmem:[%s338_s0 + $0x58] sm:$0xff]  }
   0x6   :  { %157 = vmatpush1.bf16.msra.mxu0 %v244_v2  ;;  %v255_v16 = vld [vmem:[%s338_s0 + $0x60] sm:$0xff]   ;;  %v256_v17 = vld [vmem:[%s338_s0 + $0x68] ss:$0 sps:$4 sm:$0xff]  }
   0x7   :  { %158 = vmatprep.subr.bf16.mxu0 %v260_v0  ;;  %v152_v18 = vsel %vm150_vm1, %v256_v17, 0  ;;  %v257_v19 = vld [vmem:[%s339_s1] ss:$8 sps:$4 sm:$0xff]  }
   0x9   :  { %53 = vperm.xlu0 %242, %v45_v8  }
   0xa   :  { %159 = vmatpush1.bf16.msra.mxu0 %v245_v3 }
   0xb   :  { %160 = vmatprep.subr.bf16.mxu0 %v260_v0 }
   0xe   :  { %161 = vmatpush1.bf16.msra.mxu0 %v246_v4 }
   0xf   :  { %162 = vmatprep.subr.bf16.mxu0 %v260_v0 }
  0x12   :  { %163 = vmatpush1.bf16.msra.mxu0 %v247_v5 }
  0x13   :  { %164 = vmatprep.subr.bf16.mxu0 %v260_v0 }
  0x16   :  { %165 = vmatpush1.bf16.msra.mxu0 %v248_v9 }
  0x17   :  { %166 = vmatprep.subr.bf16.mxu0 %v260_v0 }
  0x1a   :  { %167 = vmatpush1.bf16.msra.mxu0 %v249_v10 }
  0x1b   :  { %168 = vmatprep.subr.bf16.mxu0 %v260_v0 }
  0x1e   :  { %169 = vmatpush1.bf16.msra.mxu0 %v250_v11 }
  0x1f   :  { %170 = vmatprep.subr.bf16.mxu0 %v260_v0 }
  0x22   :  { %171 = vmatpush1.bf16.msra.mxu0 %v251_v12 }
  0x23   :  { %172 = vmatprep.subr.bf16.mxu0 %v260_v0 }
  0x26   :  { %173 = vmatpush1.bf16.msra.mxu0 %v252_v13 }
  0x27   :  { %174 = vmatprep.subr.bf16.mxu0 %v260_v0 }
  0x2a   :  { %175 = vmatpush1.bf16.msra.mxu0 %v253_v14 }
  0x2b   :  { %176 = vmatprep.subr.bf16.mxu0 %v260_v0 }
  0x2e   :  { %177 = vmatpush1.bf16.msra.mxu0 %v254_v15 }
  0x2f   :  { %178 = vmatprep.subr.bf16.mxu0 %v260_v0 }
  0x32   :  { %179 = vmatpush1.bf16.msra.mxu0 %v255_v16 }
  0x33   :  { %180 = vmatprep.subr.bf16.mxu0 %v260_v0 }
  0x36   :  { %181 = vmatpush1.bf16.msra.mxu0 %v152_v18 }
  0x39   :  { %187 = vmatmul.mubr.bf16.vlgmr.msra.gmra.mrb[0].mxu0 %v257_v19 }
  0x84   :  { %v49_v20 = vpop.permute.xlu0 %48 }
  0x88   :  { %v54_v24 = vpop.permute.xlu0 %53 }
 0x10c   :  { %v188_v21 = vpop.f32.mrb[0].mxu0 }
 0x10d   :  { %v189_v22 = vadd.f32 %v188_v21, %v49_v20  ;;  %v190_v23 = vpop.f32.mrb[1].mxu0 }
 0x10e   :  { %v191_v25 = vpop.f32.mrb[2].mxu0 }
 0x10f   :  { %v197_v26 = vmul.f32 0.01, %v189_v22  ;;  %v192_v27 = vadd.f32 %v191_v25, %v54_v24  ;;  %v193_v28 = vpop.f32.mrb[3].mxu0  ;;  %vm195_vm2 = vcmp.ge.f32.partialorder %v189_v22, 0.0 }
 0x111   :  { %vm196_vm3 = vcmp.ge.f32.partialorder %v192_v27, 0.0  ;;  %v198_v29 = vmul.f32 0.01, %v192_v27  ;;  %v199_v30 = vsel %vm195_vm2, %v189_v22, %v197_v26 }
 0x113   :  { %v200_v31 = vsel %vm196_vm3, %v192_v27, %v198_v29 }
 0x114   :  { %v239_v32 = vpack.c.bf16 %v200_v31, %v199_v30 }
 0x116   :  { %240 = vst [vmem:[%s341_s3] sm:$0xff] %v239_v32  }

// kernel: downup_forward.23
= control target key start
LH: loop header
LB: loop body
LE: loop exit
PB: predicated region body
PF: predicated region fallthrough
CT: control target
= control target key end

     0   :  { %s132_s0 = inlined_call_operand.vmem [shape: bf16[8,16,128], index: 0, kind: input, shape index: {}]   ;;  %s133_s1 = inlined_call_operand.vmem [shape: bf16[16,128], index: 1, kind: output, shape index: {}]  }
   0x1   :  { %v8_v0 = vld [vmem:[%s132_s0] sm:$0xf]  ;;  %v9_v1 = vld [vmem:[%s132_s0 + $0x4] sm:$0xf]  ;;  %v51_v2 = vld [vmem:[%s132_s0 + $0x8] sm:$0xf] }
   0x2   :  { %v52_v3 = vld [vmem:[%s132_s0 + $0xc] sm:$0xf]  ;;  %v13_v4 = vmax.bf16 %v51_v2, %v8_v0  ;;  %v53_v5 = vld [vmem:[%s132_s0 + $0x10] sm:$0xf]  ;;  %v54_v6 = vld [vmem:[%s132_s0 + $0x14] sm:$0xf] }
   0x3   :  { %v14_v7 = vmax.bf16 %v52_v3, %v9_v1  ;;  %v55_v8 = vld [vmem:[%s132_s0 + $0x18] sm:$0xf]  ;;  %v56_v10 = vld [vmem:[%s132_s0 + $0x1c] sm:$0xf]  ;;  %v57_v12 = vld [vmem:[%s132_s0 + $0x20] sm:$0xf] }
   0x4   :  { %v18_v9 = vmax.bf16 %v53_v5, %v13_v4  ;;  %v58_v14 = vld [vmem:[%s132_s0 + $0x24] sm:$0xf]  ;;  %v59_v16 = vld [vmem:[%s132_s0 + $0x28] sm:$0xf]  ;;  %v60_v18 = vld [vmem:[%s132_s0 + $0x2c] sm:$0xf] }
   0x5   :  { %v19_v11 = vmax.bf16 %v54_v6, %v14_v7  ;;  %v61_v20 = vld [vmem:[%s132_s0 + $0x30] sm:$0xf]  ;;  %v62_v22 = vld [vmem:[%s132_s0 + $0x34] sm:$0xf]  ;;  %v63_v24 = vld [vmem:[%s132_s0 + $0x38] sm:$0xf] }
   0x6   :  { %v23_v13 = vmax.bf16 %v55_v8, %v18_v9  ;;  %v64_v26 = vld [vmem:[%s132_s0 + $0x3c] sm:$0xf] }
   0x7   :  { %v24_v15 = vmax.bf16 %v56_v10, %v19_v11 }
   0x8   :  { %v28_v17 = vmax.bf16 %v57_v12, %v23_v13 }
   0x9   :  { %v29_v19 = vmax.bf16 %v58_v14, %v24_v15 }
   0xa   :  { %v33_v21 = vmax.bf16 %v59_v16, %v28_v17 }
   0xb   :  { %v34_v23 = vmax.bf16 %v60_v18, %v29_v19 }
   0xc   :  { %v38_v25 = vmax.bf16 %v61_v20, %v33_v21 }
   0xd   :  { %v39_v27 = vmax.bf16 %v62_v22, %v34_v23 }
   0xe   :  { %v43_v28 = vmax.bf16 %v63_v24, %v38_v25 }
   0xf   :  { %v44_v29 = vmax.bf16 %v64_v26, %v39_v27 }
  0x11   :  { %v70_v30 = vcombine.low %v43_v28, %v44_v29 }
  0x13   :  { %69 = vst [vmem:[%s133_s1] sm:$0xff] %v70_v30  }

// kernel: downup_forward.24
= control target key start
LH: loop header
LB: loop body
LE: loop exit
PB: predicated region body
PF: predicated region fallthrough
CT: control target
= control target key end

     0   :  { %v470_v0 = vmov 0   ;;  %vm266_vm0 = vcmask 392192   ;;  %s605_s0 = inlined_call_operand.vmem [shape: bf16[432,128], index: 0, kind: input, shape index: {}]   ;;  %s606_s1 = inlined_call_operand.vmem [shape: bf16[16,432], index: 1, kind: input, shape index: {}]   ;;  %s607_s2 = inlined_call_operand.vmem [shape: f32[16,1], index: 2, kind: input, shape index: {}]   ;;  %s608_s3 = inlined_call_operand.vmem [shape: bf16[16,128], index: 3, kind: output, shape index: {}]  }
   0x1   :  { %311 = vmatprep.subr.bf16.mxu1 %v470_v0  ;;  %v437_v1 = vld [vmem:[%s605_s0 + $0x80] sm:$0xff]   ;;  %436 = vset.pattern.permute.xlu0 %v470_v0  ;;  %v440_v4 = vld [vmem:[%s605_s0 + $0x88] sm:$0xff]   ;;  %v443_v7 = vld [vmem:[%s605_s0 + $0x90] sm:$0xff]  }
   0x2   :  { %v438_v2 = vld [vmem:[%s605_s0 + $0x40] sm:$0xff]   ;;  %312 = vmatpush1.bf16.msra.mxu1 %v437_v1  ;;  %v441_v5 = vld [vmem:[%s605_s0 + $0x48] sm:$0xff]   ;;  %v444_v8 = vld [vmem:[%s605_s0 + $0x50] sm:$0xff]  }
   0x3   :  { %v439_v3 = vld [vmem:[%s605_s0] sm:$0xff]   ;;  %413 = vmatprep.subr.bf16.mxu0 %v438_v2  ;;  %313 = vmatprep.subr.bf16.mxu1 %v470_v0  ;;  %v442_v6 = vld [vmem:[%s605_s0 + $0x8] sm:$0xff]   ;;  %v445_v9 = vld [vmem:[%s605_s0 + $0x10] sm:$0xff]  }
   0x4   :  { %414 = vmatpush3.bf16.msra.mxu0 %v439_v3  ;;  %v446_v10 = vld [vmem:[%s605_s0 + $0x98] sm:$0xff]   ;;  %v450_v13 = vld [vmem:[%s605_s0 + $0x60] sm:$0xff]   ;;  %v453_v16 = vld [vmem:[%s605_s0 + $0x68] sm:$0xff]  }
   0x5   :  { %415 = vmatprep.subr.bf16.mxu0 %v441_v5  ;;  %v447_v11 = vld [vmem:[%s605_s0 + $0x58] sm:$0xff]   ;;  %v449_v14 = vld [vmem:[%s605_s0 + $0xa0] sm:$0xff]   ;;  %v452_v17 = vld [vmem:[%s605_s0 + $0xa8] sm:$0xff]  }
   0x6   :  { %314 = vmatpush1.bf16.msra.mxu1 %v440_v4  ;;  %v448_v12 = vld [vmem:[%s605_s0 + $0x18] sm:$0xff]   ;;  %v451_v15 = vld [vmem:[%s605_s0 + $0x20] sm:$0xff]   ;;  %v454_v18 = vld [vmem:[%s605_s0 + $0x28] sm:$0xff]  }
   0x7   :  { %315 = vmatprep.subr.bf16.mxu1 %v470_v0  ;;  %v456_v19 = vld [vmem:[%s605_s0 + $0x70] sm:$0xff]   ;;  %v458_v22 = vld [vmem:[%s605_s0 + $0xb8] sm:$0xff]   ;;  %v73_v27 = vld [vmem:[%s607_s2] sm:$0xff] }
   0x8   :  { %416 = vmatpush3.bf16.msra.mxu0 %v442_v6  ;;  %v455_v20 = vld [vmem:[%s605_s0 + $0xb0] sm:$0xff]   ;;  %v459_v23 = vld [vmem:[%s605_s0 + $0x78] sm:$0xff]   ;;  %v461_v28 = vld [vmem:[%s605_s0 + $0xc0] sm:$0xff]   ;;  %77 = vperm.xlu0 %436, %v73_v27  }
   0x9   :  { %417 = vmatprep.subr.bf16.mxu0 %v444_v8  ;;  %v457_v21 = vld [vmem:[%s605_s0 + $0x30] sm:$0xff]   ;;  %v460_v25 = vld [vmem:[%s605_s0 + $0x38] sm:$0xff]   ;;  %v74_v30 = vld [vmem:[%s607_s2 + $0x8] sm:$0xff] }
   0xa   :  { %316 = vmatpush1.bf16.msra.mxu1 %v443_v7  ;;  %v464_v24 = vld [vmem:[%s606_s1 + $0x4] ss:$16 sps:$4 sm:$0xff]   ;;  %v469_v26 = vld [vmem:[%s606_s1 + $0xc] ss:$16 sps:$4 sm:$0xff]   ;;  %v462_v29 = vld [vmem:[%s606_s1] ss:$16 sps:$4 sm:$0xff]  }
   0xb   :  { %317 = vmatprep.subr.bf16.mxu1 %v470_v0  ;;  %302 = vmatprep.mubr.bf16.mxu0 %v464_v24  ;;  %v465_v31 = vld [vmem:[%s605_s0 + $0xc8] sm:$0xff]   ;;  %v466_v32 = vld [vmem:[%s605_s0 + $0xd0] sm:$0xff]  }
   0xc   :  { %418 = vmatpush3.bf16.msra.mxu0 %v445_v9  ;;  %403 = vmatprep.mubr.msk.bf16.mxu1 %vm266_vm0, %v469_v26  ;;  %v467_v33 = vld [vmem:[%s606_s1 + $0x8] ss:$16 sps:$4 sm:$0xff]  }
   0xd   :  { %419 = vmatprep.subr.bf16.mxu0 %v447_v11  ;;  %82 = vperm.xlu0 %436, %v74_v30  }
   0xe   :  { %318 = vmatpush1.bf16.msra.mxu1 %v446_v10 }
   0xf   :  { %319 = vmatprep.subr.bf16.mxu1 %v470_v0 }
  0x10   :  { %420 = vmatpush3.bf16.msra.mxu0 %v448_v12 }
  0x11   :  { %421 = vmatprep.subr.bf16.mxu0 %v450_v13 }
  0x12   :  { %320 = vmatpush1.bf16.msra.mxu1 %v449_v14 }
  0x13   :  { %321 = vmatprep.subr.bf16.mxu1 %v470_v0 }
  0x14   :  { %422 = vmatpush3.bf16.msra.mxu0 %v451_v15 }
  0x15   :  { %423 = vmatprep.subr.bf16.mxu0 %v453_v16 }
  0x16   :  { %322 = vmatpush1.bf16.msra.mxu1 %v452_v17 }
  0x17   :  { %323 = vmatprep.subr.bf16.mxu1 %v470_v0 }
  0x18   :  { %424 = vmatpush3.bf16.msra.mxu0 %v454_v18 }
  0x19   :  { %425 = vmatprep.subr.bf16.mxu0 %v456_v19 }
  0x1a   :  { %324 = vmatpush1.bf16.msra.mxu1 %v455_v20 }
  0x1b   :  { %325 = vmatprep.subr.bf16.mxu1 %v470_v0 }
  0x1c   :  { %426 = vmatpush3.bf16.msra.mxu0 %v457_v21 }
  0x1d   :  { %427 = vmatprep.subr.bf16.mxu0 %v459_v23 }
  0x1e   :  { %326 = vmatpush1.bf16.msra.mxu1 %v458_v22 }
  0x1f   :  { %327 = vmatprep.subr.bf16.mxu1 %v470_v0 }
  0x20   :  { %428 = vmatpush3.bf16.msra.mxu0 %v460_v25 }
  0x22   :  { %328 = vmatpush1.bf16.msra.mxu1 %v461_v28 }
  0x23   :  { %303 = vmatmul.mubr.bf16.vlgmr.msra.gmra.mrb[0].mxu0 %v462_v29  ;;  %329 = vmatprep.subr.bf16.mxu1 %v470_v0 }
  0x26   :  { %330 = vmatpush1.bf16.msra.mxu1 %v465_v31 }
  0x27   :  { %331 = vmatprep.subr.bf16.mxu1 %v470_v0 }
  0x2a   :  { %332 = vmatpush1.bf16.msra.mxu1 %v466_v32 }
  0x2d   :  { %344 = vmatmul.mubr.bf16.vlgmr.msra.gmra.mrb[0].mxu1 %v467_v33 }
  0x87   :  { %v78_v36 = vpop.permute.xlu0 %77 }
  0x8c   :  { %v83_v41 = vpop.permute.xlu0 %82 }
  0xf6   :  { %v429_v34 = vpop.f32.mrb[0].mxu0 }
  0xf7   :  { %v430_v35 = vpop.f32.mrb[1].mxu0 }
  0xf8   :  { %v431_v37 = vadd.f32 %v430_v35, %v429_v34  ;;  %v432_v38 = vpop.f32.mrb[2].mxu0 }
  0xf9   :  { %v433_v39 = vpop.f32.mrb[3].mxu0 }
  0xfa   :  { %v434_v40 = vadd.f32 %v433_v39, %v432_v38  ;;  %v305_v42 = vadd.f32 %v431_v37, %v78_v36 }
  0xfc   :  { %v308_v44 = vadd.f32 %v434_v40, %v83_v41 }
 0x100   :  { %v345_v43 = vpop.f32.mrb[0].mxu1 }
 0x101   :  { %v346_v45 = vadd.f32 %v345_v43, %v305_v42  ;;  %v347_v46 = vpop.f32.mrb[1].mxu1 }
 0x102   :  { %v348_v47 = vpop.f32.mrb[2].mxu1 }
 0x103   :  { %v354_v48 = vmul.f32 0.01, %v346_v45  ;;  %v349_v49 = vadd.f32 %v348_v47, %v308_v44  ;;  %v350_v50 = vpop.f32.mrb[3].mxu1  ;;  %vm352_vm1 = vcmp.ge.f32.partialorder %v346_v45, 0.0 }
 0x105   :  { %vm353_vm2 = vcmp.ge.f32.partialorder %v349_v49, 0.0  ;;  %v355_v51 = vmul.f32 0.01, %v349_v49  ;;  %v356_v52 = vsel %vm352_vm1, %v346_v45, %v354_v48 }
 0x107   :  { %v357_v53 = vsel %vm353_vm2, %v349_v49, %v355_v51 }
 0x108   :  { %v411_v54 = vpack.c.bf16 %v357_v53, %v356_v52 }
 0x10a   :  { %412 = vst [vmem:[%s608_s3] sm:$0xff] %v411_v54  }

// kernel: downup_forward.25
= control target key start
LH: loop header
LB: loop body
LE: loop exit
PB: predicated region body
PF: predicated region fallthrough
CT: control target
= control target key end

     0   :  { %v568_v0 = vmov 0   ;;  %vm301_vm0 = vcmask 392192   ;;  %s727_s0 = inlined_call_operand.vmem [shape: bf16[432,128], index: 0, kind: input, shape index: {}]   ;;  %s728_s1 = inlined_call_operand.vmem [shape: bf16[32,432], index: 1, kind: input, shape index: {}]   ;;  %s729_s2 = inlined_call_operand.vmem [shape: f32[32,1], index: 2, kind: input, shape index: {}]   ;;  %s730_s3 = inlined_call_operand.vmem [shape: bf16[32,128], index: 3, kind: output, shape index: {}]  }
   0x1   :  { %357 = vmatprep.subr.bf16.mxu1 %v568_v0  ;;  %v529_v1 = vld [vmem:[%s727_s0 + $0x80] sm:$0xff]   ;;  %527 = vset.pattern.permute.xlu0 %v568_v0  ;;  %v532_v4 = vld [vmem:[%s727_s0 + $0x88] sm:$0xff]   ;;  %v535_v7 = vld [vmem:[%s727_s0 + $0x90] sm:$0xff]  }
   0x2   :  { %v530_v2 = vld [vmem:[%s727_s0 + $0x40] sm:$0xff]   ;;  %528 = vset.pattern.permute.xlu1 %v568_v0  ;;  %358 = vmatpush1.bf16.msra.mxu1 %v529_v1  ;;  %v533_v5 = vld [vmem:[%s727_s0 + $0x48] sm:$0xff]   ;;  %v536_v8 = vld [vmem:[%s727_s0 + $0x50] sm:$0xff]  }
   0x3   :  { %v531_v3 = vld [vmem:[%s727_s0] sm:$0xff]   ;;  %498 = vmatprep.subr.bf16.mxu0 %v530_v2  ;;  %359 = vmatprep.subr.bf16.mxu1 %v568_v0  ;;  %v534_v6 = vld [vmem:[%s727_s0 + $0x8] sm:$0xff]   ;;  %v537_v9 = vld [vmem:[%s727_s0 + $0x10] sm:$0xff]  }
   0x4   :  { %499 = vmatpush3.bf16.msra.mxu0 %v531_v3  ;;  %v538_v10 = vld [vmem:[%s727_s0 + $0x98] sm:$0xff]   ;;  %v542_v13 = vld [vmem:[%s727_s0 + $0x60] sm:$0xff]   ;;  %v545_v16 = vld [vmem:[%s727_s0 + $0x68] sm:$0xff]  }
   0x5   :  { %500 = vmatprep.subr.bf16.mxu0 %v533_v5  ;;  %v539_v11 = vld [vmem:[%s727_s0 + $0x58] sm:$0xff]   ;;  %v541_v14 = vld [vmem:[%s727_s0 + $0xa0] sm:$0xff]   ;;  %v544_v17 = vld [vmem:[%s727_s0 + $0xa8] sm:$0xff]  }
   0x6   :  { %360 = vmatpush1.bf16.msra.mxu1 %v532_v4  ;;  %v540_v12 = vld [vmem:[%s727_s0 + $0x18] sm:$0xff]   ;;  %v543_v15 = vld [vmem:[%s727_s0 + $0x20] sm:$0xff]   ;;  %v546_v18 = vld [vmem:[%s727_s0 + $0x28] sm:$0xff]  }
   0x7   :  { %361 = vmatprep.subr.bf16.mxu1 %v568_v0  ;;  %v548_v19 = vld [vmem:[%s727_s0 + $0x70] sm:$0xff]   ;;  %v550_v22 = vld [vmem:[%s727_s0 + $0xb8] sm:$0xff]   ;;  %v553_v26 = vld [vmem:[%s727_s0 + $0xc0] sm:$0xff]  }
   0x8   :  { %501 = vmatpush3.bf16.msra.mxu0 %v534_v6  ;;  %v547_v20 = vld [vmem:[%s727_s0 + $0xb0] sm:$0xff]   ;;  %v551_v23 = vld [vmem:[%s727_s0 + $0x78] sm:$0xff]   ;;  %v77_v30 = vld [vmem:[%s729_s2] sm:$0xff] }
   0x9   :  { %502 = vmatprep.subr.bf16.mxu0 %v536_v8  ;;  %v549_v21 = vld [vmem:[%s727_s0 + $0x30] sm:$0xff]   ;;  %v552_v25 = vld [vmem:[%s727_s0 + $0x38] sm:$0xff]   ;;  %83 = vperm.xlu0 %527, %v77_v30   ;;  %v557_v32 = vld [vmem:[%s727_s0 + $0xc8] sm:$0xff]  }
   0xa   :  { %362 = vmatpush1.bf16.msra.mxu1 %v535_v7  ;;  %v556_v24 = vld [vmem:[%s728_s1 + $0x4] ss:$16 sps:$4 sm:$0xff]   ;;  %v564_v27 = vld [vmem:[%s728_s1 + $0xc] ss:$16 sps:$4 sm:$0xff]   ;;  %v554_v28 = vld [vmem:[%s728_s1] ss:$16 sps:$4 sm:$0xff]  }
   0xb   :  { %363 = vmatprep.subr.bf16.mxu1 %v568_v0  ;;  %340 = vmatprep.mubr.bf16.mxu0 %v556_v24  ;;  %v559_v29 = vld [vmem:[%s728_s1 + $0x24] ss:$16 sps:$4 sm:$0xff]   ;;  %v78_v33 = vld [vmem:[%s729_s2 + $0x8] sm:$0xff]  ;;  %v80_v34 = vld [vmem:[%s729_s2 + $0x18] sm:$0xff] }
   0xc   :  { %503 = vmatpush3.bf16.msra.mxu0 %v537_v9  ;;  %477 = vmatprep.mubr.msk.bf16.mxu1 %vm301_vm0, %v564_v27  ;;  %v79_v31 = vld [vmem:[%s729_s2 + $0x10] sm:$0xff]  ;;  %v562_v37 = vld [vmem:[%s728_s1 + $0x8] ss:$16 sps:$4 sm:$0xff]   ;;  %v565_v38 = vld [vmem:[%s728_s1 + $0x2c] ss:$16 sps:$4 sm:$0xff]  }
   0xd   :  { %504 = vmatprep.subr.bf16.mxu0 %v539_v11  ;;  %93 = vperm.xlu1 %528, %v79_v31   ;;  %v558_v35 = vld [vmem:[%s727_s0 + $0xd0] sm:$0xff]   ;;  %v567_v39 = vld [vmem:[%s728_s1 + $0x28] ss:$16 sps:$4 sm:$0xff]  }
   0xe   :  { %364 = vmatpush1.bf16.msra.mxu1 %v538_v10  ;;  %88 = vperm.xlu0 %527, %v78_v33   ;;  %v561_v36 = vld [vmem:[%s728_s1 + $0x20] ss:$16 sps:$4 sm:$0xff]  }
   0xf   :  { %365 = vmatprep.subr.bf16.mxu1 %v568_v0 }
  0x10   :  { %505 = vmatpush3.bf16.msra.mxu0 %v540_v12 }
  0x11   :  { %506 = vmatprep.subr.bf16.mxu0 %v542_v13  ;;  %98 = vperm.xlu1 %528, %v80_v34  }
  0x12   :  { %366 = vmatpush1.bf16.msra.mxu1 %v541_v14 }
  0x13   :  { %367 = vmatprep.subr.bf16.mxu1 %v568_v0 }
  0x14   :  { %507 = vmatpush3.bf16.msra.mxu0 %v543_v15 }
  0x15   :  { %508 = vmatprep.subr.bf16.mxu0 %v545_v16 }
  0x16   :  { %368 = vmatpush1.bf16.msra.mxu1 %v544_v17 }
  0x17   :  { %369 = vmatprep.subr.bf16.mxu1 %v568_v0 }
  0x18   :  { %509 = vmatpush3.bf16.msra.mxu0 %v546_v18 }
  0x19   :  { %510 = vmatprep.subr.bf16.mxu0 %v548_v19 }
  0x1a   :  { %370 = vmatpush1.bf16.msra.mxu1 %v547_v20 }
  0x1b   :  { %371 = vmatprep.subr.bf16.mxu1 %v568_v0 }
  0x1c   :  { %511 = vmatpush3.bf16.msra.mxu0 %v549_v21 }
  0x1d   :  { %512 = vmatprep.subr.bf16.mxu0 %v551_v23 }
  0x1e   :  { %372 = vmatpush1.bf16.msra.mxu1 %v550_v22 }
  0x1f   :  { %373 = vmatprep.subr.bf16.mxu1 %v568_v0 }
  0x20   :  { %513 = vmatpush3.bf16.msra.mxu0 %v552_v25 }
  0x22   :  { %374 = vmatpush1.bf16.msra.mxu1 %v553_v26 }
  0x23   :  { %341 = vmatmul.mubr.bf16.vlgmr.msra.gmra.mrb[0].mxu0 %v554_v28  ;;  %375 = vmatprep.subr.bf16.mxu1 %v568_v0 }
  0x24   :  { %348 = vmatprep.mubr.bf16.mxu0 %v559_v29 }
  0x26   :  { %376 = vmatpush1.bf16.msra.mxu1 %v557_v32 }
  0x27   :  { %377 = vmatprep.subr.bf16.mxu1 %v568_v0 }
  0x2a   :  { %378 = vmatpush1.bf16.msra.mxu1 %v558_v35 }
  0x2b   :  { %349 = vmatmul.mubr.bf16.gmra.mrb[4].mxu0 %v561_v36 }
  0x2d   :  { %390 = vmatmul.mubr.bf16.vlgmr.msra.gmra.mrb[0].mxu1 %v562_v37 }
  0x2e   :  { %478 = vmatprep.mubr.msk.bf16.mxu1 %vm301_vm0, %v565_v38 }
  0x35   :  { %398 = vmatmul.mubr.bf16.gmra.mrb[4].mxu1 %v567_v39 }
  0x88   :  { %v84_v42 = vpop.permute.xlu0 %83 }
  0x8c   :  { %v94_v50 = vpop.permute.xlu1 %93 }
  0x8d   :  { %v89_v48 = vpop.permute.xlu0 %88 }
  0x90   :  { %v99_v1 = vpop.permute.xlu1 %98 }
  0xf6   :  { %v514_v40 = vpop.f32.mrb[0].mxu0 }
  0xf7   :  { %v515_v41 = vpop.f32.mrb[1].mxu0 }
  0xf8   :  { %v516_v43 = vadd.f32 %v515_v41, %v514_v40  ;;  %v517_v44 = vpop.f32.mrb[2].mxu0 }
  0xf9   :  { %v518_v45 = vpop.f32.mrb[3].mxu0 }
  0xfa   :  { %v519_v46 = vadd.f32 %v518_v45, %v517_v44  ;;  %v343_v47 = vadd.f32 %v516_v43, %v84_v42 }
  0xfc   :  { %v346_v55 = vadd.f32 %v519_v46, %v89_v48 }
  0xfe   :  { %v520_v49 = vpop.f32.mrb[4].mxu0 }
  0xff   :  { %v521_v51 = vpop.f32.mrb[5].mxu0 }
 0x100   :  { %v522_v52 = vadd.f32 %v521_v51, %v520_v49  ;;  %v391_v53 = vpop.f32.mrb[0].mxu1  ;;  %v523_v54 = vpop.f32.mrb[6].mxu0 }
 0x101   :  { %v392_v56 = vadd.f32 %v391_v53, %v343_v47  ;;  %v393_v57 = vpop.f32.mrb[1].mxu1  ;;  %v524_v58 = vpop.f32.mrb[7].mxu0 }
 0x102   :  { %v525_v59 = vadd.f32 %v524_v58, %v523_v54  ;;  %v394_v60 = vpop.f32.mrb[2].mxu1  ;;  %v351_v4 = vadd.f32 %v522_v52, %v94_v50 }
 0x103   :  { %v410_v61 = vmul.f32 0.01, %v392_v56  ;;  %v395_v62 = vadd.f32 %v394_v60, %v346_v55  ;;  %v396_v63 = vpop.f32.mrb[3].mxu1  ;;  %vm406_vm1 = vcmp.ge.f32.partialorder %v392_v56, 0.0 }
 0x104   :  { %v354_v7 = vadd.f32 %v525_v59, %v99_v1 }
 0x105   :  { %vm407_vm2 = vcmp.ge.f32.partialorder %v395_v62, 0.0  ;;  %v411_v0 = vmul.f32 0.01, %v395_v62  ;;  %v414_v2 = vsel %vm406_vm1, %v392_v56, %v410_v61 }
 0x107   :  { %v415_v3 = vsel %vm407_vm2, %v395_v62, %v411_v0 }
 0x108   :  { %v490_v5 = vpack.c.bf16 %v415_v3, %v414_v2  ;;  %v399_v6 = vpop.f32.mrb[4].mxu1 }
 0x109   :  { %v400_v8 = vadd.f32 %v399_v6, %v351_v4  ;;  %v401_v9 = vpop.f32.mrb[5].mxu1 }
 0x10a   :  { %491 = vst [vmem:[%s730_s3] sm:$0xff] %v490_v5   ;;  %v402_v10 = vpop.f32.mrb[6].mxu1 }
 0x10b   :  { %v412_v11 = vmul.f32 0.01, %v400_v8  ;;  %v403_v12 = vadd.f32 %v402_v10, %v354_v7  ;;  %v404_v13 = vpop.f32.mrb[7].mxu1  ;;  %vm408_vm3 = vcmp.ge.f32.partialorder %v400_v8, 0.0 }
 0x10d   :  { %vm409_vm4 = vcmp.ge.f32.partialorder %v403_v12, 0.0  ;;  %v413_v14 = vmul.f32 0.01, %v403_v12  ;;  %v416_v15 = vsel %vm408_vm3, %v400_v8, %v412_v11 }
 0x10f   :  { %v417_v16 = vsel %vm409_vm4, %v403_v12, %v413_v14 }
 0x110   :  { %v495_v17 = vpack.c.bf16 %v417_v16, %v416_v15 }
 0x112   :  { %497 = vst [vmem:[%s730_s3 + $0x8] sm:$0xff] %v495_v17  }

// kernel: downup_forward.26
= control target key start
LH: loop header
LB: loop body
LE: loop exit
PB: predicated region body
PF: predicated region fallthrough
CT: control target
= control target key end

     0   :  { %s236_s0 = inlined_call_operand.vmem [shape: bf16[8,32,128], index: 0, kind: input, shape index: {}]   ;;  %s237_s1 = inlined_call_operand.vmem [shape: bf16[32,128], index: 1, kind: output, shape index: {}]  }
   0x1   :  { %v8_v0 = vld [vmem:[%s236_s0] sm:$0xf]  ;;  %v9_v1 = vld [vmem:[%s236_s0 + $0x4] sm:$0xf]  ;;  %v83_v2 = vld [vmem:[%s236_s0 + $0x10] sm:$0xf] }
   0x2   :  { %v84_v3 = vld [vmem:[%s236_s0 + $0x14] sm:$0xf]  ;;  %v17_v4 = vmax.bf16 %v83_v2, %v8_v0  ;;  %v87_v5 = vld [vmem:[%s236_s0 + $0x20] sm:$0xf]  ;;  %v88_v6 = vld [vmem:[%s236_s0 + $0x24] sm:$0xf] }
   0x3   :  { %v18_v7 = vmax.bf16 %v84_v3, %v9_v1  ;;  %v91_v8 = vld [vmem:[%s236_s0 + $0x30] sm:$0xf]  ;;  %v92_v10 = vld [vmem:[%s236_s0 + $0x34] sm:$0xf]  ;;  %v95_v12 = vld [vmem:[%s236_s0 + $0x40] sm:$0xf] }
   0x4   :  { %v26_v9 = vmax.bf16 %v87_v5, %v17_v4  ;;  %v96_v13 = vld [vmem:[%s236_s0 + $0x44] sm:$0xf]  ;;  %v99_v15 = vld [vmem:[%s236_s0 + $0x50] sm:$0xf]  ;;  %v10_v16 = vld [vmem:[%s236_s0 + $0x8] sm:$0xf] }
   0x5   :  { %v27_v11 = vmax.bf16 %v88_v6, %v18_v7  ;;  %v11_v17 = vld [vmem:[%s236_s0 + $0xc] sm:$0xf]  ;;  %v85_v19 = vld [vmem:[%s236_s0 + $0x18] sm:$0xf]  ;;  %v86_v20 = vld [vmem:[%s236_s0 + $0x1c] sm:$0xf] }
   0x6   :  { %v35_v14 = vmax.bf16 %v91_v8, %v26_v9  ;;  %v89_v21 = vld [vmem:[%s236_s0 + $0x28] sm:$0xf]  ;;  %v100_v23 = vld [vmem:[%s236_s0 + $0x54] sm:$0xf]  ;;  %v19_v24 = vmax.bf16 %v85_v19, %v10_v16  ;;  %v20_v25 = vmax.bf16 %v86_v20, %v11_v17  ;;  %v90_v26 = vld [vmem:[%s236_s0 + $0x2c] sm:$0xf] }
   0x7   :  { %v36_v18 = vmax.bf16 %v92_v10, %v27_v11  ;;  %v103_v28 = vld [vmem:[%s236_s0 + $0x60] sm:$0xf]  ;;  %v93_v29 = vld [vmem:[%s236_s0 + $0x38] sm:$0xf]  ;;  %v94_v30 = vld [vmem:[%s236_s0 + $0x3c] sm:$0xf] }
   0x8   :  { %v44_v22 = vmax.bf16 %v95_v12, %v35_v14  ;;  %v104_v32 = vld [vmem:[%s236_s0 + $0x64] sm:$0xf]  ;;  %v28_v33 = vmax.bf16 %v89_v21, %v19_v24  ;;  %v29_v34 = vmax.bf16 %v90_v26, %v20_v25  ;;  %v107_v36 = vld [vmem:[%s236_s0 + $0x70] sm:$0xf]  ;;  %v97_v37 = vld [vmem:[%s236_s0 + $0x48] sm:$0xf] }
   0x9   :  { %v45_v27 = vmax.bf16 %v96_v13, %v36_v18  ;;  %v98_v38 = vld [vmem:[%s236_s0 + $0x4c] sm:$0xf]  ;;  %v108_v40 = vld [vmem:[%s236_s0 + $0x74] sm:$0xf]  ;;  %v101_v44 = vld [vmem:[%s236_s0 + $0x58] sm:$0xf] }
   0xa   :  { %v53_v31 = vmax.bf16 %v99_v15, %v44_v22  ;;  %v37_v41 = vmax.bf16 %v93_v29, %v28_v33  ;;  %v38_v42 = vmax.bf16 %v94_v30, %v29_v34  ;;  %v102_v45 = vld [vmem:[%s236_s0 + $0x5c] sm:$0xf]  ;;  %v105_v50 = vld [vmem:[%s236_s0 + $0x68] sm:$0xf]  ;;  %v106_v51 = vld [vmem:[%s236_s0 + $0x6c] sm:$0xf] }
   0xb   :  { %v54_v35 = vmax.bf16 %v100_v23, %v45_v27  ;;  %v109_v55 = vld [vmem:[%s236_s0 + $0x78] sm:$0xf]  ;;  %v110_v56 = vld [vmem:[%s236_s0 + $0x7c] sm:$0xf] }
   0xc   :  { %v62_v39 = vmax.bf16 %v103_v28, %v53_v31  ;;  %v46_v47 = vmax.bf16 %v97_v37, %v37_v41  ;;  %v47_v48 = vmax.bf16 %v98_v38, %v38_v42 }
   0xd   :  { %v63_v43 = vmax.bf16 %v104_v32, %v54_v35 }
   0xe   :  { %v71_v46 = vmax.bf16 %v107_v36, %v62_v39  ;;  %v55_v52 = vmax.bf16 %v101_v44, %v46_v47  ;;  %v56_v53 = vmax.bf16 %v102_v45, %v47_v48 }
   0xf   :  { %v72_v49 = vmax.bf16 %v108_v40, %v63_v43 }
  0x10   :  { %v64_v57 = vmax.bf16 %v105_v50, %v55_v52  ;;  %v65_v58 = vmax.bf16 %v106_v51, %v56_v53 }
  0x11   :  { %v121_v54 = vcombine.low %v71_v46, %v72_v49 }
  0x12   :  { %v73_v59 = vmax.bf16 %v109_v55, %v64_v57  ;;  %v74_v60 = vmax.bf16 %v110_v56, %v65_v58 }
  0x13   :  { %115 = vst [vmem:[%s237_s1] sm:$0xff] %v121_v54  }
  0x14   :  { %v122_v61 = vcombine.low %v73_v59, %v74_v60 }
  0x16   :  { %123 = vst [vmem:[%s237_s1 + $0x8] sm:$0xff] %v122_v61  }

// kernel: downup_forward.28
= control target key start
LH: loop header
LB: loop body
LE: loop exit
PB: predicated region body
PF: predicated region fallthrough
CT: control target
= control target key end

     0   :  { %v1380_v1 = vmov 0   ;;  %vm667_vm0 = vcmask 785408   ;;  %s1711_s0 = inlined_call_operand.vmem [shape: bf16[864,128], index: 0, kind: input, shape index: {}]   ;;  %s1712_s1 = inlined_call_operand.vmem [shape: bf16[64,864], index: 1, kind: input, shape index: {}]   ;;  %s1713_s2 = inlined_call_operand.vmem [shape: f32[64,1], index: 2, kind: input, shape index: {}]   ;;  %s1714_s3 = inlined_call_operand.vmem [shape: bf16[64,128], index: 3, kind: output, shape index: {}]  }
   0x1   :  { %v1286_v0 = vld [vmem:[%s1711_s0 + $0x40] sm:$0xff]   ;;  %1284 = vset.pattern.permute.xlu0 %v1380_v1  ;;  %1285 = vset.pattern.permute.xlu1 %v1380_v1  ;;  %v1290_v5 = vld [vmem:[%s1711_s0 + $0x48] sm:$0xff]   ;;  %v1294_v9 = vld [vmem:[%s1711_s0 + $0x50] sm:$0xff]  }
   0x2   :  { %v1287_v2 = vld [vmem:[%s1711_s0] sm:$0xff]   ;;  %1133 = vmatprep.subr.bf16.mxu0 %v1286_v0  ;;  %v1291_v6 = vld [vmem:[%s1711_s0 + $0x8] sm:$0xff]   ;;  %v1295_v10 = vld [vmem:[%s1711_s0 + $0x10] sm:$0xff]  }
   0x3   :  { %v1288_v3 = vld [vmem:[%s1711_s0 + $0xc0] sm:$0xff]   ;;  %1134 = vmatpush3.bf16.msra.mxu0 %v1287_v2  ;;  %v1292_v7 = vld [vmem:[%s1711_s0 + $0xc8] sm:$0xff]   ;;  %v1296_v11 = vld [vmem:[%s1711_s0 + $0xd0] sm:$0xff]  }
   0x4   :  { %v1289_v4 = vld [vmem:[%s1711_s0 + $0x80] sm:$0xff]   ;;  %1173 = vmatprep.subr.bf16.mxu1 %v1288_v3  ;;  %1135 = vmatprep.subr.bf16.mxu0 %v1290_v5  ;;  %v1293_v8 = vld [vmem:[%s1711_s0 + $0x88] sm:$0xff]   ;;  %v1297_v12 = vld [vmem:[%s1711_s0 + $0x90] sm:$0xff]  }
   0x5   :  { %1174 = vmatpush3.bf16.msra.mxu1 %v1289_v4  ;;  %v1298_v13 = vld [vmem:[%s1711_s0 + $0x58] sm:$0xff]   ;;  %v1302_v17 = vld [vmem:[%s1711_s0 + $0x60] sm:$0xff]   ;;  %v1306_v21 = vld [vmem:[%s1711_s0 + $0x68] sm:$0xff]  }
   0x6   :  { %1175 = vmatprep.subr.bf16.mxu1 %v1292_v7  ;;  %v1299_v14 = vld [vmem:[%s1711_s0 + $0x18] sm:$0xff]   ;;  %v1303_v18 = vld [vmem:[%s1711_s0 + $0x20] sm:$0xff]   ;;  %v1307_v22 = vld [vmem:[%s1711_s0 + $0x28] sm:$0xff]  }
   0x7   :  { %1136 = vmatpush3.bf16.msra.mxu0 %v1291_v6  ;;  %v1300_v15 = vld [vmem:[%s1711_s0 + $0xd8] sm:$0xff]   ;;  %v1304_v19 = vld [vmem:[%s1711_s0 + $0xe0] sm:$0xff]   ;;  %v1308_v23 = vld [vmem:[%s1711_s0 + $0xe8] sm:$0xff]  }
   0x8   :  { %1137 = vmatprep.subr.bf16.mxu0 %v1294_v9  ;;  %v1301_v16 = vld [vmem:[%s1711_s0 + $0x98] sm:$0xff]   ;;  %v1305_v20 = vld [vmem:[%s1711_s0 + $0xa0] sm:$0xff]   ;;  %v1309_v24 = vld [vmem:[%s1711_s0 + $0xa8] sm:$0xff]  }
   0x9   :  { %1176 = vmatpush3.bf16.msra.mxu1 %v1293_v8  ;;  %v1310_v25 = vld [vmem:[%s1711_s0 + $0x70] sm:$0xff]   ;;  %v1314_v29 = vld [vmem:[%s1711_s0 + $0x78] sm:$0xff]   ;;  %v1319_v33 = vld [vmem:[%s1712_s1 + $0x4] ss:$28 sps:$4 sm:$0xff]  }
   0xa   :  { %1177 = vmatprep.subr.bf16.mxu1 %v1296_v11  ;;  %v1311_v26 = vld [vmem:[%s1711_s0 + $0x30] sm:$0xff]   ;;  %v1315_v30 = vld [vmem:[%s1711_s0 + $0x38] sm:$0xff]   ;;  %712 = vmatprep.mubr.bf16.mxu0 %v1319_v33  ;;  %v1321_v35 = vld [vmem:[%s1711_s0 + $0x140] sm:$0xff]  }
   0xb   :  { %1138 = vmatpush3.bf16.msra.mxu0 %v1295_v10  ;;  %v1312_v27 = vld [vmem:[%s1711_s0 + $0xf0] sm:$0xff]   ;;  %v1316_v31 = vld [vmem:[%s1711_s0 + $0xf8] sm:$0xff]   ;;  %v1322_v36 = vld [vmem:[%s1712_s1 + $0x8] ss:$28 sps:$4 sm:$0xff]  }
   0xc   :  { %1139 = vmatprep.subr.bf16.mxu0 %v1298_v13  ;;  %v1313_v28 = vld [vmem:[%s1711_s0 + $0xb0] sm:$0xff]   ;;  %v1317_v32 = vld [vmem:[%s1712_s1] ss:$28 sps:$4 sm:$0xff]   ;;  %v1324_v37 = vld [vmem:[%s1712_s1 + $0xc] ss:$28 sps:$4 sm:$0xff]  }
   0xd   :  { %1178 = vmatpush3.bf16.msra.mxu1 %v1297_v12  ;;  %v1320_v34 = vld [vmem:[%s1711_s0 + $0xb8] sm:$0xff]   ;;  %v1325_v38 = vld [vmem:[%s1711_s0 + $0x100] sm:$0xff]   ;;  %777 = vmatprep.mubr.bf16.mxu1 %v1324_v37  ;;  %v1326_v39 = vld [vmem:[%s1711_s0 + $0x148] sm:$0xff]  }
   0xe   :  { %1179 = vmatprep.subr.bf16.mxu1 %v1300_v15  ;;  %v1327_v40 = vld [vmem:[%s1711_s0 + $0x108] sm:$0xff]   ;;  %v1328_v41 = vld [vmem:[%s1712_s1 + $0x3c] ss:$28 sps:$4 sm:$0xff]   ;;  %v1331_v43 = vld [vmem:[%s1711_s0 + $0x150] sm:$0xff]  }
   0xf   :  { %1140 = vmatpush3.bf16.msra.mxu0 %v1299_v14  ;;  %v1330_v42 = vld [vmem:[%s1712_s1 + $0x38] ss:$28 sps:$4 sm:$0xff]   ;;  %v1332_v44 = vld [vmem:[%s1712_s1 + $0x44] ss:$28 sps:$4 sm:$0xff]   ;;  %v1341_v51 = vld [vmem:[%s1712_s1 + $0x70] ss:$28 sps:$4 sm:$0xff]  }
  0x10   :  { %1141 = vmatprep.subr.bf16.mxu0 %v1302_v17  ;;  %v1334_v45 = vld [vmem:[%s1711_s0 + $0x110] sm:$0xff]   ;;  %v1335_v46 = vld [vmem:[%s1712_s1 + $0x40] ss:$28 sps:$4 sm:$0xff]   ;;  %v1343_v53 = vld [vmem:[%s1711_s0 + $0x188] sm:$0xff]  }
  0x11   :  { %1180 = vmatpush3.bf16.msra.mxu1 %v1301_v16  ;;  %v1336_v47 = vld [vmem:[%s1711_s0 + $0x158] sm:$0xff]   ;;  %v1337_v48 = vld [vmem:[%s1711_s0 + $0x180] sm:$0xff]   ;;  %v1339_v50 = vld [vmem:[%s1712_s1 + $0x74] ss:$28 sps:$4 sm:$0xff]  }
  0x12   :  { %1181 = vmatprep.subr.bf16.mxu1 %v1304_v19  ;;  %v1338_v49 = vld [vmem:[%s1711_s0 + $0x118] sm:$0xff]   ;;  %v1342_v52 = vld [vmem:[%s1711_s0 + $0x160] sm:$0xff]   ;;  %v1348_v57 = vld [vmem:[%s1711_s0 + $0x168] sm:$0xff]  }
  0x13   :  { %1142 = vmatpush3.bf16.msra.mxu0 %v1303_v18  ;;  %v1344_v54 = vld [vmem:[%s1712_s1 + $0x7c] ss:$28 sps:$4 sm:$0xff]   ;;  %v1346_v55 = vld [vmem:[%s1711_s0 + $0x120] sm:$0xff]   ;;  %v1349_v58 = vld [vmem:[%s1711_s0 + $0x190] sm:$0xff]  }
  0x14   :  { %1143 = vmatprep.subr.bf16.mxu0 %v1306_v21  ;;  %v1347_v56 = vld [vmem:[%s1712_s1 + $0x78] ss:$28 sps:$4 sm:$0xff]   ;;  %v1350_v59 = vld [vmem:[%s1711_s0 + $0x128] sm:$0xff]   ;;  %v1361_v4 = vld [vmem:[%s1711_s0 + $0x1a0] sm:$0xff]  }
  0x15   :  { %1182 = vmatpush3.bf16.msra.mxu1 %v1305_v20  ;;  %v1351_v60 = vld [vmem:[%s1712_s1 + $0xac] ss:$28 sps:$4 sm:$0xff]   ;;  %v1354_v62 = vld [vmem:[%s1711_s0 + $0x170] sm:$0xff]   ;;  %v1355_v63 = vld [vmem:[%s1711_s0 + $0x198] sm:$0xff]  }
  0x16   :  { %1183 = vmatprep.subr.bf16.mxu1 %v1308_v23  ;;  %v1353_v61 = vld [vmem:[%s1712_s1 + $0xa8] ss:$28 sps:$4 sm:$0xff]   ;;  %v1356_v0 = vld [vmem:[%s1712_s1 + $0xb4] ss:$28 sps:$4 sm:$0xff]   ;;  %v1360_v3 = vld [vmem:[%s1711_s0 + $0x178] sm:$0xff]  }
  0x17   :  { %1144 = vmatpush3.bf16.msra.mxu0 %v1307_v22  ;;  %v1358_v1 = vld [vmem:[%s1711_s0 + $0x130] sm:$0xff]   ;;  %v1362_v5 = vld [vmem:[%s1711_s0 + $0x138] sm:$0xff]   ;;  %v1366_v8 = vld [vmem:[%s1711_s0 + $0x1a8] sm:$0xff]  }
  0x18   :  { %1145 = vmatprep.subr.bf16.mxu0 %v1310_v25  ;;  %v1359_v2 = vld [vmem:[%s1712_s1 + $0xb0] ss:$28 sps:$4 sm:$0xff]   ;;  %v1367_v9 = vld [vmem:[%s1712_s1 + $0x18] ss:$28 sps:$4 sm:$0xff]   ;;  %v1375_v12 = vld [vmem:[%s1712_s1 + $0x88] ss:$28 sps:$4 sm:$0xff]  }
  0x19   :  { %1184 = vmatpush3.bf16.msra.mxu1 %v1309_v24  ;;  %v1363_v6 = vld [vmem:[%s1712_s1 + $0x10] ss:$28 sps:$4 sm:$0xff]   ;;  %v1371_v13 = vld [vmem:[%s1712_s1 + $0x48] ss:$28 sps:$4 sm:$0xff]   ;;  %v1376_v17 = vld [vmem:[%s1712_s1 + $0xc0] ss:$28 sps:$4 sm:$0xff]  }
  0x1a   :  { %1185 = vmatprep.subr.bf16.mxu1 %v1312_v27  ;;  %v1365_v7 = vld [vmem:[%s1712_s1 + $0x14] ss:$28 sps:$4 sm:$0xff]   ;;  %v1369_v11 = vld [vmem:[%s1712_s1 + $0x4c] ss:$28 sps:$4 sm:$0xff]   ;;  %v1372_v14 = vld [vmem:[%s1712_s1 + $0x84] ss:$28 sps:$4 sm:$0xff]  }
  0x1b   :  { %1146 = vmatpush3.bf16.msra.mxu0 %v1311_v26  ;;  %v1368_v10 = vld [vmem:[%s1712_s1 + $0x50] ss:$28 sps:$4 sm:$0xff]   ;;  %v155_v15 = vld [vmem:[%s1713_s2] sm:$0xff]  ;;  %v158_v19 = vld [vmem:[%s1713_s2 + $0x18] sm:$0xff] }
  0x1c   :  { %1147 = vmatprep.subr.bf16.mxu0 %v1314_v29  ;;  %v157_v16 = vld [vmem:[%s1713_s2 + $0x10] sm:$0xff]  ;;  %165 = vperm.xlu0 %1284, %v155_v15   ;;  %v156_v18 = vld [vmem:[%s1713_s2 + $0x8] sm:$0xff]  ;;  %v159_v20 = vld [vmem:[%s1713_s2 + $0x20] sm:$0xff] }
  0x1d   :  { %1186 = vmatpush3.bf16.msra.mxu1 %v1313_v28  ;;  %175 = vperm.xlu1 %1285, %v157_v16   ;;  %v160_v21 = vld [vmem:[%s1713_s2 + $0x28] sm:$0xff]  ;;  %v1374_v22 = vld [vmem:[%s1712_s1 + $0x80] ss:$28 sps:$4 sm:$0xff]   ;;  %v161_v24 = vld [vmem:[%s1713_s2 + $0x30] sm:$0xff] }
  0x1e   :  { %1187 = vmatprep.subr.bf16.mxu1 %v1316_v31  ;;  %v1377_v23 = vld [vmem:[%s1712_s1 + $0xbc] ss:$28 sps:$4 sm:$0xff]  }
  0x1f   :  { %1148 = vmatpush3.bf16.msra.mxu0 %v1315_v30  ;;  %v162_v25 = vld [vmem:[%s1713_s2 + $0x38] sm:$0xff] }
  0x20   :  { %1213 = vmatprep.subr.bf16.mxu0 %v1321_v35  ;;  %170 = vperm.xlu0 %1284, %v156_v18   ;;  %v1379_v26 = vld [vmem:[%s1712_s1 + $0xb8] ss:$28 sps:$4 sm:$0xff]  }
  0x21   :  { %1188 = vmatpush3.bf16.msra.mxu1 %v1320_v34  ;;  %180 = vperm.xlu1 %1285, %v158_v19  }
  0x22   :  { %713 = vmatmul.mubr.bf16.vlgmr.msra.gmra.mrb[0].mxu0 %v1317_v32  ;;  %1263 = vmatprep.subr.bf16.mxu1 %v1337_v48 }
  0x23   :  { %1214 = vmatpush3.bf16.msra.mxu0 %v1325_v38  ;;  %720 = vmatprep.mubr.bf16.mxu0 %v1328_v41 }
  0x24   :  { %778 = vmatmul.mubr.bf16.vlgmr.msra.gmra.mrb[0].mxu1 %v1322_v36  ;;  %1215 = vmatprep.subr.bf16.mxu0 %v1326_v39 }
  0x25   :  { %785 = vmatprep.mubr.bf16.mxu1 %v1332_v44  ;;  %1264 = vmatpush3.bf16.msra.mxu1 %v1337_v48 }
  0x26   :  { %1265 = vmatprep.subr.bf16.mxu1 %v1343_v53  ;;  %185 = vperm.xlu0 %1284, %v159_v20  }
  0x27   :  { %1216 = vmatpush3.bf16.msra.mxu0 %v1327_v40  ;;  %190 = vperm.xlu1 %1285, %v160_v21  }
  0x28   :  { %1217 = vmatprep.subr.bf16.mxu0 %v1331_v43 }
  0x29   :  { %1266 = vmatpush3.bf16.msra.mxu1 %v1343_v53 }
  0x2a   :  { %721 = vmatmul.mubr.bf16.gmra.mrb[4].mxu0 %v1330_v42  ;;  %1267 = vmatprep.subr.bf16.mxu1 %v1349_v58 }
  0x2b   :  { %1218 = vmatpush3.bf16.msra.mxu0 %v1334_v45  ;;  %728 = vmatprep.mubr.bf16.mxu0 %v1339_v50 }
  0x2c   :  { %786 = vmatmul.mubr.bf16.gmra.mrb[4].mxu1 %v1335_v46  ;;  %1219 = vmatprep.subr.bf16.mxu0 %v1336_v47 }
  0x2d   :  { %793 = vmatprep.mubr.bf16.mxu1 %v1344_v54  ;;  %1268 = vmatpush3.bf16.msra.mxu1 %v1349_v58 }
  0x2e   :  { %1269 = vmatprep.subr.bf16.mxu1 %v1355_v63  ;;  %195 = vperm.xlu0 %1284, %v161_v24  }
  0x2f   :  { %1220 = vmatpush3.bf16.msra.mxu0 %v1338_v49  ;;  %200 = vperm.xlu1 %1285, %v162_v25  }
  0x30   :  { %1221 = vmatprep.subr.bf16.mxu0 %v1342_v52 }
  0x31   :  { %1270 = vmatpush3.bf16.msra.mxu1 %v1355_v63 }
  0x32   :  { %729 = vmatmul.mubr.bf16.gmra.mrb[8].mxu0 %v1341_v51  ;;  %1271 = vmatprep.subr.bf16.mxu1 %v1361_v4 }
  0x33   :  { %1222 = vmatpush3.bf16.msra.mxu0 %v1346_v55  ;;  %736 = vmatprep.mubr.bf16.mxu0 %v1351_v60 }
  0x34   :  { %794 = vmatmul.mubr.bf16.gmra.mrb[8].mxu1 %v1347_v56  ;;  %1223 = vmatprep.subr.bf16.mxu0 %v1348_v57 }
  0x35   :  { %801 = vmatprep.mubr.bf16.mxu1 %v1356_v0  ;;  %1272 = vmatpush3.bf16.msra.mxu1 %v1361_v4 }
  0x36   :  { %1273 = vmatprep.subr.bf16.mxu1 %v1366_v8 }
  0x37   :  { %1224 = vmatpush3.bf16.msra.mxu0 %v1350_v59 }
  0x38   :  { %1225 = vmatprep.subr.bf16.mxu0 %v1354_v62 }
  0x39   :  { %1274 = vmatpush3.bf16.msra.mxu1 %v1366_v8 }
  0x3a   :  { %737 = vmatmul.mubr.bf16.gmra.mrb[12].mxu0 %v1353_v61 }
  0x3b   :  { %1226 = vmatpush3.bf16.msra.mxu0 %v1358_v1  ;;  %842 = vmatprep.mubr.bf16.mxu0 %v1365_v7 }
  0x3c   :  { %802 = vmatmul.mubr.bf16.gmra.mrb[12].mxu1 %v1359_v2  ;;  %1227 = vmatprep.subr.bf16.mxu0 %v1360_v3 }
  0x3d   :  { %1275 = vmatprep.mubr.msk.bf16.mxu1 %vm667_vm0, %v1367_v9 }
  0x3f   :  { %1228 = vmatpush3.bf16.msra.mxu0 %v1362_v5 }
  0x42   :  { %843 = vmatmul.mubr.bf16.vlgmr.msra.gmra.mrb[16].mxu0 %v1363_v6 }
  0x43   :  { %850 = vmatprep.mubr.bf16.mxu0 %v1369_v11 }
  0x44   :  { %1276 = vmatmul.mubr.msk.bf16.vlgmr.msra.gmra.mrb[16].mxu1 %vm667_vm0, %v1368_v10 }
  0x45   :  { %1279 = vmatprep.mubr.msk.bf16.mxu1 %vm667_vm0, %v1375_v12 }
  0x4a   :  { %851 = vmatmul.mubr.bf16.gmra.mrb[20].mxu0 %v1371_v13 }
  0x4b   :  { %858 = vmatprep.mubr.bf16.mxu0 %v1372_v14 }
  0x4c   :  { %1280 = vmatmul.mubr.msk.bf16.gmra.mrb[20].mxu1 %vm667_vm0, %v1376_v17 }
  0x52   :  { %859 = vmatmul.mubr.bf16.gmra.mrb[24].mxu0 %v1374_v22 }
  0x53   :  { %866 = vmatprep.mubr.bf16.mxu0 %v1377_v23 }
  0x5a   :  { %867 = vmatmul.mubr.bf16.gmra.mrb[28].mxu0 %v1379_v26 }
  0x9b   :  { %v166_v27 = vpop.permute.xlu0 %165 }
  0x9c   :  { %v176_v38 = vpop.permute.xlu1 %175 }
  0x9f   :  { %v171_v32 = vpop.permute.xlu0 %170 }
  0xa0   :  { %v181_v50 = vpop.permute.xlu1 %180 }
  0xa5   :  { %v186_v1 = vpop.permute.xlu0 %185 }
  0xa6   :  { %v191_v4 = vpop.permute.xlu1 %190 }
  0xad   :  { %v196_v19 = vpop.permute.xlu0 %195 }
  0xae   :  { %v201_v22 = vpop.permute.xlu1 %200 }
  0xf5   :  { %v1149_v28 = vpop.f32.mrb[0].mxu0 }
  0xf6   :  { %v1150_v29 = vpop.f32.mrb[1].mxu0 }
  0xf7   :  { %v1151_v30 = vadd.f32 %v1150_v29, %v1149_v28  ;;  %v1152_v31 = vpop.f32.mrb[2].mxu0  ;;  %v1189_v33 = vpop.f32.mrb[0].mxu1 }
  0xf8   :  { %v1153_v34 = vpop.f32.mrb[3].mxu0  ;;  %v1190_v37 = vpop.f32.mrb[1].mxu1 }
  0xf9   :  { %v715_v35 = vadd.f32 %v1151_v30, %v166_v27  ;;  %v1154_v36 = vadd.f32 %v1153_v34, %v1152_v31  ;;  %v1191_v39 = vadd.f32 %v1190_v37, %v1189_v33  ;;  %v1192_v40 = vpop.f32.mrb[2].mxu1 }
  0xfa   :  { %v1193_v42 = vpop.f32.mrb[3].mxu1 }
  0xfb   :  { %v718_v41 = vadd.f32 %v1154_v36, %v171_v32  ;;  %v1675_v43 = vadd.f32 %v1191_v39, %v715_v35  ;;  %v1194_v44 = vadd.f32 %v1193_v42, %v1192_v40 }
  0xfd   :  { %v1155_v45 = vpop.f32.mrb[4].mxu0  ;;  %v1677_v46 = vadd.f32 %v1194_v44, %v718_v41 }
  0xfe   :  { %v1156_v47 = vpop.f32.mrb[5].mxu0 }
  0xff   :  { %v1157_v48 = vadd.f32 %v1156_v47, %v1155_v45  ;;  %v1158_v49 = vpop.f32.mrb[6].mxu0  ;;  %v1195_v51 = vpop.f32.mrb[4].mxu1 }
 0x100   :  { %v1159_v52 = vpop.f32.mrb[7].mxu0  ;;  %v1196_v55 = vpop.f32.mrb[5].mxu1 }
 0x101   :  { %v723_v53 = vadd.f32 %v1157_v48, %v176_v38  ;;  %v1160_v54 = vadd.f32 %v1159_v52, %v1158_v49  ;;  %v1197_v56 = vadd.f32 %v1196_v55, %v1195_v51  ;;  %v1198_v57 = vpop.f32.mrb[6].mxu1 }
 0x102   :  { %v1199_v59 = vpop.f32.mrb[7].mxu1 }
 0x103   :  { %v726_v58 = vadd.f32 %v1160_v54, %v181_v50  ;;  %v1679_v60 = vadd.f32 %v1197_v56, %v723_v53  ;;  %v1200_v61 = vadd.f32 %v1199_v59, %v1198_v57 }
 0x105   :  { %v1161_v62 = vpop.f32.mrb[8].mxu0  ;;  %v1681_v63 = vadd.f32 %v1200_v61, %v726_v58 }
 0x106   :  { %v1162_v0 = vpop.f32.mrb[9].mxu0 }
 0x107   :  { %v1163_v2 = vadd.f32 %v1162_v0, %v1161_v62  ;;  %v1164_v3 = vpop.f32.mrb[10].mxu0  ;;  %v1201_v5 = vpop.f32.mrb[8].mxu1 }
 0x108   :  { %v1165_v6 = vpop.f32.mrb[11].mxu0  ;;  %v1202_v9 = vpop.f32.mrb[9].mxu1 }
 0x109   :  { %v731_v7 = vadd.f32 %v1163_v2, %v186_v1  ;;  %v1166_v8 = vadd.f32 %v1165_v6, %v1164_v3  ;;  %v1203_v10 = vadd.f32 %v1202_v9, %v1201_v5  ;;  %v1204_v11 = vpop.f32.mrb[10].mxu1 }
 0x10a   :  { %v1205_v13 = vpop.f32.mrb[11].mxu1 }
 0x10b   :  { %v734_v12 = vadd.f32 %v1166_v8, %v191_v4  ;;  %v1683_v14 = vadd.f32 %v1203_v10, %v731_v7  ;;  %v1206_v15 = vadd.f32 %v1205_v13, %v1204_v11 }
 0x10d   :  { %v1167_v16 = vpop.f32.mrb[12].mxu0  ;;  %v1685_v17 = vadd.f32 %v1206_v15, %v734_v12 }
 0x10e   :  { %v1168_v18 = vpop.f32.mrb[13].mxu0 }
 0x10f   :  { %v1169_v20 = vadd.f32 %v1168_v18, %v1167_v16  ;;  %v1170_v21 = vpop.f32.mrb[14].mxu0  ;;  %v1207_v23 = vpop.f32.mrb[12].mxu1 }
 0x110   :  { %v1171_v24 = vpop.f32.mrb[15].mxu0  ;;  %v1208_v27 = vpop.f32.mrb[13].mxu1 }
 0x111   :  { %v739_v25 = vadd.f32 %v1169_v20, %v196_v19  ;;  %v1172_v26 = vadd.f32 %v1171_v24, %v1170_v21  ;;  %v1209_v28 = vadd.f32 %v1208_v27, %v1207_v23  ;;  %v1210_v29 = vpop.f32.mrb[14].mxu1 }
 0x112   :  { %v1211_v31 = vpop.f32.mrb[15].mxu1 }
 0x113   :  { %v742_v30 = vadd.f32 %v1172_v26, %v201_v22  ;;  %v1687_v32 = vadd.f32 %v1209_v28, %v739_v25  ;;  %v1212_v33 = vadd.f32 %v1211_v31, %v1210_v29 }
 0x115   :  { %v1689_v34 = vadd.f32 %v1212_v33, %v742_v30  ;;  %v1229_v35 = vpop.f32.mrb[16].mxu0 }
 0x116   :  { %v1230_v36 = vpop.f32.mrb[17].mxu0 }
 0x117   :  { %v1231_v37 = vadd.f32 %v1230_v36, %v1229_v35  ;;  %v1232_v38 = vpop.f32.mrb[18].mxu0  ;;  %v1277_v40 = vpop.f32.mrb[16].mxu1 }
 0x118   :  { %v1233_v39 = vpop.f32.mrb[19].mxu0  ;;  %v909_v44 = vpop.f32.mrb[17].mxu1 }
 0x119   :  { %v1234_v41 = vadd.f32 %v1233_v39, %v1232_v38  ;;  %v845_v42 = vadd.f32 %v1231_v37, %v1675_v43  ;;  %v1278_v45 = vpop.f32.mrb[18].mxu1 }
 0x11a   :  { %v912_v49 = vpop.f32.mrb[19].mxu1 }
 0x11b   :  { %v910_v47 = vadd.f32 %v909_v44, %v845_v42  ;;  %v848_v48 = vadd.f32 %v1234_v41, %v1677_v46 }
 0x11d   :  { %v948_v50 = vmul.f32 0.01, %v910_v47  ;;  %v913_v51 = vadd.f32 %v912_v49, %v848_v48  ;;  %v1235_v52 = vpop.f32.mrb[20].mxu0  ;;  %vm940_vm1 = vcmp.ge.f32.partialorder %v910_v47, 0.0 }
 0x11e   :  { %v1236_v53 = vpop.f32.mrb[21].mxu0 }
 0x11f   :  { %vm941_vm2 = vcmp.ge.f32.partialorder %v913_v51, 0.0  ;;  %v949_v54 = vmul.f32 0.01, %v913_v51  ;;  %v1237_v55 = vadd.f32 %v1236_v53, %v1235_v52  ;;  %v1238_v56 = vpop.f32.mrb[22].mxu0  ;;  %v1281_v58 = vpop.f32.mrb[20].mxu1  ;;  %v956_v59 = vsel %vm940_vm1, %v910_v47, %v948_v50 }
 0x120   :  { %v1239_v57 = vpop.f32.mrb[23].mxu0  ;;  %v925_v0 = vpop.f32.mrb[21].mxu1 }
 0x121   :  { %v957_v61 = vsel %vm941_vm2, %v913_v51, %v949_v54  ;;  %v853_v43 = vadd.f32 %v1237_v55, %v1679_v60  ;;  %v1240_v62 = vadd.f32 %v1239_v57, %v1238_v56  ;;  %v1282_v46 = vpop.f32.mrb[22].mxu1 }
 0x122   :  { %v1113_v1 = vpack.c.bf16 %v957_v61, %v956_v59  ;;  %v928_v4 = vpop.f32.mrb[23].mxu1 }
 0x123   :  { %v918_v2 = vadd.f32 %v1277_v40, %v853_v43  ;;  %v856_v3 = vadd.f32 %v1240_v62, %v1681_v63 }
 0x124   :  { %1114 = vst [vmem:[%s1714_s3] sm:$0xff] %v1113_v1  }
 0x125   :  { %v950_v5 = vmul.f32 0.01, %v918_v2  ;;  %v921_v6 = vadd.f32 %v1278_v45, %v856_v3  ;;  %v1241_v7 = vpop.f32.mrb[24].mxu0  ;;  %vm942_vm3 = vcmp.ge.f32.partialorder %v918_v2, 0.0 }
 0x126   :  { %v1242_v8 = vpop.f32.mrb[25].mxu0 }
 0x127   :  { %vm943_vm4 = vcmp.ge.f32.partialorder %v921_v6, 0.0  ;;  %v951_v9 = vmul.f32 0.01, %v921_v6  ;;  %v1243_v60 = vadd.f32 %v1242_v8, %v1241_v7  ;;  %v1244_v10 = vpop.f32.mrb[26].mxu0  ;;  %v958_v12 = vsel %vm942_vm3, %v918_v2, %v950_v5 }
 0x128   :  { %v1245_v11 = vpop.f32.mrb[27].mxu0 }
 0x129   :  { %v959_v13 = vsel %vm943_vm4, %v921_v6, %v951_v9  ;;  %v1246_v15 = vadd.f32 %v1245_v11, %v1244_v10  ;;  %v861_v63 = vadd.f32 %v1243_v60, %v1683_v14 }
 0x12a   :  { %v1118_v16 = vpack.c.bf16 %v959_v13, %v958_v12 }
 0x12b   :  { %v926_v18 = vadd.f32 %v925_v0, %v861_v63  ;;  %v864_v19 = vadd.f32 %v1246_v15, %v1685_v17 }
 0x12c   :  { %1130 = vst [vmem:[%s1714_s3 + $0x8] sm:$0xff] %v1118_v16  }
 0x12d   :  { %v952_v20 = vmul.f32 0.01, %v926_v18  ;;  %v929_v21 = vadd.f32 %v928_v4, %v864_v19  ;;  %v1247_v22 = vpop.f32.mrb[28].mxu0  ;;  %vm944_vm5 = vcmp.ge.f32.partialorder %v926_v18, 0.0 }
 0x12e   :  { %v1248_v23 = vpop.f32.mrb[29].mxu0 }
 0x12f   :  { %vm945_vm6 = vcmp.ge.f32.partialorder %v929_v21, 0.0  ;;  %v953_v24 = vmul.f32 0.01, %v929_v21  ;;  %v1249_v25 = vadd.f32 %v1248_v23, %v1247_v22  ;;  %v1250_v26 = vpop.f32.mrb[30].mxu0  ;;  %v960_v28 = vsel %vm944_vm5, %v926_v18, %v952_v20 }
 0x130   :  { %v1251_v27 = vpop.f32.mrb[31].mxu0 }
 0x131   :  { %v961_v14 = vsel %vm945_vm6, %v929_v21, %v953_v24  ;;  %v869_v29 = vadd.f32 %v1249_v25, %v1687_v32  ;;  %v1252_v30 = vadd.f32 %v1251_v27, %v1250_v26 }
 0x132   :  { %v1123_v17 = vpack.c.bf16 %v961_v14, %v960_v28 }
 0x133   :  { %v934_v31 = vadd.f32 %v1281_v58, %v869_v29  ;;  %v872_v33 = vadd.f32 %v1252_v30, %v1689_v34 }
 0x134   :  { %1131 = vst [vmem:[%s1714_s3 + $0x10] sm:$0xff] %v1123_v17  }
 0x135   :  { %v954_v35 = vmul.f32 0.01, %v934_v31  ;;  %v937_v36 = vadd.f32 %v1282_v46, %v872_v33  ;;  %vm946_vm7 = vcmp.ge.f32.partialorder %v934_v31, 0.0 }
 0x137   :  { %vm947_vm8 = vcmp.ge.f32.partialorder %v937_v36, 0.0  ;;  %v955_v37 = vmul.f32 0.01, %v937_v36  ;;  %v962_v38 = vsel %vm946_vm7, %v934_v31, %v954_v35 }
 0x139   :  { %v963_v39 = vsel %vm947_vm8, %v937_v36, %v955_v37 }
 0x13a   :  { %v1128_v40 = vpack.c.bf16 %v963_v39, %v962_v38 }
 0x13c   :  { %1132 = vst [vmem:[%s1714_s3 + $0x18] sm:$0xff] %v1128_v40  }

// kernel: downup_forward.27
= control target key start
LH: loop header
LB: loop body
LE: loop exit
PB: predicated region body
PF: predicated region fallthrough
CT: control target
= control target key end

     0   :  { %v1070_v1 = vmov 0   ;;  %vm557_vm0 = vcmask 785408   ;;  %s1315_s0 = inlined_call_operand.vmem [shape: bf16[864,128], index: 0, kind: input, shape index: {}]   ;;  %s1316_s1 = inlined_call_operand.vmem [shape: bf16[32,864], index: 1, kind: input, shape index: {}]   ;;  %s1317_s2 = inlined_call_operand.vmem [shape: f32[32,1], index: 2, kind: input, shape index: {}]   ;;  %s1318_s3 = inlined_call_operand.vmem [shape: bf16[32,128], index: 3, kind: output, shape index: {}]  }
   0x1   :  { %v996_v0 = vld [vmem:[%s1315_s0 + $0x40] sm:$0xff]   ;;  %994 = vset.pattern.permute.xlu0 %v1070_v1  ;;  %995 = vset.pattern.permute.xlu1 %v1070_v1  ;;  %v1000_v5 = vld [vmem:[%s1315_s0 + $0x48] sm:$0xff]   ;;  %v1004_v9 = vld [vmem:[%s1315_s0 + $0x50] sm:$0xff]  }
   0x2   :  { %v997_v2 = vld [vmem:[%s1315_s0] sm:$0xff]   ;;  %885 = vmatprep.subr.bf16.mxu0 %v996_v0  ;;  %v1001_v6 = vld [vmem:[%s1315_s0 + $0x8] sm:$0xff]   ;;  %v1005_v10 = vld [vmem:[%s1315_s0 + $0x10] sm:$0xff]  }
   0x3   :  { %v998_v3 = vld [vmem:[%s1315_s0 + $0xc0] sm:$0xff]   ;;  %886 = vmatpush3.bf16.msra.mxu0 %v997_v2  ;;  %v1002_v7 = vld [vmem:[%s1315_s0 + $0xc8] sm:$0xff]   ;;  %v1006_v11 = vld [vmem:[%s1315_s0 + $0xd0] sm:$0xff]  }
   0x4   :  { %v999_v4 = vld [vmem:[%s1315_s0 + $0x80] sm:$0xff]   ;;  %913 = vmatprep.subr.bf16.mxu1 %v998_v3  ;;  %887 = vmatprep.subr.bf16.mxu0 %v1000_v5  ;;  %v1003_v8 = vld [vmem:[%s1315_s0 + $0x88] sm:$0xff]   ;;  %v1007_v12 = vld [vmem:[%s1315_s0 + $0x90] sm:$0xff]  }
   0x5   :  { %914 = vmatpush3.bf16.msra.mxu1 %v999_v4  ;;  %v1008_v13 = vld [vmem:[%s1315_s0 + $0x58] sm:$0xff]   ;;  %v1012_v17 = vld [vmem:[%s1315_s0 + $0x60] sm:$0xff]   ;;  %v1016_v21 = vld [vmem:[%s1315_s0 + $0x68] sm:$0xff]  }
   0x6   :  { %915 = vmatprep.subr.bf16.mxu1 %v1002_v7  ;;  %v1009_v14 = vld [vmem:[%s1315_s0 + $0x18] sm:$0xff]   ;;  %v1013_v18 = vld [vmem:[%s1315_s0 + $0x20] sm:$0xff]   ;;  %v1017_v22 = vld [vmem:[%s1315_s0 + $0x28] sm:$0xff]  }
   0x7   :  { %888 = vmatpush3.bf16.msra.mxu0 %v1001_v6  ;;  %v1010_v15 = vld [vmem:[%s1315_s0 + $0xd8] sm:$0xff]   ;;  %v1014_v19 = vld [vmem:[%s1315_s0 + $0xe0] sm:$0xff]   ;;  %v1018_v23 = vld [vmem:[%s1315_s0 + $0xe8] sm:$0xff]  }
   0x8   :  { %889 = vmatprep.subr.bf16.mxu0 %v1004_v9  ;;  %v1011_v16 = vld [vmem:[%s1315_s0 + $0x98] sm:$0xff]   ;;  %v1015_v20 = vld [vmem:[%s1315_s0 + $0xa0] sm:$0xff]   ;;  %v1019_v24 = vld [vmem:[%s1315_s0 + $0xa8] sm:$0xff]  }
   0x9   :  { %916 = vmatpush3.bf16.msra.mxu1 %v1003_v8  ;;  %v1020_v25 = vld [vmem:[%s1315_s0 + $0x70] sm:$0xff]   ;;  %v1024_v29 = vld [vmem:[%s1315_s0 + $0x78] sm:$0xff]   ;;  %v1029_v33 = vld [vmem:[%s1316_s1 + $0x4] ss:$28 sps:$4 sm:$0xff]  }
   0xa   :  { %917 = vmatprep.subr.bf16.mxu1 %v1006_v11  ;;  %v1021_v26 = vld [vmem:[%s1315_s0 + $0x30] sm:$0xff]   ;;  %v1025_v30 = vld [vmem:[%s1315_s0 + $0x38] sm:$0xff]   ;;  %596 = vmatprep.mubr.bf16.mxu0 %v1029_v33  ;;  %v1031_v35 = vld [vmem:[%s1315_s0 + $0x140] sm:$0xff]  }
   0xb   :  { %890 = vmatpush3.bf16.msra.mxu0 %v1005_v10  ;;  %v1022_v27 = vld [vmem:[%s1315_s0 + $0xf0] sm:$0xff]   ;;  %v1026_v31 = vld [vmem:[%s1315_s0 + $0xf8] sm:$0xff]   ;;  %v1032_v36 = vld [vmem:[%s1316_s1 + $0x8] ss:$28 sps:$4 sm:$0xff]  }
   0xc   :  { %891 = vmatprep.subr.bf16.mxu0 %v1008_v13  ;;  %v1023_v28 = vld [vmem:[%s1315_s0 + $0xb0] sm:$0xff]   ;;  %v1027_v32 = vld [vmem:[%s1316_s1] ss:$28 sps:$4 sm:$0xff]   ;;  %v1034_v37 = vld [vmem:[%s1316_s1 + $0xc] ss:$28 sps:$4 sm:$0xff]  }
   0xd   :  { %918 = vmatpush3.bf16.msra.mxu1 %v1007_v12  ;;  %v1030_v34 = vld [vmem:[%s1315_s0 + $0xb8] sm:$0xff]   ;;  %v1035_v38 = vld [vmem:[%s1315_s0 + $0x100] sm:$0xff]   ;;  %645 = vmatprep.mubr.bf16.mxu1 %v1034_v37  ;;  %v1036_v39 = vld [vmem:[%s1315_s0 + $0x148] sm:$0xff]  }
   0xe   :  { %919 = vmatprep.subr.bf16.mxu1 %v1010_v15  ;;  %v1037_v40 = vld [vmem:[%s1315_s0 + $0x108] sm:$0xff]   ;;  %v1038_v41 = vld [vmem:[%s1315_s0 + $0x150] sm:$0xff]   ;;  %v1041_v43 = vld [vmem:[%s1315_s0 + $0x180] sm:$0xff]  }
   0xf   :  { %892 = vmatpush3.bf16.msra.mxu0 %v1009_v14  ;;  %v1039_v42 = vld [vmem:[%s1315_s0 + $0x110] sm:$0xff]   ;;  %v1040_v44 = vld [vmem:[%s1315_s0 + $0x158] sm:$0xff]   ;;  %v1044_v46 = vld [vmem:[%s1315_s0 + $0x188] sm:$0xff]  }
  0x10   :  { %893 = vmatprep.subr.bf16.mxu0 %v1012_v17  ;;  %v1042_v45 = vld [vmem:[%s1315_s0 + $0x118] sm:$0xff]   ;;  %v1043_v47 = vld [vmem:[%s1315_s0 + $0x160] sm:$0xff]   ;;  %v1049_v50 = vld [vmem:[%s1315_s0 + $0x190] sm:$0xff]  }
  0x11   :  { %920 = vmatpush3.bf16.msra.mxu1 %v1011_v16  ;;  %v1046_v48 = vld [vmem:[%s1316_s1 + $0x3c] ss:$28 sps:$4 sm:$0xff]   ;;  %v1045_v49 = vld [vmem:[%s1315_s0 + $0x120] sm:$0xff]   ;;  %v1048_v52 = vld [vmem:[%s1315_s0 + $0x168] sm:$0xff]  }
  0x12   :  { %921 = vmatprep.subr.bf16.mxu1 %v1014_v19  ;;  %v1050_v51 = vld [vmem:[%s1316_s1 + $0x38] ss:$28 sps:$4 sm:$0xff]   ;;  %v1052_v53 = vld [vmem:[%s1316_s1 + $0x44] ss:$28 sps:$4 sm:$0xff]   ;;  %v1051_v55 = vld [vmem:[%s1315_s0 + $0x128] sm:$0xff]  }
  0x13   :  { %894 = vmatpush3.bf16.msra.mxu0 %v1013_v18  ;;  %v1054_v54 = vld [vmem:[%s1316_s1 + $0x40] ss:$28 sps:$4 sm:$0xff]   ;;  %v1055_v57 = vld [vmem:[%s1315_s0 + $0x170] sm:$0xff]   ;;  %v1064_v62 = vld [vmem:[%s1315_s0 + $0x1a8] sm:$0xff]  }
  0x14   :  { %895 = vmatprep.subr.bf16.mxu0 %v1016_v21  ;;  %v1056_v56 = vld [vmem:[%s1315_s0 + $0x198] sm:$0xff]   ;;  %v1059_v58 = vld [vmem:[%s1315_s0 + $0x1a0] sm:$0xff]   ;;  %v1057_v59 = vld [vmem:[%s1315_s0 + $0x130] sm:$0xff]  }
  0x15   :  { %922 = vmatpush3.bf16.msra.mxu1 %v1015_v20  ;;  %v1058_v60 = vld [vmem:[%s1315_s0 + $0x178] sm:$0xff]   ;;  %v1063_v61 = vld [vmem:[%s1316_s1 + $0x14] ss:$28 sps:$4 sm:$0xff]   ;;  %v139_v2 = vld [vmem:[%s1317_s2] sm:$0xff] }
  0x16   :  { %923 = vmatprep.subr.bf16.mxu1 %v1018_v23  ;;  %v1065_v63 = vld [vmem:[%s1316_s1 + $0x18] ss:$28 sps:$4 sm:$0xff]   ;;  %v1066_v1 = vld [vmem:[%s1316_s1 + $0x50] ss:$28 sps:$4 sm:$0xff]   ;;  %145 = vperm.xlu0 %994, %v139_v2   ;;  %v1069_v8 = vld [vmem:[%s1316_s1 + $0x48] ss:$28 sps:$4 sm:$0xff]  }
  0x17   :  { %896 = vmatpush3.bf16.msra.mxu0 %v1017_v22  ;;  %v1060_v0 = vld [vmem:[%s1315_s0 + $0x138] sm:$0xff]   ;;  %v141_v3 = vld [vmem:[%s1317_s2 + $0x10] sm:$0xff]  ;;  %v1067_v5 = vld [vmem:[%s1316_s1 + $0x4c] ss:$28 sps:$4 sm:$0xff]  }
  0x18   :  { %897 = vmatprep.subr.bf16.mxu0 %v1020_v25  ;;  %v1061_v4 = vld [vmem:[%s1316_s1 + $0x10] ss:$28 sps:$4 sm:$0xff]   ;;  %155 = vperm.xlu1 %995, %v141_v3   ;;  %v142_v7 = vld [vmem:[%s1317_s2 + $0x18] sm:$0xff] }
  0x19   :  { %924 = vmatpush3.bf16.msra.mxu1 %v1019_v24  ;;  %v140_v6 = vld [vmem:[%s1317_s2 + $0x8] sm:$0xff] }
  0x1a   :  { %925 = vmatprep.subr.bf16.mxu1 %v1022_v27  ;;  %150 = vperm.xlu0 %994, %v140_v6  }
  0x1b   :  { %898 = vmatpush3.bf16.msra.mxu0 %v1021_v26 }
  0x1c   :  { %899 = vmatprep.subr.bf16.mxu0 %v1024_v29  ;;  %160 = vperm.xlu1 %995, %v142_v7  }
  0x1d   :  { %926 = vmatpush3.bf16.msra.mxu1 %v1023_v28 }
  0x1e   :  { %927 = vmatprep.subr.bf16.mxu1 %v1026_v31 }
  0x1f   :  { %900 = vmatpush3.bf16.msra.mxu0 %v1025_v30 }
  0x20   :  { %941 = vmatprep.subr.bf16.mxu0 %v1031_v35 }
  0x21   :  { %928 = vmatpush3.bf16.msra.mxu1 %v1030_v34 }
  0x22   :  { %597 = vmatmul.mubr.bf16.vlgmr.msra.gmra.mrb[0].mxu0 %v1027_v32  ;;  %977 = vmatprep.subr.bf16.mxu1 %v1041_v43 }
  0x23   :  { %942 = vmatpush3.bf16.msra.mxu0 %v1035_v38  ;;  %604 = vmatprep.mubr.bf16.mxu0 %v1046_v48 }
  0x24   :  { %646 = vmatmul.mubr.bf16.vlgmr.msra.gmra.mrb[0].mxu1 %v1032_v36  ;;  %943 = vmatprep.subr.bf16.mxu0 %v1036_v39 }
  0x25   :  { %978 = vmatpush3.bf16.msra.mxu1 %v1041_v43  ;;  %653 = vmatprep.mubr.bf16.mxu1 %v1052_v53 }
  0x26   :  { %979 = vmatprep.subr.bf16.mxu1 %v1044_v46 }
  0x27   :  { %944 = vmatpush3.bf16.msra.mxu0 %v1037_v40 }
  0x28   :  { %945 = vmatprep.subr.bf16.mxu0 %v1038_v41 }
  0x29   :  { %980 = vmatpush3.bf16.msra.mxu1 %v1044_v46 }
  0x2a   :  { %981 = vmatprep.subr.bf16.mxu1 %v1049_v50  ;;  %605 = vmatmul.mubr.bf16.gmra.mrb[4].mxu0 %v1050_v51 }
  0x2b   :  { %946 = vmatpush3.bf16.msra.mxu0 %v1039_v42  ;;  %694 = vmatprep.mubr.bf16.mxu0 %v1063_v61 }
  0x2c   :  { %947 = vmatprep.subr.bf16.mxu0 %v1040_v44  ;;  %654 = vmatmul.mubr.bf16.gmra.mrb[4].mxu1 %v1054_v54 }
  0x2d   :  { %982 = vmatpush3.bf16.msra.mxu1 %v1049_v50  ;;  %989 = vmatprep.mubr.msk.bf16.mxu1 %vm557_vm0, %v1065_v63 }
  0x2e   :  { %983 = vmatprep.subr.bf16.mxu1 %v1056_v56 }
  0x2f   :  { %948 = vmatpush3.bf16.msra.mxu0 %v1042_v45 }
  0x30   :  { %949 = vmatprep.subr.bf16.mxu0 %v1043_v47 }
  0x31   :  { %984 = vmatpush3.bf16.msra.mxu1 %v1056_v56 }
  0x32   :  { %985 = vmatprep.subr.bf16.mxu1 %v1059_v58 }
  0x33   :  { %950 = vmatpush3.bf16.msra.mxu0 %v1045_v49 }
  0x34   :  { %951 = vmatprep.subr.bf16.mxu0 %v1048_v52 }
  0x35   :  { %986 = vmatpush3.bf16.msra.mxu1 %v1059_v58 }
  0x36   :  { %987 = vmatprep.subr.bf16.mxu1 %v1064_v62 }
  0x37   :  { %952 = vmatpush3.bf16.msra.mxu0 %v1051_v55 }
  0x38   :  { %953 = vmatprep.subr.bf16.mxu0 %v1055_v57 }
  0x39   :  { %988 = vmatpush3.bf16.msra.mxu1 %v1064_v62 }
  0x3b   :  { %954 = vmatpush3.bf16.msra.mxu0 %v1057_v59 }
  0x3c   :  { %955 = vmatprep.subr.bf16.mxu0 %v1058_v60  ;;  %990 = vmatmul.mubr.msk.bf16.vlgmr.msra.gmra.mrb[8].mxu1 %vm557_vm0, %v1066_v1 }
  0x3f   :  { %956 = vmatpush3.bf16.msra.mxu0 %v1060_v0 }
  0x42   :  { %695 = vmatmul.mubr.bf16.vlgmr.msra.gmra.mrb[8].mxu0 %v1061_v4 }
  0x43   :  { %702 = vmatprep.mubr.bf16.mxu0 %v1067_v5 }
  0x4a   :  { %703 = vmatmul.mubr.bf16.gmra.mrb[12].mxu0 %v1069_v8 }
  0x95   :  { %v146_v9 = vpop.permute.xlu0 %145 }
  0x97   :  { %v156_v27 = vpop.permute.xlu1 %155 }
  0x99   :  { %v151_v14 = vpop.permute.xlu0 %150 }
  0x9b   :  { %v161_v30 = vpop.permute.xlu1 %160 }
  0xf5   :  { %v901_v10 = vpop.f32.mrb[0].mxu0 }
  0xf6   :  { %v902_v11 = vpop.f32.mrb[1].mxu0 }
  0xf7   :  { %v903_v12 = vadd.f32 %v902_v11, %v901_v10  ;;  %v904_v13 = vpop.f32.mrb[2].mxu0  ;;  %v929_v15 = vpop.f32.mrb[0].mxu1 }
  0xf8   :  { %v905_v16 = vpop.f32.mrb[3].mxu0  ;;  %v930_v19 = vpop.f32.mrb[1].mxu1 }
  0xf9   :  { %v599_v17 = vadd.f32 %v903_v12, %v146_v9  ;;  %v906_v18 = vadd.f32 %v905_v16, %v904_v13  ;;  %v931_v20 = vadd.f32 %v930_v19, %v929_v15  ;;  %v932_v21 = vpop.f32.mrb[2].mxu1 }
  0xfa   :  { %v933_v23 = vpop.f32.mrb[3].mxu1 }
  0xfb   :  { %v602_v22 = vadd.f32 %v906_v18, %v151_v14  ;;  %v648_v24 = vadd.f32 %v931_v20, %v599_v17  ;;  %v934_v25 = vadd.f32 %v933_v23, %v932_v21 }
  0xfd   :  { %v651_v26 = vadd.f32 %v934_v25, %v602_v22  ;;  %v907_v28 = vpop.f32.mrb[4].mxu0 }
  0xfe   :  { %v908_v29 = vpop.f32.mrb[5].mxu0 }
  0xff   :  { %v909_v31 = vadd.f32 %v908_v29, %v907_v28  ;;  %v910_v32 = vpop.f32.mrb[6].mxu0  ;;  %v935_v33 = vpop.f32.mrb[4].mxu1 }
 0x100   :  { %v911_v34 = vpop.f32.mrb[7].mxu0  ;;  %v936_v35 = vpop.f32.mrb[5].mxu1 }
 0x101   :  { %v607_v36 = vadd.f32 %v909_v31, %v156_v27  ;;  %v912_v37 = vadd.f32 %v911_v34, %v910_v32  ;;  %v937_v38 = vadd.f32 %v936_v35, %v935_v33  ;;  %v938_v39 = vpop.f32.mrb[6].mxu1 }
 0x102   :  { %v939_v40 = vpop.f32.mrb[7].mxu1 }
 0x103   :  { %v656_v41 = vadd.f32 %v937_v38, %v607_v36  ;;  %v610_v42 = vadd.f32 %v912_v37, %v161_v30  ;;  %v940_v43 = vadd.f32 %v939_v40, %v938_v39 }
 0x105   :  { %v659_v44 = vadd.f32 %v940_v43, %v610_v42 }
 0x10f   :  { %v991_v45 = vpop.f32.mrb[8].mxu1 }
 0x110   :  { %v745_v47 = vpop.f32.mrb[9].mxu1 }
 0x111   :  { %v992_v49 = vpop.f32.mrb[10].mxu1 }
 0x112   :  { %v748_v52 = vpop.f32.mrb[11].mxu1 }
 0x115   :  { %v957_v46 = vpop.f32.mrb[8].mxu0 }
 0x116   :  { %v958_v48 = vpop.f32.mrb[9].mxu0 }
 0x117   :  { %v959_v50 = vadd.f32 %v958_v48, %v957_v46  ;;  %v960_v51 = vpop.f32.mrb[10].mxu0 }
 0x118   :  { %v961_v53 = vpop.f32.mrb[11].mxu0 }
 0x119   :  { %v962_v54 = vadd.f32 %v961_v53, %v960_v51  ;;  %v697_v55 = vadd.f32 %v959_v50, %v648_v24 }
 0x11b   :  { %v746_v56 = vadd.f32 %v745_v47, %v697_v55  ;;  %v700_v57 = vadd.f32 %v962_v54, %v651_v26 }
 0x11d   :  { %v764_v58 = vmul.f32 0.01, %v746_v56  ;;  %v749_v59 = vadd.f32 %v748_v52, %v700_v57  ;;  %v963_v60 = vpop.f32.mrb[12].mxu0  ;;  %vm760_vm1 = vcmp.ge.f32.partialorder %v746_v56, 0.0 }
 0x11e   :  { %v964_v61 = vpop.f32.mrb[13].mxu0 }
 0x11f   :  { %vm761_vm2 = vcmp.ge.f32.partialorder %v749_v59, 0.0  ;;  %v765_v62 = vmul.f32 0.01, %v749_v59  ;;  %v965_v63 = vadd.f32 %v964_v61, %v963_v60  ;;  %v966_v0 = vpop.f32.mrb[14].mxu0  ;;  %v768_v2 = vsel %vm760_vm1, %v746_v56, %v764_v58 }
 0x120   :  { %v967_v1 = vpop.f32.mrb[15].mxu0 }
 0x121   :  { %v769_v3 = vsel %vm761_vm2, %v749_v59, %v765_v62  ;;  %v705_v4 = vadd.f32 %v965_v63, %v656_v41  ;;  %v968_v5 = vadd.f32 %v967_v1, %v966_v0 }
 0x122   :  { %v877_v6 = vpack.c.bf16 %v769_v3, %v768_v2 }
 0x123   :  { %v754_v7 = vadd.f32 %v991_v45, %v705_v4  ;;  %v708_v8 = vadd.f32 %v968_v5, %v659_v44 }
 0x124   :  { %878 = vst [vmem:[%s1318_s3] sm:$0xff] %v877_v6  }
 0x125   :  { %v766_v9 = vmul.f32 0.01, %v754_v7  ;;  %v757_v10 = vadd.f32 %v992_v49, %v708_v8  ;;  %vm762_vm3 = vcmp.ge.f32.partialorder %v754_v7, 0.0 }
 0x127   :  { %vm763_vm4 = vcmp.ge.f32.partialorder %v757_v10, 0.0  ;;  %v767_v11 = vmul.f32 0.01, %v757_v10  ;;  %v770_v12 = vsel %vm762_vm3, %v754_v7, %v766_v9 }
 0x129   :  { %v771_v13 = vsel %vm763_vm4, %v757_v10, %v767_v11 }
 0x12a   :  { %v882_v14 = vpack.c.bf16 %v771_v13, %v770_v12 }
 0x12c   :  { %884 = vst [vmem:[%s1318_s3 + $0x8] sm:$0xff] %v882_v14  }

// kernel: downup_forward.29
= control target key start
LH: loop header
LB: loop body
LE: loop exit
PB: predicated region body
PF: predicated region fallthrough
CT: control target
= control target key end

     0   :  { %v1933_v1 = vmov 0   ;;  %vm1069_vm0 = vcmask 523264   ;;  %s2396_s0 = inlined_call_operand.vmem [shape: bf16[1728,128], index: 0, kind: input, shape index: {}]   ;;  %s2397_s1 = inlined_call_operand.vmem [shape: bf16[32,1728], index: 1, kind: input, shape index: {}]   ;;  %s2398_s2 = inlined_call_operand.vmem [shape: f32[32,1], index: 2, kind: input, shape index: {}]   ;;  %s2399_s3 = inlined_call_operand.vmem [shape: bf16[32,128], index: 3, kind: output, shape index: {}]  }
   0x1   :  { %v1783_v0 = vld [vmem:[%s2396_s0 + $0x40] sm:$0xff]   ;;  %1781 = vset.pattern.permute.xlu0 %v1933_v1  ;;  %1782 = vset.pattern.permute.xlu1 %v1933_v1  ;;  %v1785_v3 = vld [vmem:[%s2396_s0 + $0x48] sm:$0xff]   ;;  %v1787_v5 = vld [vmem:[%s2396_s0 + $0x50] sm:$0xff]  }
   0x2   :  { %v1784_v2 = vld [vmem:[%s2396_s0] sm:$0xff]   ;;  %1612 = vmatprep.subr.bf16.mxu1 %v1783_v0  ;;  %v1786_v4 = vld [vmem:[%s2396_s0 + $0x8] sm:$0xff]   ;;  %v1788_v6 = vld [vmem:[%s2396_s0 + $0x10] sm:$0xff]  }
   0x3   :  { %1613 = vmatpush3.bf16.msra.mxu1 %v1784_v2  ;;  %v1789_v7 = vld [vmem:[%s2396_s0 + $0x58] sm:$0xff]   ;;  %v1793_v9 = vld [vmem:[%s2396_s0 + $0x140] sm:$0xff]   ;;  %v1797_v13 = vld [vmem:[%s2396_s0 + $0x148] sm:$0xff]  }
   0x4   :  { %1614 = vmatprep.subr.bf16.mxu1 %v1785_v3  ;;  %v1790_v8 = vld [vmem:[%s2396_s0 + $0x18] sm:$0xff]   ;;  %v1794_v10 = vld [vmem:[%s2396_s0 + $0x100] sm:$0xff]   ;;  %1668 = vmatprep.subr.bf16.mxu0 %v1793_v9  ;;  %v1798_v14 = vld [vmem:[%s2396_s0 + $0x108] sm:$0xff]  }
   0x5   :  { %v1791_v11 = vld [vmem:[%s2396_s0 + $0x60] sm:$0xff]   ;;  %1669 = vmatpush3.bf16.msra.mxu0 %v1794_v10  ;;  %v1795_v15 = vld [vmem:[%s2396_s0 + $0x68] sm:$0xff]   ;;  %v1801_v17 = vld [vmem:[%s2396_s0 + $0x150] sm:$0xff]  }
   0x6   :  { %v1792_v12 = vld [vmem:[%s2396_s0 + $0x20] sm:$0xff]   ;;  %1670 = vmatprep.subr.bf16.mxu0 %v1797_v13  ;;  %v1796_v16 = vld [vmem:[%s2396_s0 + $0x28] sm:$0xff]   ;;  %v1802_v18 = vld [vmem:[%s2396_s0 + $0x110] sm:$0xff]  }
   0x7   :  { %1615 = vmatpush3.bf16.msra.mxu1 %v1786_v4  ;;  %v1799_v19 = vld [vmem:[%s2396_s0 + $0x70] sm:$0xff]   ;;  %v1805_v21 = vld [vmem:[%s2396_s0 + $0x158] sm:$0xff]   ;;  %v1810_v26 = vld [vmem:[%s2396_s0 + $0xc0] sm:$0xff]  }
   0x8   :  { %1616 = vmatprep.subr.bf16.mxu1 %v1787_v5  ;;  %v1800_v20 = vld [vmem:[%s2396_s0 + $0x30] sm:$0xff]   ;;  %v1803_v22 = vld [vmem:[%s2396_s0 + $0x78] sm:$0xff]   ;;  %v1812_v28 = vld [vmem:[%s2396_s0 + $0x160] sm:$0xff]  }
   0x9   :  { %1671 = vmatpush3.bf16.msra.mxu0 %v1798_v14  ;;  %v1808_v23 = vld [vmem:[%s2397_s1 + $0x4] ss:$56 sps:$4 sm:$0xff]   ;;  %v1806_v27 = vld [vmem:[%s2397_s1] ss:$56 sps:$4 sm:$0xff]   ;;  %v1814_v31 = vld [vmem:[%s2396_s0 + $0xc8] sm:$0xff]  }
   0xa   :  { %1672 = vmatprep.subr.bf16.mxu0 %v1801_v17  ;;  %v1809_v24 = vld [vmem:[%s2396_s0 + $0x118] sm:$0xff]   ;;  %1108 = vmatprep.mubr.bf16.mxu1 %v1808_v23  ;;  %v1813_v29 = vld [vmem:[%s2396_s0 + $0x120] sm:$0xff]   ;;  %v1816_v32 = vld [vmem:[%s2396_s0 + $0x168] sm:$0xff]  }
   0xb   :  { %1617 = vmatpush3.bf16.msra.mxu1 %v1788_v6  ;;  %v1804_v25 = vld [vmem:[%s2396_s0 + $0x38] sm:$0xff]   ;;  %v1811_v30 = vld [vmem:[%s2396_s0 + $0x80] sm:$0xff]   ;;  %v1817_v33 = vld [vmem:[%s2396_s0 + $0x128] sm:$0xff]  }
   0xc   :  { %1618 = vmatprep.subr.bf16.mxu1 %v1789_v7  ;;  %v1815_v34 = vld [vmem:[%s2396_s0 + $0x88] sm:$0xff]   ;;  %v1818_v35 = vld [vmem:[%s2396_s0 + $0xd0] sm:$0xff]   ;;  %v1822_v39 = vld [vmem:[%s2396_s0 + $0xd8] sm:$0xff]  }
   0xd   :  { %1673 = vmatpush3.bf16.msra.mxu0 %v1802_v18  ;;  %v1820_v36 = vld [vmem:[%s2396_s0 + $0x170] sm:$0xff]   ;;  %v1824_v40 = vld [vmem:[%s2396_s0 + $0x178] sm:$0xff]   ;;  %v1826_v43 = vld [vmem:[%s2396_s0 + $0xe0] sm:$0xff]  }
   0xe   :  { %1674 = vmatprep.subr.bf16.mxu0 %v1805_v21  ;;  %v1821_v37 = vld [vmem:[%s2396_s0 + $0x130] sm:$0xff]   ;;  %v1825_v41 = vld [vmem:[%s2396_s0 + $0x138] sm:$0xff]   ;;  %v1827_v46 = vld [vmem:[%s2396_s0 + $0xa0] sm:$0xff]  }
   0xf   :  { %1619 = vmatpush3.bf16.msra.mxu1 %v1790_v8  ;;  %v1819_v38 = vld [vmem:[%s2396_s0 + $0x90] sm:$0xff]   ;;  %v1823_v42 = vld [vmem:[%s2396_s0 + $0x98] sm:$0xff]   ;;  %v1831_v47 = vld [vmem:[%s2396_s0 + $0x240] sm:$0xff]  }
  0x10   :  { %1620 = vmatprep.subr.bf16.mxu1 %v1791_v11  ;;  %v1828_v44 = vld [vmem:[%s2397_s1 + $0x10] ss:$56 sps:$4 sm:$0xff]   ;;  %v1830_v45 = vld [vmem:[%s2397_s1 + $0x14] ss:$56 sps:$4 sm:$0xff]   ;;  %v1832_v48 = vld [vmem:[%s2396_s0 + $0x200] sm:$0xff]  }
  0x11   :  { %1675 = vmatpush3.bf16.msra.mxu0 %v1809_v24  ;;  %1206 = vmatprep.mubr.bf16.mxu0 %v1830_v45  ;;  %v1833_v49 = vld [vmem:[%s2396_s0 + $0xe8] sm:$0xff]   ;;  %v1840_v55 = vld [vmem:[%s2396_s0 + $0xf0] sm:$0xff]   ;;  %v1844_v59 = vld [vmem:[%s2396_s0 + $0xf8] sm:$0xff]  }
  0x12   :  { %1676 = vmatprep.subr.bf16.mxu0 %v1812_v28  ;;  %v1834_v50 = vld [vmem:[%s2397_s1 + $0x74] ss:$56 sps:$4 sm:$0xff]   ;;  %v1837_v52 = vld [vmem:[%s2397_s1 + $0x70] ss:$56 sps:$4 sm:$0xff]   ;;  %v1846_v60 = vld [vmem:[%s2396_s0 + $0x258] sm:$0xff]  }
  0x13   :  { %1621 = vmatpush3.bf16.msra.mxu1 %v1792_v12  ;;  %v1836_v51 = vld [vmem:[%s2396_s0 + $0xa8] sm:$0xff]   ;;  %v1841_v56 = vld [vmem:[%s2396_s0 + $0xb0] sm:$0xff]   ;;  %v1845_v61 = vld [vmem:[%s2396_s0 + $0xb8] sm:$0xff]  }
  0x14   :  { %1622 = vmatprep.subr.bf16.mxu1 %v1795_v15  ;;  %v1838_v53 = vld [vmem:[%s2396_s0 + $0x248] sm:$0xff]   ;;  %v1842_v57 = vld [vmem:[%s2396_s0 + $0x250] sm:$0xff]   ;;  %v1850_v0 = vld [vmem:[%s2396_s0 + $0x218] sm:$0xff]  }
  0x15   :  { %1677 = vmatpush3.bf16.msra.mxu0 %v1813_v29  ;;  %v1839_v54 = vld [vmem:[%s2396_s0 + $0x208] sm:$0xff]   ;;  %v1843_v58 = vld [vmem:[%s2396_s0 + $0x210] sm:$0xff]   ;;  %v1851_v2 = vld [vmem:[%s2396_s0 + $0x1c0] sm:$0xff]  }
  0x16   :  { %1678 = vmatprep.subr.bf16.mxu0 %v1816_v32  ;;  %v1847_v62 = vld [vmem:[%s2397_s1 + $0x8] ss:$56 sps:$4 sm:$0xff]   ;;  %v1849_v63 = vld [vmem:[%s2397_s1 + $0xc] ss:$56 sps:$4 sm:$0xff]   ;;  %v1858_v9 = vld [vmem:[%s2397_s1 + $0x7c] ss:$56 sps:$4 sm:$0xff]  }
  0x17   :  { %1623 = vmatpush3.bf16.msra.mxu1 %v1796_v16  ;;  %v1852_v3 = vld [vmem:[%s2396_s0 + $0x180] sm:$0xff]   ;;  %v1855_v6 = vld [vmem:[%s2396_s0 + $0x1c8] sm:$0xff]   ;;  %v1861_v11 = vld [vmem:[%s2397_s1 + $0x78] ss:$56 sps:$4 sm:$0xff]  }
  0x18   :  { %1624 = vmatprep.subr.bf16.mxu1 %v1799_v19  ;;  %v1853_v4 = vld [vmem:[%s2396_s0 + $0x260] sm:$0xff]   ;;  %v1856_v7 = vld [vmem:[%s2396_s0 + $0x188] sm:$0xff]   ;;  %v1862_v12 = vld [vmem:[%s2396_s0 + $0x1d0] sm:$0xff]  }
  0x19   :  { %1679 = vmatpush3.bf16.msra.mxu0 %v1817_v33  ;;  %v1854_v5 = vld [vmem:[%s2396_s0 + $0x220] sm:$0xff]   ;;  %v1857_v8 = vld [vmem:[%s2396_s0 + $0x268] sm:$0xff]   ;;  %v1865_v14 = vld [vmem:[%s2396_s0 + $0x190] sm:$0xff]  }
  0x1a   :  { %1680 = vmatprep.subr.bf16.mxu0 %v1820_v36  ;;  %v1860_v10 = vld [vmem:[%s2396_s0 + $0x228] sm:$0xff]   ;;  %v1863_v13 = vld [vmem:[%s2397_s1 + $0x84] ss:$56 sps:$4 sm:$0xff]   ;;  %v1866_v15 = vld [vmem:[%s2397_s1 + $0x80] ss:$56 sps:$4 sm:$0xff]  }
  0x1b   :  { %1625 = vmatpush3.bf16.msra.mxu1 %v1800_v20  ;;  %v1867_v16 = vld [vmem:[%s2396_s0 + $0x270] sm:$0xff]   ;;  %v1869_v18 = vld [vmem:[%s2396_s0 + $0x1d8] sm:$0xff]   ;;  %v1874_v23 = vld [vmem:[%s2396_s0 + $0x1a0] sm:$0xff]  }
  0x1c   :  { %1626 = vmatprep.subr.bf16.mxu1 %v1803_v22  ;;  %v1868_v17 = vld [vmem:[%s2396_s0 + $0x230] sm:$0xff]   ;;  %v1870_v19 = vld [vmem:[%s2396_s0 + $0x198] sm:$0xff]   ;;  %v1873_v22 = vld [vmem:[%s2396_s0 + $0x1e0] sm:$0xff]  }
  0x1d   :  { %1681 = vmatpush3.bf16.msra.mxu0 %v1821_v37  ;;  %v1871_v20 = vld [vmem:[%s2396_s0 + $0x278] sm:$0xff]   ;;  %v1880_v28 = vld [vmem:[%s2396_s0 + $0x1a8] sm:$0xff]   ;;  %v1884_v32 = vld [vmem:[%s2396_s0 + $0x310] sm:$0xff]  }
  0x1e   :  { %1682 = vmatprep.subr.bf16.mxu0 %v1824_v40  ;;  %v1872_v21 = vld [vmem:[%s2396_s0 + $0x238] sm:$0xff]   ;;  %v1881_v29 = vld [vmem:[%s2396_s0 + $0x308] sm:$0xff]   ;;  %v1893_v40 = vld [vmem:[%s2396_s0 + $0x320] sm:$0xff]  }
  0x1f   :  { %1627 = vmatpush3.bf16.msra.mxu1 %v1804_v25  ;;  %v1875_v24 = vld [vmem:[%s2397_s1 + $0x20] ss:$56 sps:$4 sm:$0xff]   ;;  %v1877_v25 = vld [vmem:[%s2397_s1 + $0x24] ss:$56 sps:$4 sm:$0xff]  }
  0x20   :  { %1640 = vmatprep.subr.bf16.mxu1 %v1810_v26  ;;  %v1878_v26 = vld [vmem:[%s2396_s0 + $0x300] sm:$0xff]   ;;  %v1885_v33 = vld [vmem:[%s2396_s0 + $0x1f8] sm:$0xff]  }
  0x21   :  { %1683 = vmatpush3.bf16.msra.mxu0 %v1825_v41  ;;  %v1889_v36 = vld [vmem:[%s2397_s1 + $0x1c] ss:$56 sps:$4 sm:$0xff]   ;;  %v1894_v41 = vld [vmem:[%s2396_s0 + $0x2c8] sm:$0xff]  }
  0x22   :  { %1109 = vmatmul.mubr.bf16.vlgmr.msra.gmra.mrb[0].mxu1 %v1806_v27  ;;  %1724 = vmatprep.subr.bf16.mxu0 %v1831_v47  ;;  %v1879_v27 = vld [vmem:[%s2396_s0 + $0x1e8] sm:$0xff]   ;;  %v1890_v37 = vld [vmem:[%s2396_s0 + $0x318] sm:$0xff]  }
  0x23   :  { %1641 = vmatpush3.bf16.msra.mxu1 %v1811_v30  ;;  %1116 = vmatprep.mubr.bf16.mxu1 %v1834_v50  ;;  %v1882_v30 = vld [vmem:[%s2396_s0 + $0x1f0] sm:$0xff]   ;;  %v1899_v45 = vld [vmem:[%s2397_s1 + $0x88] ss:$56 sps:$4 sm:$0xff]  }
  0x24   :  { %1642 = vmatprep.subr.bf16.mxu1 %v1814_v31  ;;  %1207 = vmatmul.mubr.bf16.vlgmr.msra.gmra.mrb[0].mxu0 %v1828_v44  ;;  %v1883_v31 = vld [vmem:[%s2396_s0 + $0x1b0] sm:$0xff]   ;;  %v1898_v44 = vld [vmem:[%s2396_s0 + $0x328] sm:$0xff]  }
  0x25   :  { %1725 = vmatpush3.bf16.msra.mxu0 %v1832_v48  ;;  %1214 = vmatprep.mubr.bf16.mxu0 %v1863_v13  ;;  %v1901_v47 = vld [vmem:[%s2397_s1 + $0x94] ss:$56 sps:$4 sm:$0xff]   ;;  %v1932_v13 = vld [vmem:[%s2397_s1 + $0xa0] ss:$56 sps:$4 sm:$0xff]  }
  0x26   :  { %1726 = vmatprep.subr.bf16.mxu0 %v1838_v53  ;;  %v1903_v48 = vld [vmem:[%s2396_s0 + $0x290] sm:$0xff]   ;;  %v1909_v53 = vld [vmem:[%s2396_s0 + $0x2e0] sm:$0xff]  }
  0x27   :  { %1643 = vmatpush3.bf16.msra.mxu1 %v1815_v34  ;;  %v1886_v34 = vld [vmem:[%s2396_s0 + $0x1b8] sm:$0xff]   ;;  %v1905_v50 = vld [vmem:[%s2396_s0 + $0x330] sm:$0xff]  }
  0x28   :  { %1644 = vmatprep.subr.bf16.mxu1 %v1818_v35  ;;  %v1887_v35 = vld [vmem:[%s2397_s1 + $0x18] ss:$56 sps:$4 sm:$0xff]  }
  0x29   :  { %1727 = vmatpush3.bf16.msra.mxu0 %v1839_v54  ;;  %v1908_v54 = vld [vmem:[%s2396_s0 + $0x338] sm:$0xff]  }
  0x2a   :  { %1117 = vmatmul.mubr.bf16.gmra.mrb[4].mxu1 %v1837_v52  ;;  %1728 = vmatprep.subr.bf16.mxu0 %v1842_v57  ;;  %v1907_v52 = vld [vmem:[%s2396_s0 + $0x298] sm:$0xff]   ;;  %v259_v57 = vld [vmem:[%s2398_s2] sm:$0xff] }
  0x2b   :  { %1645 = vmatpush3.bf16.msra.mxu1 %v1819_v38  ;;  %1157 = vmatprep.mubr.bf16.mxu1 %v1849_v63  ;;  %v1891_v38 = vld [vmem:[%s2396_s0 + $0x2c0] sm:$0xff]   ;;  %v1916_v63 = vld [vmem:[%s2396_s0 + $0x2b0] sm:$0xff]  }
  0x2c   :  { %1646 = vmatprep.subr.bf16.mxu1 %v1822_v39  ;;  %1215 = vmatmul.mubr.bf16.gmra.mrb[4].mxu0 %v1866_v15  ;;  %v1892_v39 = vld [vmem:[%s2396_s0 + $0x280] sm:$0xff]  }
  0x2d   :  { %1729 = vmatpush3.bf16.msra.mxu0 %v1843_v58  ;;  %1304 = vmatprep.mubr.bf16.mxu0 %v1877_v25  ;;  %v1911_v58 = vld [vmem:[%s2396_s0 + $0x340] sm:$0xff]  }
  0x2e   :  { %1730 = vmatprep.subr.bf16.mxu0 %v1846_v60  ;;  %265 = vperm.xlu0 %1781, %v259_v57   ;;  %v260_v60 = vld [vmem:[%s2398_s2 + $0x8] sm:$0xff] }
  0x2f   :  { %1647 = vmatpush3.bf16.msra.mxu1 %v1823_v42  ;;  %v1895_v42 = vld [vmem:[%s2396_s0 + $0x288] sm:$0xff]  }
  0x30   :  { %1648 = vmatprep.subr.bf16.mxu1 %v1826_v43  ;;  %v1896_v43 = vld [vmem:[%s2397_s1 + $0x8c] ss:$56 sps:$4 sm:$0xff]  }
  0x31   :  { %1731 = vmatpush3.bf16.msra.mxu0 %v1850_v0  ;;  %v1918_v0 = vld [vmem:[%s2396_s0 + $0x2f8] sm:$0xff]  }
  0x32   :  { %1732 = vmatprep.subr.bf16.mxu0 %v1853_v4  ;;  %270 = vperm.xlu0 %1781, %v260_v60   ;;  %v1919_v4 = vld [vmem:[%s2396_s0 + $0x2b8] sm:$0xff]  }
  0x33   :  { %1649 = vmatpush3.bf16.msra.mxu1 %v1827_v46  ;;  %v1900_v46 = vld [vmem:[%s2396_s0 + $0x2d0] sm:$0xff]  }
  0x34   :  { %1650 = vmatprep.subr.bf16.mxu1 %v1833_v49  ;;  %v1904_v49 = vld [vmem:[%s2397_s1 + $0x90] ss:$56 sps:$4 sm:$0xff]  }
  0x35   :  { %1733 = vmatpush3.bf16.msra.mxu0 %v1854_v5  ;;  %v1926_v5 = vld [vmem:[%s2397_s1 + $0x34] ss:$56 sps:$4 sm:$0xff]  }
  0x36   :  { %1734 = vmatprep.subr.bf16.mxu0 %v1857_v8  ;;  %v261_v8 = vld [vmem:[%s2398_s2 + $0x10] sm:$0xff] }
  0x37   :  { %1651 = vmatpush3.bf16.msra.mxu1 %v1836_v51  ;;  %v1906_v51 = vld [vmem:[%s2396_s0 + $0x2d8] sm:$0xff]   ;;  %275 = vperm.xlu1 %1782, %v261_v8  }
  0x38   :  { %1652 = vmatprep.subr.bf16.mxu1 %v1840_v55  ;;  %v1910_v55 = vld [vmem:[%s2396_s0 + $0x2a0] sm:$0xff]  }
  0x39   :  { %1735 = vmatpush3.bf16.msra.mxu0 %v1860_v10  ;;  %v1924_v10 = vld [vmem:[%s2397_s1 + $0x30] ss:$56 sps:$4 sm:$0xff]  }
  0x3a   :  { %1736 = vmatprep.subr.bf16.mxu0 %v1867_v16 }
  0x3b   :  { %1653 = vmatpush3.bf16.msra.mxu1 %v1841_v56  ;;  %v1912_v56 = vld [vmem:[%s2396_s0 + $0x2e8] sm:$0xff]  }
  0x3c   :  { %1654 = vmatprep.subr.bf16.mxu1 %v1844_v59  ;;  %v1913_v59 = vld [vmem:[%s2396_s0 + $0x2a8] sm:$0xff]  }
  0x3d   :  { %1737 = vmatpush3.bf16.msra.mxu0 %v1868_v17 }
  0x3e   :  { %1738 = vmatprep.subr.bf16.mxu0 %v1871_v20 }
  0x3f   :  { %1655 = vmatpush3.bf16.msra.mxu1 %v1845_v61  ;;  %v1915_v61 = vld [vmem:[%s2396_s0 + $0x2f0] sm:$0xff]  }
  0x40   :  { %1696 = vmatprep.subr.bf16.mxu1 %v1851_v2  ;;  %v1922_v2 = vld [vmem:[%s2397_s1 + $0x2c] ss:$56 sps:$4 sm:$0xff]  }
  0x41   :  { %1739 = vmatpush3.bf16.msra.mxu0 %v1872_v21 }
  0x42   :  { %1158 = vmatmul.mubr.bf16.vlgmr.msra.gmra.mrb[8].mxu1 %v1847_v62  ;;  %1370 = vmatprep.subr.bf16.mxu0 %v1933_v1  ;;  %v1914_v62 = vld [vmem:[%s2396_s0 + $0x348] sm:$0xff]  }
  0x43   :  { %1697 = vmatpush3.bf16.msra.mxu1 %v1852_v3  ;;  %1165 = vmatprep.mubr.bf16.mxu1 %v1858_v9  ;;  %v1917_v3 = vld [vmem:[%s2396_s0 + $0x350] sm:$0xff]  }
  0x44   :  { %1698 = vmatprep.subr.bf16.mxu1 %v1855_v6  ;;  %1305 = vmatmul.mubr.bf16.vlgmr.msra.gmra.mrb[8].mxu0 %v1875_v24  ;;  %v1920_v6 = vld [vmem:[%s2397_s1 + $0x28] ss:$56 sps:$4 sm:$0xff]   ;;  %v1927_v9 = vld [vmem:[%s2397_s1 + $0x9c] ss:$56 sps:$4 sm:$0xff]  }
  0x45   :  { %1371 = vmatpush1.bf16.msra.mxu0 %v1878_v26  ;;  %1312 = vmatprep.mubr.bf16.mxu0 %v1901_v47 }
  0x46   :  { %1372 = vmatprep.subr.bf16.mxu0 %v1933_v1 }
  0x47   :  { %1699 = vmatpush3.bf16.msra.mxu1 %v1856_v7  ;;  %v1923_v7 = vld [vmem:[%s2396_s0 + $0x358] sm:$0xff]  }
  0x48   :  { %1700 = vmatprep.subr.bf16.mxu1 %v1862_v12  ;;  %v1930_v12 = vld [vmem:[%s2397_s1 + $0xa4] ss:$56 sps:$4 sm:$0xff]  }
  0x49   :  { %1373 = vmatpush1.bf16.msra.mxu0 %v1881_v29 }
  0x4a   :  { %1166 = vmatmul.mubr.bf16.gmra.mrb[12].mxu1 %v1861_v11  ;;  %1374 = vmatprep.subr.bf16.mxu0 %v1933_v1  ;;  %v262_v11 = vld [vmem:[%s2398_s2 + $0x18] sm:$0xff] }
  0x4b   :  { %1701 = vmatpush3.bf16.msra.mxu1 %v1865_v14  ;;  %1255 = vmatprep.mubr.bf16.mxu1 %v1889_v36 }
  0x4c   :  { %1702 = vmatprep.subr.bf16.mxu1 %v1869_v18  ;;  %1313 = vmatmul.mubr.bf16.gmra.mrb[12].mxu0 %v1904_v49 }
  0x4d   :  { %1375 = vmatpush1.bf16.msra.mxu0 %v1884_v32  ;;  %1591 = vmatprep.mubr.msk.bf16.mxu0 %vm1069_vm0, %v1926_v5 }
  0x4e   :  { %1376 = vmatprep.subr.bf16.mxu0 %v1933_v1  ;;  %280 = vperm.xlu1 %1782, %v262_v11  }
  0x4f   :  { %1703 = vmatpush3.bf16.msra.mxu1 %v1870_v19 }
  0x50   :  { %1704 = vmatprep.subr.bf16.mxu1 %v1873_v22 }
  0x51   :  { %1377 = vmatpush1.bf16.msra.mxu0 %v1890_v37 }
  0x52   :  { %1378 = vmatprep.subr.bf16.mxu0 %v1933_v1 }
  0x53   :  { %1705 = vmatpush3.bf16.msra.mxu1 %v1874_v23 }
  0x54   :  { %1706 = vmatprep.subr.bf16.mxu1 %v1879_v27 }
  0x55   :  { %1379 = vmatpush1.bf16.msra.mxu0 %v1893_v40 }
  0x56   :  { %1380 = vmatprep.subr.bf16.mxu0 %v1933_v1 }
  0x57   :  { %1707 = vmatpush3.bf16.msra.mxu1 %v1880_v28 }
  0x58   :  { %1708 = vmatprep.subr.bf16.mxu1 %v1882_v30 }
  0x59   :  { %1381 = vmatpush1.bf16.msra.mxu0 %v1898_v44 }
  0x5a   :  { %1382 = vmatprep.subr.bf16.mxu0 %v1933_v1 }
  0x5b   :  { %1709 = vmatpush3.bf16.msra.mxu1 %v1883_v31 }
  0x5c   :  { %1710 = vmatprep.subr.bf16.mxu1 %v1885_v33 }
  0x5d   :  { %1383 = vmatpush1.bf16.msra.mxu0 %v1905_v50 }
  0x5e   :  { %1384 = vmatprep.subr.bf16.mxu0 %v1933_v1 }
  0x5f   :  { %1711 = vmatpush3.bf16.msra.mxu1 %v1886_v34 }
  0x60   :  { %1752 = vmatprep.subr.bf16.mxu1 %v1891_v38 }
  0x61   :  { %1385 = vmatpush1.bf16.msra.mxu0 %v1908_v54 }
  0x62   :  { %1256 = vmatmul.mubr.bf16.vlgmr.msra.gmra.mrb[16].mxu1 %v1887_v35  ;;  %1386 = vmatprep.subr.bf16.mxu0 %v1933_v1 }
  0x63   :  { %1753 = vmatpush3.bf16.msra.mxu1 %v1892_v39  ;;  %1263 = vmatprep.mubr.bf16.mxu1 %v1896_v43 }
  0x64   :  { %1754 = vmatprep.subr.bf16.mxu1 %v1894_v41 }
  0x65   :  { %1387 = vmatpush1.bf16.msra.mxu0 %v1911_v58 }
  0x66   :  { %1388 = vmatprep.subr.bf16.mxu0 %v1933_v1 }
  0x67   :  { %1755 = vmatpush3.bf16.msra.mxu1 %v1895_v42 }
  0x68   :  { %1756 = vmatprep.subr.bf16.mxu1 %v1900_v46 }
  0x69   :  { %1389 = vmatpush1.bf16.msra.mxu0 %v1914_v62 }
  0x6a   :  { %1264 = vmatmul.mubr.bf16.gmra.mrb[20].mxu1 %v1899_v45  ;;  %1390 = vmatprep.subr.bf16.mxu0 %v1933_v1 }
  0x6b   :  { %1757 = vmatpush3.bf16.msra.mxu1 %v1903_v48  ;;  %1353 = vmatprep.mubr.bf16.mxu1 %v1922_v2 }
  0x6c   :  { %1758 = vmatprep.subr.bf16.mxu1 %v1906_v51 }
  0x6d   :  { %1391 = vmatpush1.bf16.msra.mxu0 %v1917_v3 }
  0x6e   :  { %1392 = vmatprep.subr.bf16.mxu0 %v1933_v1  ;;  %v1929_v1 = vld [vmem:[%s2397_s1 + $0x98] ss:$56 sps:$4 sm:$0xff]  }
  0x6f   :  { %1759 = vmatpush3.bf16.msra.mxu1 %v1907_v52 }
  0x70   :  { %1760 = vmatprep.subr.bf16.mxu1 %v1909_v53 }
  0x71   :  { %1393 = vmatpush1.bf16.msra.mxu0 %v1923_v7 }
  0x73   :  { %1761 = vmatpush3.bf16.msra.mxu1 %v1910_v55 }
  0x74   :  { %1762 = vmatprep.subr.bf16.mxu1 %v1912_v56  ;;  %1403 = vmatmul.mubr.bf16.vlgmr.msra.gmra.mrb[16].mxu0 %v1924_v10 }
  0x75   :  { %1592 = vmatprep.mubr.msk.bf16.mxu0 %vm1069_vm0, %v1930_v12 }
  0x77   :  { %1763 = vmatpush3.bf16.msra.mxu1 %v1913_v59 }
  0x78   :  { %1764 = vmatprep.subr.bf16.mxu1 %v1915_v61 }
  0x7b   :  { %1765 = vmatpush3.bf16.msra.mxu1 %v1916_v63 }
  0x7c   :  { %1766 = vmatprep.subr.bf16.mxu1 %v1918_v0  ;;  %1411 = vmatmul.mubr.bf16.gmra.mrb[20].mxu0 %v1932_v13 }
  0x7f   :  { %1767 = vmatpush3.bf16.msra.mxu1 %v1919_v4 }
  0x82   :  { %1354 = vmatmul.mubr.bf16.vlgmr.msra.gmra.mrb[24].mxu1 %v1920_v6 }
  0x83   :  { %1361 = vmatprep.mubr.bf16.mxu1 %v1927_v9 }
  0x8a   :  { %1362 = vmatmul.mubr.bf16.gmra.mrb[28].mxu1 %v1929_v1 }
  0xad   :  { %v266_v32 = vpop.permute.xlu0 %265 }
  0xb1   :  { %v271_v34 = vpop.permute.xlu0 %270 }
  0xb6   :  { %v276_v37 = vpop.permute.xlu1 %275 }
  0xcd   :  { %v281_v46 = vpop.permute.xlu1 %280 }
  0xf5   :  { %v1628_v14 = vpop.f32.mrb[0].mxu1 }
  0xf6   :  { %v1629_v15 = vpop.f32.mrb[1].mxu1 }
  0xf7   :  { %v1630_v16 = vadd.f32 %v1629_v15, %v1628_v14  ;;  %v1631_v17 = vpop.f32.mrb[2].mxu1  ;;  %v1684_v20 = vpop.f32.mrb[0].mxu0 }
  0xf8   :  { %v1632_v18 = vpop.f32.mrb[3].mxu1  ;;  %v1685_v21 = vpop.f32.mrb[1].mxu0 }
  0xf9   :  { %v1633_v19 = vadd.f32 %v1632_v18, %v1631_v17  ;;  %v1686_v22 = vadd.f32 %v1685_v21, %v1684_v20  ;;  %v1687_v23 = vpop.f32.mrb[2].mxu0  ;;  %v1111_v36 = vadd.f32 %v1630_v16, %v266_v32 }
  0xfa   :  { %v1688_v24 = vpop.f32.mrb[3].mxu0 }
  0xfb   :  { %v1689_v26 = vadd.f32 %v1688_v24, %v1687_v23  ;;  %v1114_v41 = vadd.f32 %v1633_v19, %v271_v34 }
  0xfd   :  { %v1634_v25 = vpop.f32.mrb[4].mxu1 }
  0xfe   :  { %v1635_v27 = vpop.f32.mrb[5].mxu1 }
  0xff   :  { %v1636_v28 = vadd.f32 %v1635_v27, %v1634_v25  ;;  %v1637_v29 = vpop.f32.mrb[6].mxu1  ;;  %v1690_v50 = vpop.f32.mrb[4].mxu0 }
 0x100   :  { %v1638_v30 = vpop.f32.mrb[7].mxu1  ;;  %v1691_v54 = vpop.f32.mrb[5].mxu0 }
 0x101   :  { %v1639_v31 = vadd.f32 %v1638_v30, %v1637_v29  ;;  %v1119_v51 = vadd.f32 %v1636_v28, %v276_v37  ;;  %v1692_v56 = vadd.f32 %v1691_v54, %v1690_v50  ;;  %v1693_v57 = vpop.f32.mrb[6].mxu0 }
 0x102   :  { %v1694_v61 = vpop.f32.mrb[7].mxu0 }
 0x103   :  { %v1122_v58 = vadd.f32 %v1639_v31, %v281_v46  ;;  %v1695_v62 = vadd.f32 %v1694_v61, %v1693_v57 }
 0x115   :  { %v1656_v33 = vpop.f32.mrb[8].mxu1 }
 0x116   :  { %v1657_v35 = vpop.f32.mrb[9].mxu1 }
 0x117   :  { %v1658_v38 = vadd.f32 %v1657_v35, %v1656_v33  ;;  %v1659_v39 = vpop.f32.mrb[10].mxu1  ;;  %v1740_v3 = vpop.f32.mrb[8].mxu0 }
 0x118   :  { %v1660_v40 = vpop.f32.mrb[11].mxu1  ;;  %v1741_v4 = vpop.f32.mrb[9].mxu0 }
 0x119   :  { %v1160_v42 = vadd.f32 %v1658_v38, %v1111_v36  ;;  %v1661_v43 = vadd.f32 %v1660_v40, %v1659_v39  ;;  %v1742_v5 = vadd.f32 %v1741_v4, %v1740_v3  ;;  %v1743_v6 = vpop.f32.mrb[10].mxu0 }
 0x11a   :  { %v1744_v7 = vpop.f32.mrb[11].mxu0 }
 0x11b   :  { %v1163_v44 = vadd.f32 %v1661_v43, %v1114_v41  ;;  %v1209_v45 = vadd.f32 %v1686_v22, %v1160_v42  ;;  %v1745_v8 = vadd.f32 %v1744_v7, %v1743_v6 }
 0x11d   :  { %v1662_v47 = vpop.f32.mrb[12].mxu1  ;;  %v1212_v48 = vadd.f32 %v1689_v26, %v1163_v44 }
 0x11e   :  { %v1663_v49 = vpop.f32.mrb[13].mxu1 }
 0x11f   :  { %v1664_v52 = vadd.f32 %v1663_v49, %v1662_v47  ;;  %v1665_v53 = vpop.f32.mrb[14].mxu1  ;;  %v1746_v20 = vpop.f32.mrb[12].mxu0 }
 0x120   :  { %v1666_v55 = vpop.f32.mrb[15].mxu1  ;;  %v1747_v23 = vpop.f32.mrb[13].mxu0 }
 0x121   :  { %v1168_v59 = vadd.f32 %v1664_v52, %v1119_v51  ;;  %v1667_v60 = vadd.f32 %v1666_v55, %v1665_v53  ;;  %v1748_v25 = vadd.f32 %v1747_v23, %v1746_v20  ;;  %v1749_v26 = vpop.f32.mrb[14].mxu0 }
 0x122   :  { %v1750_v29 = vpop.f32.mrb[15].mxu0 }
 0x123   :  { %v1171_v63 = vadd.f32 %v1667_v60, %v1122_v58  ;;  %v1217_v0 = vadd.f32 %v1692_v56, %v1168_v59  ;;  %v1751_v30 = vadd.f32 %v1750_v29, %v1749_v26 }
 0x125   :  { %v1220_v2 = vadd.f32 %v1695_v62, %v1171_v63 }
 0x135   :  { %v1712_v9 = vpop.f32.mrb[16].mxu1 }
 0x136   :  { %v1713_v10 = vpop.f32.mrb[17].mxu1 }
 0x137   :  { %v1714_v11 = vadd.f32 %v1713_v10, %v1712_v9  ;;  %v1715_v12 = vpop.f32.mrb[18].mxu1 }
 0x138   :  { %v1716_v1 = vpop.f32.mrb[19].mxu1 }
 0x139   :  { %v1258_v13 = vadd.f32 %v1714_v11, %v1209_v45  ;;  %v1717_v14 = vadd.f32 %v1716_v1, %v1715_v12 }
 0x13b   :  { %v1261_v15 = vadd.f32 %v1717_v14, %v1212_v48  ;;  %v1307_v16 = vadd.f32 %v1742_v5, %v1258_v13 }
 0x13d   :  { %v1718_v17 = vpop.f32.mrb[20].mxu1  ;;  %v1310_v18 = vadd.f32 %v1745_v8, %v1261_v15 }
 0x13e   :  { %v1719_v19 = vpop.f32.mrb[21].mxu1 }
 0x13f   :  { %v1720_v21 = vadd.f32 %v1719_v19, %v1718_v17  ;;  %v1721_v22 = vpop.f32.mrb[22].mxu1 }
 0x140   :  { %v1722_v24 = vpop.f32.mrb[23].mxu1 }
 0x141   :  { %v1266_v27 = vadd.f32 %v1720_v21, %v1217_v0  ;;  %v1723_v28 = vadd.f32 %v1722_v24, %v1721_v22 }
 0x143   :  { %v1269_v31 = vadd.f32 %v1723_v28, %v1220_v2  ;;  %v1315_v32 = vadd.f32 %v1748_v25, %v1266_v27 }
 0x145   :  { %v1318_v33 = vadd.f32 %v1751_v30, %v1269_v31 }
 0x147   :  { %v1404_v38 = vpop.f32.mrb[16].mxu0 }
 0x148   :  { %v1406_v42 = vpop.f32.mrb[17].mxu0 }
 0x149   :  { %v1407_v43 = vpop.f32.mrb[18].mxu0 }
 0x14a   :  { %v1409_v46 = vpop.f32.mrb[19].mxu0 }
 0x14f   :  { %v1412_v54 = vpop.f32.mrb[20].mxu0 }
 0x150   :  { %v1414_v60 = vpop.f32.mrb[21].mxu0 }
 0x151   :  { %v1415_v62 = vpop.f32.mrb[22].mxu0 }
 0x152   :  { %v1417_v2 = vpop.f32.mrb[23].mxu0 }
 0x155   :  { %v1768_v34 = vpop.f32.mrb[24].mxu1 }
 0x156   :  { %v1769_v35 = vpop.f32.mrb[25].mxu1 }
 0x157   :  { %v1770_v36 = vadd.f32 %v1769_v35, %v1768_v34  ;;  %v1771_v37 = vpop.f32.mrb[26].mxu1 }
 0x158   :  { %v1772_v39 = vpop.f32.mrb[27].mxu1 }
 0x159   :  { %v1356_v40 = vadd.f32 %v1770_v36, %v1307_v16  ;;  %v1773_v41 = vadd.f32 %v1772_v39, %v1771_v37 }
 0x15b   :  { %v1405_v44 = vadd.f32 %v1404_v38, %v1356_v40  ;;  %v1359_v45 = vadd.f32 %v1773_v41, %v1310_v18 }
 0x15d   :  { %v1423_v47 = vmul.f32 0.01, %v1405_v44  ;;  %v1408_v48 = vadd.f32 %v1407_v43, %v1359_v45  ;;  %v1774_v49 = vpop.f32.mrb[28].mxu1  ;;  %vm1419_vm1 = vcmp.ge.f32.partialorder %v1405_v44, 0.0 }
 0x15e   :  { %v1775_v50 = vpop.f32.mrb[29].mxu1 }
 0x15f   :  { %vm1420_vm2 = vcmp.ge.f32.partialorder %v1408_v48, 0.0  ;;  %v1424_v51 = vmul.f32 0.01, %v1408_v48  ;;  %v1776_v52 = vadd.f32 %v1775_v50, %v1774_v49  ;;  %v1777_v53 = vpop.f32.mrb[30].mxu1  ;;  %v1427_v56 = vsel %vm1419_vm1, %v1405_v44, %v1423_v47 }
 0x160   :  { %v1778_v55 = vpop.f32.mrb[31].mxu1 }
 0x161   :  { %v1428_v57 = vsel %vm1420_vm2, %v1408_v48, %v1424_v51  ;;  %v1364_v58 = vadd.f32 %v1776_v52, %v1315_v32  ;;  %v1779_v59 = vadd.f32 %v1778_v55, %v1777_v53 }
 0x162   :  { %v1604_v61 = vpack.c.bf16 %v1428_v57, %v1427_v56 }
 0x163   :  { %v1413_v63 = vadd.f32 %v1412_v54, %v1364_v58  ;;  %v1367_v0 = vadd.f32 %v1779_v59, %v1318_v33 }
 0x164   :  { %1605 = vst [vmem:[%s2399_s3] sm:$0xff] %v1604_v61  }
 0x165   :  { %v1425_v3 = vmul.f32 0.01, %v1413_v63  ;;  %v1416_v4 = vadd.f32 %v1415_v62, %v1367_v0  ;;  %vm1421_vm3 = vcmp.ge.f32.partialorder %v1413_v63, 0.0 }
 0x167   :  { %vm1422_vm4 = vcmp.ge.f32.partialorder %v1416_v4, 0.0  ;;  %v1426_v5 = vmul.f32 0.01, %v1416_v4  ;;  %v1429_v6 = vsel %vm1421_vm3, %v1413_v63, %v1425_v3 }
 0x169   :  { %v1430_v7 = vsel %vm1422_vm4, %v1416_v4, %v1426_v5 }
 0x16a   :  { %v1609_v8 = vpack.c.bf16 %v1430_v7, %v1429_v6 }
 0x16c   :  { %1611 = vst [vmem:[%s2399_s3 + $0x8] sm:$0xff] %v1609_v8  }

// kernel: downup_forward.31
= control target key start
LH: loop header
LB: loop body
LE: loop exit
PB: predicated region body
PF: predicated region fallthrough
CT: control target
= control target key end

     0   :  { %v918_v1 = vmov 0   ;;  %v919_v39 = vmov 0.0   ;;  %vm920_vm0 = vmmov 0   ;;  %vm502_vm1 = vcmask 785408   ;;  %s1133_s0 = inlined_call_operand.vmem [shape: bf16[864,128], index: 0, kind: input, shape index: {}]   ;;  %s1134_s1 = inlined_call_operand.vmem [shape: bf16[16,864], index: 1, kind: input, shape index: {}]   ;;  %s1135_s2 = inlined_call_operand.vmem [shape: f32[16,1], index: 2, kind: input, shape index: {}]   ;;  %s1136_s3 = inlined_call_operand.vmem [shape: bf16[16,128], index: 3, kind: output, shape index: {}]  }
   0x1   :  { %v854_v0 = vld [vmem:[%s1133_s0 + $0x40] sm:$0xff]   ;;  %853 = vset.pattern.permute.xlu0 %v918_v1  ;;  %v858_v5 = vld [vmem:[%s1133_s0 + $0x48] sm:$0xff]   ;;  %v862_v9 = vld [vmem:[%s1133_s0 + $0x50] sm:$0xff]  }
   0x2   :  { %v855_v2 = vld [vmem:[%s1133_s0] sm:$0xff]   ;;  %761 = vmatprep.subr.bf16.mxu0 %v854_v0  ;;  %v859_v6 = vld [vmem:[%s1133_s0 + $0x8] sm:$0xff]   ;;  %v863_v10 = vld [vmem:[%s1133_s0 + $0x10] sm:$0xff]  }
   0x3   :  { %v856_v3 = vld [vmem:[%s1133_s0 + $0xc0] sm:$0xff]   ;;  %762 = vmatpush3.bf16.msra.mxu0 %v855_v2  ;;  %v860_v7 = vld [vmem:[%s1133_s0 + $0xc8] sm:$0xff]   ;;  %v864_v11 = vld [vmem:[%s1133_s0 + $0xd0] sm:$0xff]  }
   0x4   :  { %v857_v4 = vld [vmem:[%s1133_s0 + $0x80] sm:$0xff]   ;;  %783 = vmatprep.subr.bf16.mxu1 %v856_v3  ;;  %763 = vmatprep.subr.bf16.mxu0 %v858_v5  ;;  %v861_v8 = vld [vmem:[%s1133_s0 + $0x88] sm:$0xff]   ;;  %v865_v12 = vld [vmem:[%s1133_s0 + $0x90] sm:$0xff]  }
   0x5   :  { %784 = vmatpush3.bf16.msra.mxu1 %v857_v4  ;;  %v866_v13 = vld [vmem:[%s1133_s0 + $0x58] sm:$0xff]   ;;  %v870_v17 = vld [vmem:[%s1133_s0 + $0x60] sm:$0xff]   ;;  %v874_v21 = vld [vmem:[%s1133_s0 + $0x68] sm:$0xff]  }
   0x6   :  { %785 = vmatprep.subr.bf16.mxu1 %v860_v7  ;;  %v867_v14 = vld [vmem:[%s1133_s0 + $0x18] sm:$0xff]   ;;  %v871_v18 = vld [vmem:[%s1133_s0 + $0x20] sm:$0xff]   ;;  %v875_v22 = vld [vmem:[%s1133_s0 + $0x28] sm:$0xff]  }
   0x7   :  { %764 = vmatpush3.bf16.msra.mxu0 %v859_v6  ;;  %v868_v15 = vld [vmem:[%s1133_s0 + $0xd8] sm:$0xff]   ;;  %v872_v19 = vld [vmem:[%s1133_s0 + $0xe0] sm:$0xff]   ;;  %v876_v23 = vld [vmem:[%s1133_s0 + $0xe8] sm:$0xff]  }
   0x8   :  { %765 = vmatprep.subr.bf16.mxu0 %v862_v9  ;;  %v869_v16 = vld [vmem:[%s1133_s0 + $0x98] sm:$0xff]   ;;  %v873_v20 = vld [vmem:[%s1133_s0 + $0xa0] sm:$0xff]   ;;  %v877_v24 = vld [vmem:[%s1133_s0 + $0xa8] sm:$0xff]  }
   0x9   :  { %786 = vmatpush3.bf16.msra.mxu1 %v861_v8  ;;  %v878_v25 = vld [vmem:[%s1133_s0 + $0x70] sm:$0xff]   ;;  %v882_v29 = vld [vmem:[%s1133_s0 + $0x78] sm:$0xff]   ;;  %v887_v33 = vld [vmem:[%s1134_s1 + $0x4] ss:$28 sps:$4 sm:$0xff]  }
   0xa   :  { %787 = vmatprep.subr.bf16.mxu1 %v864_v11  ;;  %v879_v26 = vld [vmem:[%s1133_s0 + $0x30] sm:$0xff]   ;;  %v883_v30 = vld [vmem:[%s1133_s0 + $0x38] sm:$0xff]   ;;  %538 = vmatprep.mubr.bf16.mxu0 %v887_v33  ;;  %v889_v35 = vld [vmem:[%s1133_s0 + $0x140] sm:$0xff]  }
   0xb   :  { %766 = vmatpush3.bf16.msra.mxu0 %v863_v10  ;;  %v880_v27 = vld [vmem:[%s1133_s0 + $0xf0] sm:$0xff]   ;;  %v884_v31 = vld [vmem:[%s1133_s0 + $0xf8] sm:$0xff]   ;;  %v890_v36 = vld [vmem:[%s1134_s1 + $0x8] ss:$28 sps:$4 sm:$0xff]  }
   0xc   :  { %767 = vmatprep.subr.bf16.mxu0 %v866_v13  ;;  %v881_v28 = vld [vmem:[%s1133_s0 + $0xb0] sm:$0xff]   ;;  %v885_v32 = vld [vmem:[%s1134_s1] ss:$28 sps:$4 sm:$0xff]   ;;  %v892_v37 = vld [vmem:[%s1134_s1 + $0xc] ss:$28 sps:$4 sm:$0xff]  }
   0xd   :  { %788 = vmatpush3.bf16.msra.mxu1 %v865_v12  ;;  %v888_v34 = vld [vmem:[%s1133_s0 + $0xb8] sm:$0xff]   ;;  %v893_v38 = vld [vmem:[%s1133_s0 + $0x100] sm:$0xff]   ;;  %579 = vmatprep.mubr.bf16.mxu1 %v892_v37  ;;  %v894_v40 = vld [vmem:[%s1133_s0 + $0x148] sm:$0xff]  }
   0xe   :  { %789 = vmatprep.subr.bf16.mxu1 %v868_v15  ;;  %v895_v41 = vld [vmem:[%s1133_s0 + $0x108] sm:$0xff]   ;;  %v896_v42 = vld [vmem:[%s1133_s0 + $0x150] sm:$0xff]   ;;  %v898_v43 = vld [vmem:[%s1133_s0 + $0x180] sm:$0xff]  }
   0xf   :  { %768 = vmatpush3.bf16.msra.mxu0 %v867_v14  ;;  %v897_v44 = vld [vmem:[%s1133_s0 + $0x110] sm:$0xff]   ;;  %v899_v45 = vld [vmem:[%s1133_s0 + $0x158] sm:$0xff]   ;;  %v901_v46 = vld [vmem:[%s1133_s0 + $0x188] sm:$0xff]  }
  0x10   :  { %769 = vmatprep.subr.bf16.mxu0 %v870_v17  ;;  %v900_v47 = vld [vmem:[%s1133_s0 + $0x118] sm:$0xff]   ;;  %v902_v48 = vld [vmem:[%s1133_s0 + $0x160] sm:$0xff]   ;;  %v904_v49 = vld [vmem:[%s1133_s0 + $0x190] sm:$0xff]  }
  0x11   :  { %790 = vmatpush3.bf16.msra.mxu1 %v869_v16  ;;  %v903_v50 = vld [vmem:[%s1133_s0 + $0x120] sm:$0xff]   ;;  %v905_v51 = vld [vmem:[%s1133_s0 + $0x168] sm:$0xff]   ;;  %v907_v52 = vld [vmem:[%s1133_s0 + $0x198] sm:$0xff]  }
  0x12   :  { %791 = vmatprep.subr.bf16.mxu1 %v872_v19  ;;  %v906_v53 = vld [vmem:[%s1133_s0 + $0x128] sm:$0xff]   ;;  %v908_v54 = vld [vmem:[%s1133_s0 + $0x170] sm:$0xff]   ;;  %v910_v55 = vld [vmem:[%s1133_s0 + $0x1a0] sm:$0xff]  }
  0x13   :  { %770 = vmatpush3.bf16.msra.mxu0 %v871_v18  ;;  %v915_v56 = vld [vmem:[%s1134_s1 + $0x14] ss:$28 sps:$4 sm:$0xff]   ;;  %v911_v58 = vld [vmem:[%s1133_s0 + $0x178] sm:$0xff]   ;;  %v916_v59 = vld [vmem:[%s1133_s0 + $0x1a8] sm:$0xff]  }
  0x14   :  { %771 = vmatprep.subr.bf16.mxu0 %v874_v21  ;;  %v909_v57 = vld [vmem:[%s1133_s0 + $0x130] sm:$0xff]   ;;  %v131_v60 = vld [vmem:[%s1135_s2] sm:$0xff]  ;;  %v132_v61 = vld [vmem:[%s1135_s2 + $0x8] sm:$0xff] }
  0x15   :  { %792 = vmatpush3.bf16.msra.mxu1 %v873_v20  ;;  %135 = vperm.xlu0 %853, %v131_v60   ;;  %v912_v62 = vld [vmem:[%s1133_s0 + $0x138] sm:$0xff]   ;;  %v913_v0 = vld [vmem:[%s1134_s1 + $0x10] ss:$28 sps:$4 sm:$0xff]  }
  0x16   :  { %793 = vmatprep.subr.bf16.mxu1 %v876_v23  ;;  %v917_v63 = vld [vmem:[%s1134_s1 + $0x18] ss:$28 sps:$4 sm:$0xff]  }
  0x17   :  { %772 = vmatpush3.bf16.msra.mxu0 %v875_v22 }
  0x18   :  { %773 = vmatprep.subr.bf16.mxu0 %v878_v25 }
  0x19   :  { %794 = vmatpush3.bf16.msra.mxu1 %v877_v24  ;;  %140 = vperm.xlu0 %853, %v132_v61  }
  0x1a   :  { %795 = vmatprep.subr.bf16.mxu1 %v880_v27 }
  0x1b   :  { %774 = vmatpush3.bf16.msra.mxu0 %v879_v26 }
  0x1c   :  { %775 = vmatprep.subr.bf16.mxu0 %v882_v29 }
  0x1d   :  { %796 = vmatpush3.bf16.msra.mxu1 %v881_v28 }
  0x1e   :  { %797 = vmatprep.subr.bf16.mxu1 %v884_v31 }
  0x1f   :  { %776 = vmatpush3.bf16.msra.mxu0 %v883_v30 }
  0x20   :  { %805 = vmatprep.subr.bf16.mxu0 %v889_v35 }
  0x21   :  { %798 = vmatpush3.bf16.msra.mxu1 %v888_v34 }
  0x22   :  { %539 = vmatmul.mubr.bf16.vlgmr.msra.gmra.mrb[0].mxu0 %v885_v32  ;;  %834 = vmatprep.subr.bf16.mxu1 %v919_v39 }
  0x23   :  { %806 = vmatpush3.bf16.msra.mxu0 %v893_v38  ;;  %620 = vmatprep.mubr.bf16.mxu0 %v915_v56 }
  0x24   :  { %580 = vmatmul.mubr.bf16.vlgmr.msra.gmra.mrb[0].mxu1 %v890_v36  ;;  %807 = vmatprep.subr.bf16.mxu0 %v894_v40 }
  0x25   :  { %846 = vmatprep.mubr.msk.bf16.mxu1 %vm920_vm0, %v919_v39  ;;  %835 = vmatpush3.bf16.msra.mxu1 %v898_v43 }
  0x26   :  { %836 = vmatprep.subr.bf16.mxu1 %v919_v39 }
  0x27   :  { %808 = vmatpush3.bf16.msra.mxu0 %v895_v41 }
  0x28   :  { %809 = vmatprep.subr.bf16.mxu0 %v896_v42 }
  0x29   :  { %837 = vmatpush3.bf16.msra.mxu1 %v901_v46 }
  0x2a   :  { %838 = vmatprep.subr.bf16.mxu1 %v919_v39 }
  0x2b   :  { %810 = vmatpush3.bf16.msra.mxu0 %v897_v44 }
  0x2c   :  { %811 = vmatprep.subr.bf16.mxu0 %v899_v45 }
  0x2d   :  { %839 = vmatpush3.bf16.msra.mxu1 %v904_v49 }
  0x2e   :  { %840 = vmatprep.subr.bf16.mxu1 %v919_v39 }
  0x2f   :  { %812 = vmatpush3.bf16.msra.mxu0 %v900_v47 }
  0x30   :  { %813 = vmatprep.subr.bf16.mxu0 %v902_v48 }
  0x31   :  { %841 = vmatpush3.bf16.msra.mxu1 %v907_v52 }
  0x32   :  { %842 = vmatprep.subr.bf16.mxu1 %v919_v39 }
  0x33   :  { %814 = vmatpush3.bf16.msra.mxu0 %v903_v50 }
  0x34   :  { %815 = vmatprep.subr.bf16.mxu0 %v905_v51 }
  0x35   :  { %843 = vmatpush3.bf16.msra.mxu1 %v910_v55 }
  0x36   :  { %844 = vmatprep.subr.bf16.mxu1 %v919_v39 }
  0x37   :  { %816 = vmatpush3.bf16.msra.mxu0 %v906_v53 }
  0x38   :  { %817 = vmatprep.subr.bf16.mxu0 %v908_v54 }
  0x39   :  { %845 = vmatpush3.bf16.msra.mxu1 %v916_v59 }
  0x3b   :  { %818 = vmatpush3.bf16.msra.mxu0 %v909_v57 }
  0x3c   :  { %819 = vmatprep.subr.bf16.mxu0 %v911_v58  ;;  %847 = vmatmul.mubr.msk.bf16.vlgmr.msra.gmra.mrb[4].mxu1 %vm502_vm1, %v917_v63 }
  0x3f   :  { %820 = vmatpush3.bf16.msra.mxu0 %v912_v62 }
  0x42   :  { %621 = vmatmul.mubr.bf16.vlgmr.msra.gmra.mrb[4].mxu0 %v913_v0 }
  0x94   :  { %v136_v1 = vpop.permute.xlu0 %135 }
  0x98   :  { %v141_v6 = vpop.permute.xlu0 %140 }
  0xf5   :  { %v777_v2 = vpop.f32.mrb[0].mxu0 }
  0xf6   :  { %v778_v3 = vpop.f32.mrb[1].mxu0 }
  0xf7   :  { %v779_v4 = vadd.f32 %v778_v3, %v777_v2  ;;  %v780_v5 = vpop.f32.mrb[2].mxu0  ;;  %v799_v7 = vpop.f32.mrb[0].mxu1 }
  0xf8   :  { %v781_v8 = vpop.f32.mrb[3].mxu0  ;;  %v800_v11 = vpop.f32.mrb[1].mxu1 }
  0xf9   :  { %v541_v9 = vadd.f32 %v779_v4, %v136_v1  ;;  %v782_v10 = vadd.f32 %v781_v8, %v780_v5  ;;  %v801_v12 = vadd.f32 %v800_v11, %v799_v7  ;;  %v802_v13 = vpop.f32.mrb[2].mxu1 }
  0xfa   :  { %v803_v15 = vpop.f32.mrb[3].mxu1 }
  0xfb   :  { %v544_v14 = vadd.f32 %v782_v10, %v141_v6  ;;  %v582_v16 = vadd.f32 %v801_v12, %v541_v9  ;;  %v804_v17 = vadd.f32 %v803_v15, %v802_v13 }
  0xfd   :  { %v585_v18 = vadd.f32 %v804_v17, %v544_v14 }
 0x10f   :  { %v663_v19 = vpop.f32.mrb[4].mxu1 }
 0x110   :  { %v848_v20 = vpop.f32.mrb[5].mxu1 }
 0x111   :  { %v666_v21 = vpop.f32.mrb[6].mxu1 }
 0x112   :  { %v849_v23 = vpop.f32.mrb[7].mxu1 }
 0x115   :  { %v821_v22 = vpop.f32.mrb[4].mxu0 }
 0x116   :  { %v822_v24 = vpop.f32.mrb[5].mxu0 }
 0x117   :  { %v823_v25 = vadd.f32 %v822_v24, %v821_v22  ;;  %v824_v26 = vpop.f32.mrb[6].mxu0 }
 0x118   :  { %v825_v27 = vpop.f32.mrb[7].mxu0 }
 0x119   :  { %v623_v28 = vadd.f32 %v823_v25, %v582_v16  ;;  %v826_v29 = vadd.f32 %v825_v27, %v824_v26 }
 0x11b   :  { %v664_v30 = vadd.f32 %v663_v19, %v623_v28  ;;  %v626_v31 = vadd.f32 %v826_v29, %v585_v18 }
 0x11d   :  { %v672_v32 = vmul.f32 0.01, %v664_v30  ;;  %v667_v33 = vadd.f32 %v666_v21, %v626_v31  ;;  %vm670_vm2 = vcmp.ge.f32.partialorder %v664_v30, 0.0 }
 0x11f   :  { %vm671_vm3 = vcmp.ge.f32.partialorder %v667_v33, 0.0  ;;  %v673_v34 = vmul.f32 0.01, %v667_v33  ;;  %v674_v35 = vsel %vm670_vm2, %v664_v30, %v672_v32 }
 0x121   :  { %v675_v36 = vsel %vm671_vm3, %v667_v33, %v673_v34 }
 0x122   :  { %v759_v37 = vpack.c.bf16 %v675_v36, %v674_v35 }
 0x124   :  { %760 = vst [vmem:[%s1136_s3] sm:$0xff] %v759_v37  }

// kernel: downup_forward.33
= control target key start
LH: loop header
LB: loop body
LE: loop exit
PB: predicated region body
PF: predicated region fallthrough
CT: control target
= control target key end

     0   :  { %v1184_v1 = vmov 0   ;;  %vm684_vm0 = vcmask 392192   ;;  %s1550_s0 = inlined_call_operand.vmem [shape: bf16[432,512], index: 0, kind: input, shape index: {}]   ;;  %s1551_s1 = inlined_call_operand.vmem [shape: bf16[8,432], index: 1, kind: input, shape index: {}]   ;;  %s1552_s2 = inlined_call_operand.vmem [shape: f32[8,1], index: 2, kind: input, shape index: {}]   ;;  %s1553_s3 = inlined_call_operand.vmem [shape: bf16[8,512], index: 3, kind: output, shape index: {}]  }
   0x1   :  { %v1018_v0 = vld [vmem:[%s1550_s0 + $0x4] ss:$16 sps:$4 sm:$0xff]   ;;  %1017 = vset.pattern.permute.xlu0 %v1184_v1  ;;  %v1020_v2 = vld [vmem:[%s1550_s0 + $0xc] ss:$16 sps:$4 sm:$0xff]   ;;  %v1022_v3 = vld [vmem:[%s1550_s0] ss:$16 sps:$4 sm:$0xff]  }
   0x2   :  { %688 = vmatprep.subr.bf16.mxu0 %v1018_v0  ;;  %v1023_v4 = vld [vmem:[%s1550_s0 + $0x8] ss:$16 sps:$4 sm:$0xff]   ;;  %770 = vmatprep.subr.bf16.mxu1 %v1020_v2  ;;  %v1024_v5 = vld [vmem:[%s1550_s0 + $0x24] ss:$16 sps:$4 sm:$0xff]   ;;  %v1026_v6 = vld [vmem:[%s1550_s0 + $0x2c] ss:$16 sps:$4 sm:$0xff]  }
   0x3   :  { %689 = vmatpush1.bf16.msra.mxu0 %v1022_v3  ;;  %771 = vmatpush1.bf16.msra.mxu1 %v1023_v4  ;;  %v1028_v7 = vld [vmem:[%s1550_s0 + $0x20] ss:$16 sps:$4 sm:$0xff]   ;;  %v1029_v8 = vld [vmem:[%s1550_s0 + $0x28] ss:$16 sps:$4 sm:$0xff]   ;;  %v1030_v9 = vld [vmem:[%s1550_s0 + $0x44] ss:$16 sps:$4 sm:$0xff]  }
   0x4   :  { %690 = vmatprep.subr.bf16.mxu0 %v1024_v5  ;;  %772 = vmatprep.subr.bf16.mxu1 %v1026_v6  ;;  %v1032_v10 = vld [vmem:[%s1550_s0 + $0x4c] ss:$16 sps:$4 sm:$0xff]   ;;  %v1034_v11 = vld [vmem:[%s1550_s0 + $0x40] ss:$16 sps:$4 sm:$0xff]   ;;  %v1035_v12 = vld [vmem:[%s1550_s0 + $0x48] ss:$16 sps:$4 sm:$0xff]  }
   0x5   :  { %v1036_v13 = vld [vmem:[%s1550_s0 + $0x64] ss:$16 sps:$4 sm:$0xff]   ;;  %v1038_v14 = vld [vmem:[%s1550_s0 + $0x6c] ss:$16 sps:$4 sm:$0xff]   ;;  %v1040_v15 = vld [vmem:[%s1550_s0 + $0x60] ss:$16 sps:$4 sm:$0xff]  }
   0x6   :  { %v1041_v16 = vld [vmem:[%s1550_s0 + $0x68] ss:$16 sps:$4 sm:$0xff]   ;;  %v1042_v17 = vld [vmem:[%s1550_s0 + $0x84] ss:$16 sps:$4 sm:$0xff]   ;;  %v1044_v18 = vld [vmem:[%s1550_s0 + $0x8c] ss:$16 sps:$4 sm:$0xff]  }
   0x7   :  { %691 = vmatpush1.bf16.msra.mxu0 %v1028_v7  ;;  %773 = vmatpush1.bf16.msra.mxu1 %v1029_v8  ;;  %v1046_v19 = vld [vmem:[%s1550_s0 + $0x80] ss:$16 sps:$4 sm:$0xff]   ;;  %v1047_v20 = vld [vmem:[%s1550_s0 + $0x88] ss:$16 sps:$4 sm:$0xff]   ;;  %v1048_v21 = vld [vmem:[%s1550_s0 + $0xa4] ss:$16 sps:$4 sm:$0xff]  }
   0x8   :  { %692 = vmatprep.subr.bf16.mxu0 %v1030_v9  ;;  %774 = vmatprep.subr.bf16.mxu1 %v1032_v10  ;;  %v1050_v22 = vld [vmem:[%s1550_s0 + $0xac] ss:$16 sps:$4 sm:$0xff]   ;;  %v1052_v23 = vld [vmem:[%s1550_s0 + $0xa0] ss:$16 sps:$4 sm:$0xff]   ;;  %v1053_v24 = vld [vmem:[%s1550_s0 + $0xa8] ss:$16 sps:$4 sm:$0xff]  }
   0x9   :  { %v1054_v25 = vld [vmem:[%s1550_s0 + $0xc4] ss:$16 sps:$4 sm:$0xff]   ;;  %v1056_v26 = vld [vmem:[%s1550_s0 + $0xcc] ss:$16 sps:$4 sm:$0xff]   ;;  %v1058_v27 = vld [vmem:[%s1550_s0 + $0xc0] ss:$16 sps:$4 sm:$0xff]  }
   0xa   :  { %v1059_v28 = vld [vmem:[%s1550_s0 + $0xc8] ss:$16 sps:$4 sm:$0xff]   ;;  %v1060_v29 = vld [vmem:[%s1550_s0 + $0xe4] ss:$16 sps:$4 sm:$0xff]   ;;  %v1062_v30 = vld [vmem:[%s1550_s0 + $0xec] ss:$16 sps:$4 sm:$0xff]  }
   0xb   :  { %693 = vmatpush1.bf16.msra.mxu0 %v1034_v11  ;;  %775 = vmatpush1.bf16.msra.mxu1 %v1035_v12  ;;  %v1064_v31 = vld [vmem:[%s1550_s0 + $0xe0] ss:$16 sps:$4 sm:$0xff]   ;;  %v1065_v32 = vld [vmem:[%s1550_s0 + $0xe8] ss:$16 sps:$4 sm:$0xff]   ;;  %v1066_v33 = vld [vmem:[%s1550_s0 + $0x104] ss:$16 sps:$4 sm:$0xff]  }
   0xc   :  { %694 = vmatprep.subr.bf16.mxu0 %v1036_v13  ;;  %776 = vmatprep.subr.bf16.mxu1 %v1038_v14  ;;  %v1068_v34 = vld [vmem:[%s1550_s0 + $0x10c] ss:$16 sps:$4 sm:$0xff]   ;;  %v1070_v35 = vld [vmem:[%s1550_s0 + $0x100] ss:$16 sps:$4 sm:$0xff]   ;;  %v1071_v36 = vld [vmem:[%s1550_s0 + $0x108] ss:$16 sps:$4 sm:$0xff]  }
   0xd   :  { %v1072_v37 = vld [vmem:[%s1550_s0 + $0x124] ss:$16 sps:$4 sm:$0xff]   ;;  %v1074_v38 = vld [vmem:[%s1550_s0 + $0x12c] ss:$16 sps:$4 sm:$0xff]   ;;  %v1076_v39 = vld [vmem:[%s1550_s0 + $0x120] ss:$16 sps:$4 sm:$0xff]  }
   0xe   :  { %v1077_v40 = vld [vmem:[%s1550_s0 + $0x128] ss:$16 sps:$4 sm:$0xff]   ;;  %v1078_v41 = vld [vmem:[%s1550_s0 + $0x144] ss:$16 sps:$4 sm:$0xff]   ;;  %v1080_v42 = vld [vmem:[%s1550_s0 + $0x14c] ss:$16 sps:$4 sm:$0xff]  }
   0xf   :  { %695 = vmatpush1.bf16.msra.mxu0 %v1040_v15  ;;  %777 = vmatpush1.bf16.msra.mxu1 %v1041_v16  ;;  %v1082_v43 = vld [vmem:[%s1550_s0 + $0x140] ss:$16 sps:$4 sm:$0xff]   ;;  %v1083_v44 = vld [vmem:[%s1550_s0 + $0x148] ss:$16 sps:$4 sm:$0xff]   ;;  %v1084_v45 = vld [vmem:[%s1550_s0 + $0x164] ss:$16 sps:$4 sm:$0xff]  }
  0x10   :  { %696 = vmatprep.subr.bf16.mxu0 %v1042_v17  ;;  %778 = vmatprep.subr.bf16.mxu1 %v1044_v18  ;;  %v1086_v46 = vld [vmem:[%s1550_s0 + $0x16c] ss:$16 sps:$4 sm:$0xff]   ;;  %v15_v47 = vld [vmem:[%s1551_s1] sm:$0xff]  ;;  %v1089_v50 = vld [vmem:[%s1550_s0 + $0x168] ss:$16 sps:$4 sm:$0xff]  }
  0x11   :  { %v887_v48 = vcombine.high %v15_v47, %v15_v47  ;;  %v1088_v49 = vld [vmem:[%s1550_s0 + $0x160] ss:$16 sps:$4 sm:$0xff]   ;;  %v1090_v51 = vld [vmem:[%s1550_s0 + $0x184] ss:$16 sps:$4 sm:$0xff]   ;;  %v1092_v52 = vld [vmem:[%s1550_s0 + $0x18c] ss:$16 sps:$4 sm:$0xff]   ;;  %v886_v6 = vcombine.low %v15_v47, %v15_v47 }
  0x12   :  { %v1094_v53 = vld [vmem:[%s1550_s0 + $0x180] ss:$16 sps:$4 sm:$0xff]   ;;  %v1095_v54 = vld [vmem:[%s1550_s0 + $0x188] ss:$16 sps:$4 sm:$0xff]   ;;  %v1096_v55 = vld [vmem:[%s1550_s0 + $0x1a4] ss:$16 sps:$4 sm:$0xff]  }
  0x13   :  { %697 = vmatpush1.bf16.msra.mxu0 %v1046_v19  ;;  %779 = vmatpush1.bf16.msra.mxu1 %v1047_v20  ;;  %v1098_v56 = vld [vmem:[%s1550_s0 + $0x1ac] ss:$16 sps:$4 sm:$0xff]   ;;  %v1100_v57 = vld [vmem:[%s1550_s0 + $0x1a0] ss:$16 sps:$4 sm:$0xff]   ;;  %v1101_v58 = vld [vmem:[%s1550_s0 + $0x1a8] ss:$16 sps:$4 sm:$0xff]  }
  0x14   :  { %698 = vmatprep.subr.bf16.mxu0 %v1048_v21  ;;  %780 = vmatprep.subr.bf16.mxu1 %v1050_v22  ;;  %v1102_v59 = vld [vmem:[%s1550_s0 + $0x1c4] ss:$16 sps:$4 sm:$0xff]   ;;  %v1104_v60 = vld [vmem:[%s1550_s0 + $0x1cc] ss:$16 sps:$4 sm:$0xff]   ;;  %v1106_v61 = vld [vmem:[%s1550_s0 + $0x1c0] ss:$16 sps:$4 sm:$0xff]  }
  0x15   :  { %720 = vmatprep.mubr.bf16.mxu0 %v887_v48  ;;  %802 = vmatprep.mubr.bf16.mxu1 %v887_v48  ;;  %v1107_v62 = vld [vmem:[%s1550_s0 + $0x1c8] ss:$16 sps:$4 sm:$0xff]   ;;  %v1108_v63 = vld [vmem:[%s1550_s0 + $0x1e4] ss:$16 sps:$4 sm:$0xff]   ;;  %v1110_v0 = vld [vmem:[%s1550_s0 + $0x1ec] ss:$16 sps:$4 sm:$0xff]  }
  0x16   :  { %v1112_v1 = vld [vmem:[%s1550_s0 + $0x1e0] ss:$16 sps:$4 sm:$0xff]   ;;  %v1113_v2 = vld [vmem:[%s1550_s0 + $0x1e8] ss:$16 sps:$4 sm:$0xff]   ;;  %v1120_v3 = vld [vmem:[%s1550_s0 + $0x204] ss:$16 sps:$4 sm:$0xff]  }
  0x17   :  { %699 = vmatpush1.bf16.msra.mxu0 %v1052_v23  ;;  %781 = vmatpush1.bf16.msra.mxu1 %v1053_v24  ;;  %v1123_v4 = vld [vmem:[%s1550_s0 + $0x20c] ss:$16 sps:$4 sm:$0xff]   ;;  %v1118_v7 = vld [vmem:[%s1550_s0 + $0x200] ss:$16 sps:$4 sm:$0xff]   ;;  %v1121_v8 = vld [vmem:[%s1550_s0 + $0x208] ss:$16 sps:$4 sm:$0xff]  }
  0x18   :  { %700 = vmatprep.subr.bf16.mxu0 %v1054_v25  ;;  %782 = vmatprep.subr.bf16.mxu1 %v1056_v26  ;;  %v1409_v5 = vld [vmem:[%s1551_s1 + $0x8] sm:$0xff]  ;;  %v1126_v9 = vld [vmem:[%s1550_s0 + $0x224] ss:$16 sps:$4 sm:$0xff]   ;;  %v1124_v12 = vld [vmem:[%s1550_s0 + $0x220] ss:$16 sps:$4 sm:$0xff]  }
  0x19   :  { %v1129_v10 = vld [vmem:[%s1550_s0 + $0x22c] ss:$16 sps:$4 sm:$0xff]   ;;  %v889_v11 = vcombine.high %v1409_v5, %v1409_v5  ;;  %v1127_v13 = vld [vmem:[%s1550_s0 + $0x228] ss:$16 sps:$4 sm:$0xff]   ;;  %v1132_v14 = vld [vmem:[%s1550_s0 + $0x244] ss:$16 sps:$4 sm:$0xff]  }
  0x1a   :  { %v1135_v15 = vld [vmem:[%s1550_s0 + $0x24c] ss:$16 sps:$4 sm:$0xff]   ;;  %v1130_v16 = vld [vmem:[%s1550_s0 + $0x240] ss:$16 sps:$4 sm:$0xff]   ;;  %v1133_v17 = vld [vmem:[%s1550_s0 + $0x248] ss:$16 sps:$4 sm:$0xff]  }
  0x1b   :  { %701 = vmatpush1.bf16.msra.mxu0 %v1058_v27  ;;  %783 = vmatpush1.bf16.msra.mxu1 %v1059_v28  ;;  %v125_v18 = vld [vmem:[%s1552_s2] sm:$0xff]  ;;  %v1141_v20 = vld [vmem:[%s1550_s0 + $0x26c] ss:$16 sps:$4 sm:$0xff]   ;;  %v1139_v22 = vld [vmem:[%s1550_s0 + $0x268] ss:$16 sps:$4 sm:$0xff]  }
  0x1c   :  { %702 = vmatprep.subr.bf16.mxu0 %v1060_v29  ;;  %784 = vmatprep.subr.bf16.mxu1 %v1062_v30  ;;  %v1138_v19 = vld [vmem:[%s1550_s0 + $0x264] ss:$16 sps:$4 sm:$0xff]   ;;  %v1136_v21 = vld [vmem:[%s1550_s0 + $0x260] ss:$16 sps:$4 sm:$0xff]   ;;  %v1147_v24 = vld [vmem:[%s1550_s0 + $0x28c] ss:$16 sps:$4 sm:$0xff]  }
  0x1d   :  { %128 = vperm.xlu0 %1017, %v125_v18   ;;  %v1144_v23 = vld [vmem:[%s1550_s0 + $0x284] ss:$16 sps:$4 sm:$0xff]   ;;  %v1142_v25 = vld [vmem:[%s1550_s0 + $0x280] ss:$16 sps:$4 sm:$0xff]   ;;  %v1145_v26 = vld [vmem:[%s1550_s0 + $0x288] ss:$16 sps:$4 sm:$0xff]  }
  0x1e   :  { %v1150_v27 = vld [vmem:[%s1550_s0 + $0x2a4] ss:$16 sps:$4 sm:$0xff]   ;;  %v1153_v28 = vld [vmem:[%s1550_s0 + $0x2ac] ss:$16 sps:$4 sm:$0xff]   ;;  %v1148_v29 = vld [vmem:[%s1550_s0 + $0x2a0] ss:$16 sps:$4 sm:$0xff]  }
  0x1f   :  { %703 = vmatpush1.bf16.msra.mxu0 %v1064_v31  ;;  %785 = vmatpush1.bf16.msra.mxu1 %v1065_v32  ;;  %v1151_v30 = vld [vmem:[%s1550_s0 + $0x2a8] ss:$16 sps:$4 sm:$0xff]   ;;  %v1156_v31 = vld [vmem:[%s1550_s0 + $0x2c4] ss:$16 sps:$4 sm:$0xff]   ;;  %v1159_v32 = vld [vmem:[%s1550_s0 + $0x2cc] ss:$16 sps:$4 sm:$0xff]  }
  0x20   :  { %704 = vmatprep.subr.bf16.mxu0 %v1066_v33  ;;  %786 = vmatprep.subr.bf16.mxu1 %v1068_v34  ;;  %v1154_v33 = vld [vmem:[%s1550_s0 + $0x2c0] ss:$16 sps:$4 sm:$0xff]   ;;  %v1157_v34 = vld [vmem:[%s1550_s0 + $0x2c8] ss:$16 sps:$4 sm:$0xff]   ;;  %v1180_v47 = vld [vmem:[%s1550_s0 + $0x344] ss:$16 sps:$4 sm:$0xff]  }
  0x21   :  { %v1183_v48 = vld [vmem:[%s1550_s0 + $0x34c] ss:$16 sps:$4 sm:$0xff]  }
  0x23   :  { %705 = vmatpush1.bf16.msra.mxu0 %v1070_v35  ;;  %787 = vmatpush1.bf16.msra.mxu1 %v1071_v36  ;;  %v1162_v35 = vld [vmem:[%s1550_s0 + $0x2e4] ss:$16 sps:$4 sm:$0xff]   ;;  %v1165_v36 = vld [vmem:[%s1550_s0 + $0x2ec] ss:$16 sps:$4 sm:$0xff]  }
  0x24   :  { %706 = vmatprep.subr.bf16.mxu0 %v1072_v37  ;;  %788 = vmatprep.subr.bf16.mxu1 %v1074_v38  ;;  %v1160_v37 = vld [vmem:[%s1550_s0 + $0x2e0] ss:$16 sps:$4 sm:$0xff]   ;;  %v1163_v38 = vld [vmem:[%s1550_s0 + $0x2e8] ss:$16 sps:$4 sm:$0xff]  }
  0x27   :  { %707 = vmatpush1.bf16.msra.mxu0 %v1076_v39  ;;  %789 = vmatpush1.bf16.msra.mxu1 %v1077_v40  ;;  %v1168_v39 = vld [vmem:[%s1550_s0 + $0x304] ss:$16 sps:$4 sm:$0xff]   ;;  %v1171_v40 = vld [vmem:[%s1550_s0 + $0x30c] ss:$16 sps:$4 sm:$0xff]  }
  0x28   :  { %708 = vmatprep.subr.bf16.mxu0 %v1078_v41  ;;  %790 = vmatprep.subr.bf16.mxu1 %v1080_v42  ;;  %v1166_v41 = vld [vmem:[%s1550_s0 + $0x300] ss:$16 sps:$4 sm:$0xff]   ;;  %v1169_v42 = vld [vmem:[%s1550_s0 + $0x308] ss:$16 sps:$4 sm:$0xff]  }
  0x2b   :  { %709 = vmatpush1.bf16.msra.mxu0 %v1082_v43  ;;  %791 = vmatpush1.bf16.msra.mxu1 %v1083_v44  ;;  %v1174_v43 = vld [vmem:[%s1550_s0 + $0x324] ss:$16 sps:$4 sm:$0xff]   ;;  %v1177_v44 = vld [vmem:[%s1550_s0 + $0x32c] ss:$16 sps:$4 sm:$0xff]  }
  0x2c   :  { %710 = vmatprep.subr.bf16.mxu0 %v1084_v45  ;;  %792 = vmatprep.subr.bf16.mxu1 %v1086_v46  ;;  %v1172_v45 = vld [vmem:[%s1550_s0 + $0x320] ss:$16 sps:$4 sm:$0xff]   ;;  %v1175_v46 = vld [vmem:[%s1550_s0 + $0x328] ss:$16 sps:$4 sm:$0xff]  }
  0x2f   :  { %711 = vmatpush1.bf16.msra.mxu0 %v1088_v49  ;;  %793 = vmatpush1.bf16.msra.mxu1 %v1089_v50  ;;  %v1178_v49 = vld [vmem:[%s1550_s0 + $0x340] ss:$16 sps:$4 sm:$0xff]   ;;  %v1181_v50 = vld [vmem:[%s1550_s0 + $0x348] ss:$16 sps:$4 sm:$0xff]  }
  0x30   :  { %712 = vmatprep.subr.bf16.mxu0 %v1090_v51  ;;  %794 = vmatprep.subr.bf16.mxu1 %v1092_v52  ;;  %v888_v51 = vcombine.low %v1409_v5, %v1409_v5 }
  0x33   :  { %713 = vmatpush1.bf16.msra.mxu0 %v1094_v53  ;;  %795 = vmatpush1.bf16.msra.mxu1 %v1095_v54 }
  0x34   :  { %714 = vmatprep.subr.bf16.mxu0 %v1096_v55  ;;  %796 = vmatprep.subr.bf16.mxu1 %v1098_v56 }
  0x37   :  { %715 = vmatpush1.bf16.msra.mxu0 %v1100_v57  ;;  %797 = vmatpush1.bf16.msra.mxu1 %v1101_v58 }
  0x38   :  { %716 = vmatprep.subr.bf16.mxu0 %v1102_v59  ;;  %798 = vmatprep.subr.bf16.mxu1 %v1104_v60 }
  0x3b   :  { %717 = vmatpush1.bf16.msra.mxu0 %v1106_v61  ;;  %799 = vmatpush1.bf16.msra.mxu1 %v1107_v62 }
  0x3c   :  { %718 = vmatprep.subr.bf16.mxu0 %v1108_v63  ;;  %800 = vmatprep.subr.bf16.mxu1 %v1110_v0 }
  0x3f   :  { %719 = vmatpush1.bf16.msra.mxu0 %v1112_v1  ;;  %801 = vmatpush1.bf16.msra.mxu1 %v1113_v2 }
  0x40   :  { %729 = vmatprep.subr.bf16.mxu0 %v1120_v3  ;;  %811 = vmatprep.subr.bf16.mxu1 %v1123_v4 }
  0x42   :  { %721 = vmatmul.mubr.bf16.vlgmr.msra.gmra.mrb[0].mxu0 %v886_v6  ;;  %803 = vmatmul.mubr.bf16.vlgmr.msra.gmra.mrb[0].mxu1 %v886_v6 }
  0x43   :  { %730 = vmatpush1.bf16.msra.mxu0 %v1118_v7  ;;  %812 = vmatpush1.bf16.msra.mxu1 %v1121_v8 }
  0x44   :  { %731 = vmatprep.subr.bf16.mxu0 %v1126_v9  ;;  %813 = vmatprep.subr.bf16.mxu1 %v1129_v10 }
  0x45   :  { %998 = vmatprep.mubr.msk.bf16.mxu0 %vm684_vm0, %v889_v11  ;;  %999 = vmatprep.mubr.msk.bf16.mxu1 %vm684_vm0, %v889_v11 }
  0x47   :  { %732 = vmatpush1.bf16.msra.mxu0 %v1124_v12  ;;  %814 = vmatpush1.bf16.msra.mxu1 %v1127_v13 }
  0x48   :  { %733 = vmatprep.subr.bf16.mxu0 %v1132_v14  ;;  %815 = vmatprep.subr.bf16.mxu1 %v1135_v15 }
  0x4b   :  { %734 = vmatpush1.bf16.msra.mxu0 %v1130_v16  ;;  %816 = vmatpush1.bf16.msra.mxu1 %v1133_v17 }
  0x4c   :  { %735 = vmatprep.subr.bf16.mxu0 %v1138_v19  ;;  %817 = vmatprep.subr.bf16.mxu1 %v1141_v20 }
  0x4f   :  { %736 = vmatpush1.bf16.msra.mxu0 %v1136_v21  ;;  %818 = vmatpush1.bf16.msra.mxu1 %v1139_v22 }
  0x50   :  { %737 = vmatprep.subr.bf16.mxu0 %v1144_v23  ;;  %819 = vmatprep.subr.bf16.mxu1 %v1147_v24 }
  0x53   :  { %738 = vmatpush1.bf16.msra.mxu0 %v1142_v25  ;;  %820 = vmatpush1.bf16.msra.mxu1 %v1145_v26 }
  0x54   :  { %739 = vmatprep.subr.bf16.mxu0 %v1150_v27  ;;  %821 = vmatprep.subr.bf16.mxu1 %v1153_v28 }
  0x57   :  { %740 = vmatpush1.bf16.msra.mxu0 %v1148_v29  ;;  %822 = vmatpush1.bf16.msra.mxu1 %v1151_v30 }
  0x58   :  { %741 = vmatprep.subr.bf16.mxu0 %v1156_v31  ;;  %823 = vmatprep.subr.bf16.mxu1 %v1159_v32 }
  0x5b   :  { %742 = vmatpush1.bf16.msra.mxu0 %v1154_v33  ;;  %824 = vmatpush1.bf16.msra.mxu1 %v1157_v34 }
  0x5c   :  { %743 = vmatprep.subr.bf16.mxu0 %v1162_v35  ;;  %825 = vmatprep.subr.bf16.mxu1 %v1165_v36 }
  0x5f   :  { %744 = vmatpush1.bf16.msra.mxu0 %v1160_v37  ;;  %826 = vmatpush1.bf16.msra.mxu1 %v1163_v38 }
  0x60   :  { %745 = vmatprep.subr.bf16.mxu0 %v1168_v39  ;;  %827 = vmatprep.subr.bf16.mxu1 %v1171_v40 }
  0x63   :  { %746 = vmatpush1.bf16.msra.mxu0 %v1166_v41  ;;  %828 = vmatpush1.bf16.msra.mxu1 %v1169_v42 }
  0x64   :  { %747 = vmatprep.subr.bf16.mxu0 %v1174_v43  ;;  %829 = vmatprep.subr.bf16.mxu1 %v1177_v44 }
  0x67   :  { %748 = vmatpush1.bf16.msra.mxu0 %v1172_v45  ;;  %830 = vmatpush1.bf16.msra.mxu1 %v1175_v46 }
  0x68   :  { %749 = vmatprep.subr.bf16.mxu0 %v1180_v47  ;;  %831 = vmatprep.subr.bf16.mxu1 %v1183_v48 }
  0x6b   :  { %750 = vmatpush1.bf16.msra.mxu0 %v1178_v49  ;;  %832 = vmatpush1.bf16.msra.mxu1 %v1181_v50 }
  0x6e   :  { %762 = vmatmul.mubr.bf16.vlgmr.msra.gmra.mrb[0].mxu0 %v888_v51  ;;  %844 = vmatmul.mubr.bf16.vlgmr.msra.gmra.mrb[0].mxu1 %v888_v51 }
  0x9c   :  { %v129_v52 = vpop.permute.xlu0 %128 }
 0x141   :  { %v763_v53 = vpop.f32.mrb[0].mxu0  ;;  %v845_v54 = vpop.f32.mrb[0].mxu1 }
 0x142   :  { %v1004_v55 = vadd.f32 %v763_v53, %v129_v52  ;;  %v1006_v56 = vadd.f32 %v845_v54, %v129_v52  ;;  %v765_v57 = vpop.f32.mrb[1].mxu0  ;;  %v847_v58 = vpop.f32.mrb[1].mxu1 }
 0x143   :  { %v1005_v59 = vadd.f32 %v765_v57, %v129_v52  ;;  %v1007_v60 = vadd.f32 %v847_v58, %v129_v52  ;;  %v767_v61 = vpop.f32.mrb[2].mxu0  ;;  %v849_v62 = vpop.f32.mrb[2].mxu1 }
 0x144   :  { %vm852_vm1 = vcmp.ge.f32.partialorder %v1004_v55, 0.0  ;;  %v856_v63 = vmul.f32 0.01, %v1004_v55  ;;  %vm854_vm2 = vcmp.ge.f32.partialorder %v1006_v56, 0.0  ;;  %v858_v0 = vmul.f32 0.01, %v1006_v56 }
 0x145   :  { %vm853_vm3 = vcmp.ge.f32.partialorder %v1005_v59, 0.0  ;;  %v857_v1 = vmul.f32 0.01, %v1005_v59  ;;  %vm855_vm4 = vcmp.ge.f32.partialorder %v1007_v60, 0.0  ;;  %v859_v2 = vmul.f32 0.01, %v1007_v60 }
 0x146   :  { %v860_v3 = vsel %vm852_vm1, %v1004_v55, %v856_v63  ;;  %v862_v4 = vsel %vm854_vm2, %v1006_v56, %v858_v0  ;;  %v768_v5 = vpop.f32.mrb[3].mxu0  ;;  %v850_v6 = vpop.f32.mrb[3].mxu1 }
 0x147   :  { %v861_v7 = vsel %vm853_vm3, %v1005_v59, %v857_v1  ;;  %v863_v8 = vsel %vm855_vm4, %v1007_v60, %v859_v2 }
 0x148   :  { %v1002_v9 = vpack.c.bf16 %v861_v7, %v860_v3  ;;  %v1003_v10 = vpack.c.bf16 %v863_v8, %v862_v4 }
 0x14a   :  { %880 = vst [vmem:[%s1553_s3] sm:$0xff] %v1002_v9  ;;  %881 = vst [vmem:[%s1553_s3 + $0x8] sm:$0xff] %v1003_v10 }

// kernel: downup_forward.34
= control target key start
LH: loop header
LB: loop body
LE: loop exit
PB: predicated region body
PF: predicated region fallthrough
CT: control target
= control target key end

     0   :  { %v637_v1 = vmov 0   ;;  %vm352_vm0 = vcmask 719872   ;;  %vm356_vm1 = vcmask 1043456   ;;  %s832_s0 = inlined_call_operand.vmem [shape: bf16[216,512], index: 0, kind: input, shape index: {}]   ;;  %s833_s1 = inlined_call_operand.vmem [shape: bf16[8,216], index: 1, kind: input, shape index: {}]   ;;  %s834_s2 = inlined_call_operand.vmem [shape: f32[8,1], index: 2, kind: input, shape index: {}]   ;;  %s835_s3 = inlined_call_operand.vmem [shape: bf16[8,512], index: 3, kind: output, shape index: {}]  }
   0x1   :  { %v553_v0 = vld [vmem:[%s832_s0 + $0x4] ss:$16 sps:$4 sm:$0xff]   ;;  %552 = vset.pattern.permute.xlu0 %v637_v1  ;;  %v555_v2 = vld [vmem:[%s832_s0 + $0xc] ss:$16 sps:$4 sm:$0xff]   ;;  %v557_v3 = vld [vmem:[%s832_s0] ss:$16 sps:$4 sm:$0xff]  }
   0x2   :  { %369 = vmatprep.subr.bf16.mxu0 %v553_v0  ;;  %v558_v4 = vld [vmem:[%s832_s0 + $0x8] ss:$16 sps:$4 sm:$0xff]   ;;  %410 = vmatprep.subr.bf16.mxu1 %v555_v2  ;;  %v559_v5 = vld [vmem:[%s832_s0 + $0x24] ss:$16 sps:$4 sm:$0xff]   ;;  %v561_v6 = vld [vmem:[%s832_s0 + $0x2c] ss:$16 sps:$4 sm:$0xff]  }
   0x3   :  { %370 = vmatpush1.bf16.msra.mxu0 %v557_v3  ;;  %411 = vmatpush1.bf16.msra.mxu1 %v558_v4  ;;  %v563_v7 = vld [vmem:[%s832_s0 + $0x20] ss:$16 sps:$4 sm:$0xff]   ;;  %v564_v8 = vld [vmem:[%s832_s0 + $0x28] ss:$16 sps:$4 sm:$0xff]   ;;  %v565_v9 = vld [vmem:[%s832_s0 + $0x44] ss:$16 sps:$4 sm:$0xff]  }
   0x4   :  { %371 = vmatprep.subr.bf16.mxu0 %v559_v5  ;;  %412 = vmatprep.subr.bf16.mxu1 %v561_v6  ;;  %v567_v10 = vld [vmem:[%s832_s0 + $0x4c] ss:$16 sps:$4 sm:$0xff]   ;;  %v569_v11 = vld [vmem:[%s832_s0 + $0x40] ss:$16 sps:$4 sm:$0xff]   ;;  %v570_v12 = vld [vmem:[%s832_s0 + $0x48] ss:$16 sps:$4 sm:$0xff]  }
   0x5   :  { %v571_v13 = vld [vmem:[%s832_s0 + $0x64] ss:$16 sps:$4 sm:$0xff]   ;;  %v573_v14 = vld [vmem:[%s832_s0 + $0x6c] ss:$16 sps:$4 sm:$0xff]   ;;  %v575_v15 = vld [vmem:[%s832_s0 + $0x60] ss:$16 sps:$4 sm:$0xff]  }
   0x6   :  { %v576_v16 = vld [vmem:[%s832_s0 + $0x68] ss:$16 sps:$4 sm:$0xff]   ;;  %v577_v17 = vld [vmem:[%s832_s0 + $0x84] ss:$16 sps:$4 sm:$0xff]   ;;  %v579_v18 = vld [vmem:[%s832_s0 + $0x8c] ss:$16 sps:$4 sm:$0xff]  }
   0x7   :  { %372 = vmatpush1.bf16.msra.mxu0 %v563_v7  ;;  %413 = vmatpush1.bf16.msra.mxu1 %v564_v8  ;;  %v581_v19 = vld [vmem:[%s832_s0 + $0x80] ss:$16 sps:$4 sm:$0xff]   ;;  %v582_v20 = vld [vmem:[%s832_s0 + $0x88] ss:$16 sps:$4 sm:$0xff]   ;;  %v583_v21 = vld [vmem:[%s832_s0 + $0xa4] ss:$16 sps:$4 sm:$0xff]  }
   0x8   :  { %373 = vmatprep.subr.bf16.mxu0 %v565_v9  ;;  %414 = vmatprep.subr.bf16.mxu1 %v567_v10  ;;  %v585_v22 = vld [vmem:[%s832_s0 + $0xac] ss:$16 sps:$4 sm:$0xff]   ;;  %v587_v23 = vld [vmem:[%s832_s0 + $0xa0] ss:$16 sps:$4 sm:$0xff]   ;;  %v588_v24 = vld [vmem:[%s832_s0 + $0xa8] ss:$16 sps:$4 sm:$0xff]  }
   0x9   :  { %v589_v25 = vld [vmem:[%s832_s0 + $0xc4] ss:$16 sps:$4 sm:$0xff]   ;;  %v591_v26 = vld [vmem:[%s832_s0 + $0xcc] ss:$16 sps:$4 sm:$0xff]   ;;  %v593_v27 = vld [vmem:[%s832_s0 + $0xc0] ss:$16 sps:$4 sm:$0xff]  }
   0xa   :  { %v594_v28 = vld [vmem:[%s832_s0 + $0xc8] ss:$16 sps:$4 sm:$0xff]   ;;  %v595_v29 = vld [vmem:[%s832_s0 + $0xe4] ss:$16 sps:$4 sm:$0xff]   ;;  %v597_v30 = vld [vmem:[%s832_s0 + $0xec] ss:$16 sps:$4 sm:$0xff]  }
   0xb   :  { %374 = vmatpush1.bf16.msra.mxu0 %v569_v11  ;;  %415 = vmatpush1.bf16.msra.mxu1 %v570_v12  ;;  %v599_v31 = vld [vmem:[%s832_s0 + $0xe0] ss:$16 sps:$4 sm:$0xff]   ;;  %v600_v32 = vld [vmem:[%s832_s0 + $0xe8] ss:$16 sps:$4 sm:$0xff]   ;;  %v601_v33 = vld [vmem:[%s832_s0 + $0x104] ss:$16 sps:$4 sm:$0xff]  }
   0xc   :  { %375 = vmatprep.subr.bf16.mxu0 %v571_v13  ;;  %416 = vmatprep.subr.bf16.mxu1 %v573_v14  ;;  %v603_v34 = vld [vmem:[%s832_s0 + $0x10c] ss:$16 sps:$4 sm:$0xff]   ;;  %v605_v35 = vld [vmem:[%s832_s0 + $0x100] ss:$16 sps:$4 sm:$0xff]   ;;  %v606_v36 = vld [vmem:[%s832_s0 + $0x108] ss:$16 sps:$4 sm:$0xff]  }
   0xd   :  { %v607_v37 = vld [vmem:[%s832_s0 + $0x124] ss:$16 sps:$4 sm:$0xff]   ;;  %v609_v38 = vld [vmem:[%s832_s0 + $0x12c] ss:$16 sps:$4 sm:$0xff]   ;;  %v611_v41 = vld [vmem:[%s832_s0 + $0x120] ss:$16 sps:$4 sm:$0xff]  }
   0xe   :  { %v15_v39 = vld [vmem:[%s833_s1] sm:$0xff]  ;;  %v612_v42 = vld [vmem:[%s832_s0 + $0x128] ss:$16 sps:$4 sm:$0xff]   ;;  %v615_v44 = vld [vmem:[%s832_s0 + $0x14c] ss:$16 sps:$4 sm:$0xff]  }
   0xf   :  { %376 = vmatpush1.bf16.msra.mxu0 %v575_v15  ;;  %417 = vmatpush1.bf16.msra.mxu1 %v576_v16  ;;  %v70_v40 = vld [vmem:[%s834_s2] sm:$0xff]  ;;  %v486_v45 = vcombine.high %v15_v39, %v15_v39  ;;  %v618_v47 = vld [vmem:[%s832_s0 + $0x148] ss:$16 sps:$4 sm:$0xff]   ;;  %v621_v49 = vld [vmem:[%s832_s0 + $0x16c] ss:$16 sps:$4 sm:$0xff]   ;;  %v485_v0 = vcombine.low %v15_v39, %v15_v39 }
  0x10   :  { %377 = vmatprep.subr.bf16.mxu0 %v577_v17  ;;  %418 = vmatprep.subr.bf16.mxu1 %v579_v18  ;;  %v613_v43 = vld [vmem:[%s832_s0 + $0x144] ss:$16 sps:$4 sm:$0xff]   ;;  %v617_v46 = vld [vmem:[%s832_s0 + $0x140] ss:$16 sps:$4 sm:$0xff]   ;;  %v624_v51 = vld [vmem:[%s832_s0 + $0x168] ss:$16 sps:$4 sm:$0xff]  }
  0x11   :  { %73 = vperm.xlu0 %552, %v70_v40   ;;  %544 = vmatprep.mubr.msk.bf16.mxu0 %vm352_vm0, %v486_v45  ;;  %v619_v48 = vld [vmem:[%s832_s0 + $0x164] ss:$16 sps:$4 sm:$0xff]   ;;  %v623_v50 = vld [vmem:[%s832_s0 + $0x160] ss:$16 sps:$4 sm:$0xff]   ;;  %v627_v53 = vld [vmem:[%s832_s0 + $0x18c] ss:$16 sps:$4 sm:$0xff]  }
  0x12   :  { %546 = vmatprep.mubr.msk.bf16.mxu1 %vm352_vm0, %v486_v45  ;;  %v625_v52 = vld [vmem:[%s832_s0 + $0x184] ss:$16 sps:$4 sm:$0xff]   ;;  %v69_v55 = vld [vmem:[%s832_s0 + $0x1a8] sm:$0xff]  ;;  %v629_v56 = vld [vmem:[%s832_s0 + $0x180] ss:$16 sps:$4 sm:$0xff]  }
  0x13   :  { %378 = vmatpush1.bf16.msra.mxu0 %v581_v19  ;;  %419 = vmatpush1.bf16.msra.mxu1 %v582_v20  ;;  %v68_v54 = vld [vmem:[%s832_s0 + $0x1a0] sm:$0xff]  ;;  %v630_v57 = vld [vmem:[%s832_s0 + $0x188] ss:$16 sps:$4 sm:$0xff]   ;;  %v542_v59 = vcombine.high %v69_v55, %v69_v55  ;;  %v541_v61 = vcombine.low %v69_v55, %v69_v55 }
  0x14   :  { %379 = vmatprep.subr.bf16.mxu0 %v583_v21  ;;  %420 = vmatprep.subr.bf16.mxu1 %v585_v22  ;;  %v540_v58 = vcombine.high %v68_v54, %v68_v54  ;;  %v539_v60 = vcombine.low %v68_v54, %v68_v54 }
  0x15   :  { %v364_v63 = vsel %vm356_vm1, %v541_v61, 0 }
  0x16   :  { %v358_v62 = vsel %vm356_vm1, %v539_v60, 0 }
  0x17   :  { %380 = vmatpush1.bf16.msra.mxu0 %v587_v23  ;;  %421 = vmatpush1.bf16.msra.mxu1 %v588_v24 }
  0x18   :  { %381 = vmatprep.subr.bf16.mxu0 %v589_v25  ;;  %422 = vmatprep.subr.bf16.mxu1 %v591_v26 }
  0x1b   :  { %382 = vmatpush1.bf16.msra.mxu0 %v593_v27  ;;  %423 = vmatpush1.bf16.msra.mxu1 %v594_v28 }
  0x1c   :  { %383 = vmatprep.subr.bf16.mxu0 %v595_v29  ;;  %424 = vmatprep.subr.bf16.mxu1 %v597_v30 }
  0x1f   :  { %384 = vmatpush1.bf16.msra.mxu0 %v599_v31  ;;  %425 = vmatpush1.bf16.msra.mxu1 %v600_v32 }
  0x20   :  { %385 = vmatprep.subr.bf16.mxu0 %v601_v33  ;;  %426 = vmatprep.subr.bf16.mxu1 %v603_v34 }
  0x23   :  { %386 = vmatpush1.bf16.msra.mxu0 %v605_v35  ;;  %427 = vmatpush1.bf16.msra.mxu1 %v606_v36 }
  0x24   :  { %387 = vmatprep.subr.bf16.mxu0 %v607_v37  ;;  %428 = vmatprep.subr.bf16.mxu1 %v609_v38 }
  0x27   :  { %388 = vmatpush1.bf16.msra.mxu0 %v611_v41  ;;  %429 = vmatpush1.bf16.msra.mxu1 %v612_v42 }
  0x28   :  { %389 = vmatprep.subr.bf16.mxu0 %v613_v43  ;;  %430 = vmatprep.subr.bf16.mxu1 %v615_v44 }
  0x2b   :  { %390 = vmatpush1.bf16.msra.mxu0 %v617_v46  ;;  %431 = vmatpush1.bf16.msra.mxu1 %v618_v47 }
  0x2c   :  { %391 = vmatprep.subr.bf16.mxu0 %v619_v48  ;;  %432 = vmatprep.subr.bf16.mxu1 %v621_v49 }
  0x2f   :  { %392 = vmatpush1.bf16.msra.mxu0 %v623_v50  ;;  %433 = vmatpush1.bf16.msra.mxu1 %v624_v51 }
  0x30   :  { %393 = vmatprep.subr.bf16.mxu0 %v625_v52  ;;  %434 = vmatprep.subr.bf16.mxu1 %v627_v53 }
  0x33   :  { %394 = vmatpush1.bf16.msra.mxu0 %v629_v56  ;;  %435 = vmatpush1.bf16.msra.mxu1 %v630_v57 }
  0x34   :  { %543 = vmatprep.subr.msk.bf16.mxu0 %vm356_vm1, %v540_v58  ;;  %545 = vmatprep.subr.msk.bf16.mxu1 %vm356_vm1, %v542_v59 }
  0x37   :  { %396 = vmatpush1.bf16.msra.mxu0 %v358_v62  ;;  %437 = vmatpush1.bf16.msra.mxu1 %v364_v63 }
  0x3a   :  { %402 = vmatmul.mubr.bf16.vlgmr.msra.gmra.mrb[0].mxu0 %v485_v0  ;;  %443 = vmatmul.mubr.bf16.vlgmr.msra.gmra.mrb[0].mxu1 %v485_v0 }
  0x90   :  { %v74_v1 = vpop.permute.xlu0 %73 }
 0x10d   :  { %v403_v2 = vpop.f32.mrb[0].mxu0  ;;  %v444_v3 = vpop.f32.mrb[0].mxu1 }
 0x10e   :  { %v404_v4 = vadd.f32 %v403_v2, %v74_v1  ;;  %v445_v5 = vadd.f32 %v444_v3, %v74_v1  ;;  %v405_v6 = vpop.f32.mrb[1].mxu0  ;;  %v446_v7 = vpop.f32.mrb[1].mxu1 }
 0x10f   :  { %v406_v8 = vadd.f32 %v405_v6, %v74_v1  ;;  %v447_v9 = vadd.f32 %v446_v7, %v74_v1  ;;  %v407_v10 = vpop.f32.mrb[2].mxu0  ;;  %v448_v11 = vpop.f32.mrb[2].mxu1 }
 0x110   :  { %vm451_vm2 = vcmp.ge.f32.partialorder %v404_v4, 0.0  ;;  %v455_v12 = vmul.f32 0.01, %v404_v4  ;;  %vm453_vm3 = vcmp.ge.f32.partialorder %v445_v5, 0.0  ;;  %v457_v13 = vmul.f32 0.01, %v445_v5 }
 0x111   :  { %vm452_vm4 = vcmp.ge.f32.partialorder %v406_v8, 0.0  ;;  %v456_v14 = vmul.f32 0.01, %v406_v8  ;;  %vm454_vm5 = vcmp.ge.f32.partialorder %v447_v9, 0.0  ;;  %v458_v15 = vmul.f32 0.01, %v447_v9 }
 0x112   :  { %v459_v16 = vsel %vm451_vm2, %v404_v4, %v455_v12  ;;  %v461_v17 = vsel %vm453_vm3, %v445_v5, %v457_v13  ;;  %v408_v18 = vpop.f32.mrb[3].mxu0  ;;  %v449_v19 = vpop.f32.mrb[3].mxu1 }
 0x113   :  { %v460_v20 = vsel %vm452_vm4, %v406_v8, %v456_v14  ;;  %v462_v21 = vsel %vm454_vm5, %v447_v9, %v458_v15 }
 0x114   :  { %v549_v22 = vpack.c.bf16 %v460_v20, %v459_v16  ;;  %v550_v23 = vpack.c.bf16 %v462_v21, %v461_v17 }
 0x116   :  { %479 = vst [vmem:[%s835_s3] sm:$0xff] %v549_v22  ;;  %480 = vst [vmem:[%s835_s3 + $0x8] sm:$0xff] %v550_v23 }

// kernel: downup_forward.35
= control target key start
LH: loop header
LB: loop body
LE: loop exit
PB: predicated region body
PF: predicated region fallthrough
CT: control target
= control target key end

     0   :  { %vm38_vm0 = vcmask 1043456   ;;  %v278_v2 = vmov 0   ;;  %vm34_vm1 = vcmask 64512   ;;  %v279_v48 = vmov 1966171168   ;;  %s322_s0 = inlined_call_operand.vmem [shape: bf16[8,512], index: 0, kind: input, shape index: {}]   ;;  %s323_s2 = inlined_call_operand.vmem [shape: f32[2,1], index: 2, kind: input, shape index: {}]   ;;  %s324_s1 = inlined_call_operand.vmem [shape: bf16[2,8], index: 1, kind: input, shape index: {}]   ;;  %s325_s3 = inlined_call_operand.vmem [shape: f32[2,512], index: 3, kind: output, shape index: {}]  }
   0x1   :  { %v16_v0 = vld [vmem:[%s322_s0] sm:$0xff]  ;;  %v17_v1 = vld [vmem:[%s322_s0 + $0x8] sm:$0xff]  ;;  %83 = vmatprep.mubr.bf16.mxu0 %v278_v2  ;;  %124 = vmatprep.mubr.bf16.mxu1 %v278_v2  ;;  %v180_v49 = vunpack.c.l.s4 %v279_v48  ;;  %v182_v50 = vlaneseq }
   0x2   :  { %v247_v3 = vcombine.high %v16_v0, %v16_v0  ;;  %v249_v4 = vcombine.high %v17_v1, %v17_v1  ;;  %v246_v5 = vcombine.low %v16_v0, %v16_v0  ;;  %v248_v6 = vcombine.low %v17_v1, %v17_v1  ;;  %257 = vset.pattern.permute.xlu0 %v278_v2  ;;  %v18_v7 = vld [vmem:[%s323_s2] sm:$0x3] }
   0x3   :  { %21 = vperm.xlu0 %257, %v18_v7   ;;  %v15_v10 = vld [vmem:[%s324_s1] sm:$0x1]  ;;  %v181_v51 = vunpack.c.0.s8 %v180_v49  ;;  %v183_v52 = vshrl.u32 %v182_v50, 7  ;;  %vm204_vm2 = vcmp.lt.s32.totalorder %v182_v50, 512 }
   0x4   :  { %250 = vmatprep.subr.msk.bf16.mxu0 %vm38_vm0, %v247_v3  ;;  %252 = vmatprep.subr.msk.bf16.mxu1 %vm38_vm0, %v249_v4  ;;  %v40_v8 = vsel %vm38_vm0, %v246_v5, 0  ;;  %v46_v9 = vsel %vm38_vm0, %v248_v6, 0 }
   0x5   :  { %52 = vmatpush1.bf16.msra.mxu0 %v40_v8  ;;  %93 = vmatpush1.bf16.msra.mxu1 %v46_v9  ;;  %v184_v56 = vsub.s32 %v181_v51, %v183_v52 }
   0x8   :  { %251 = vmatmul.mubr.msk.bf16.vlgmr.msra.gmra.mrb[0].mxu0 %vm34_vm1, %v15_v10  ;;  %253 = vmatmul.mubr.msk.bf16.vlgmr.msra.gmra.mrb[0].mxu1 %vm34_vm1, %v15_v10 }
  0x82   :  { %v22_v11 = vpop.permute.xlu0 %21 }
  0xdb   :  { %v85_v12 = vpop.f32.mrb[0].mxu0  ;;  %v126_v13 = vpop.f32.mrb[0].mxu1 }
  0xdc   :  { %v86_v14 = vadd.f32 %v85_v12, %v22_v11  ;;  %v127_v15 = vadd.f32 %v126_v13, %v22_v11  ;;  %v87_v16 = vpop.f32.mrb[1].mxu0  ;;  %v128_v17 = vpop.f32.mrb[1].mxu1 }
  0xdd   :  { %v88_v18 = vadd.f32 %v87_v16, %v22_v11  ;;  %v129_v19 = vadd.f32 %v128_v17, %v22_v11  ;;  %v89_v20 = vpop.f32.mrb[2].mxu0  ;;  %v130_v21 = vpop.f32.mrb[2].mxu1 }
  0xde   :  { %v137_v22 = vrot.slane %v86_v14, 1  ;;  %v139_v23 = vrot.slane %v127_v15, 1  ;;  %v90_v24 = vpop.f32.mrb[3].mxu0  ;;  %v131_v25 = vpop.f32.mrb[3].mxu1 }
  0xdf   :  { %v138_v26 = vrot.slane %v88_v18, 1  ;;  %v140_v27 = vrot.slane %v129_v19, 1 }
  0xe0   :  { %v145_v28 = vsub.f32 %v86_v14, %v137_v22  ;;  %v147_v29 = vsub.f32 %v127_v15, %v139_v23 }
  0xe1   :  { %v146_v30 = vsub.f32 %v88_v18, %v138_v26  ;;  %v148_v31 = vsub.f32 %v129_v19, %v140_v27 }
  0xe2   :  { %v149_v32 = vsub.f32 0.0, %v145_v28  ;;  %v151_v33 = vsub.f32 0.0, %v147_v29 }
  0xe3   :  { %v150_v34 = vsub.f32 0.0, %v146_v30  ;;  %v152_v35 = vsub.f32 0.0, %v148_v31 }
  0xe4   :  { %v153_v36 = vmul.f32 1.442695, %v149_v32  ;;  %v157_v37 = vmul.f32 1.442695, %v151_v33 }
  0xe5   :  { %v155_v38 = vmul.f32 1.442695, %v150_v34  ;;  %v159_v39 = vmul.f32 1.442695, %v152_v35 }
  0xe6   :  { %262 = vpow2.f32 %v153_v36 }
  0xe7   :  { %264 = vpow2.f32 %v157_v37 }
  0xe8   :  { %266 = vpow2.f32 %v155_v38 }
  0xe9   :  { %268 = vpow2.f32 %v159_v39 }
  0xf0   :  { %v263_v40 = vpop.eup %262 }
  0xf1   :  { %v265_v41 = vpop.eup %264  ;;  %v161_v42 = vadd.f32 1.0, %v263_v40 }
  0xf2   :  { %v267_v43 = vpop.eup %266  ;;  %v163_v44 = vadd.f32 1.0, %v265_v41 }
  0xf3   :  { %v269_v45 = vpop.eup %268  ;;  %270 = vrcp.f32 %v161_v42  ;;  %v162_v46 = vadd.f32 1.0, %v267_v43 }
  0xf4   :  { %272 = vrcp.f32 %v163_v44  ;;  %v164_v47 = vadd.f32 1.0, %v269_v45 }
  0xf5   :  { %274 = vrcp.f32 %v162_v46 }
  0xf6   :  { %276 = vrcp.f32 %v164_v47 }
  0xfd   :  { %v271_v53 = vpop.eup %270 }
  0xfe   :  { %v273_v54 = vpop.eup %272  ;;  %v207_v55 = vsub.f32 1.0, %v271_v53 }
  0xff   :  { %v275_v57 = vpop.eup %274  ;;  %v209_v58 = vsub.f32 1.0, %v273_v54 }
 0x100   :  { %v277_v59 = vpop.eup %276  ;;  %v177_v60 = vcombine.low %v271_v53, %v275_v57  ;;  %v208_v61 = vsub.f32 1.0, %v275_v57 }
 0x101   :  { %v178_v62 = vcombine.low %v273_v54, %v277_v59  ;;  %v210_v63 = vsub.f32 1.0, %v277_v59 }
 0x102   :  { %v185_v0 = vrot.slane %v177_v60, %v184_v56  ;;  %v215_v1 = vcombine.low %v207_v55, %v208_v61 }
 0x103   :  { %v192_v2 = vrot.slane %v178_v62, %v184_v56  ;;  %v216_v3 = vcombine.low %v209_v58, %v210_v63 }
 0x104   :  { %v223_v4 = vrot.slane %v215_v1, %v184_v56 }
 0x105   :  { %v193_v5 = vcombine.low %v185_v0, %v192_v2  ;;  %v230_v6 = vrot.slane %v216_v3, %v184_v56 }
 0x107   :  { %v200_v7 = vrot.slane %v193_v5, %v184_v56  ;;  %v231_v8 = vcombine.low %v223_v4, %v230_v6 }
 0x109   :  { %206 = vst.msk [vmem:[%s325_s3] ss:$2 sm:$0xf] %vm204_vm2, %v200_v7  ;;  %v238_v9 = vrot.slane %v231_v8, %v184_v56 }
 0x10b   :  { %254 = vst.msk [vmem:[%s325_s3 + $0x1] ss:$2 sm:$0xf] %vm204_vm2, %v238_v9 }

</bundles_post_ra>
